<compile_context>
chip_gen: v7x
topology: tpu7x:2x2x1
jax: 0.10.0
libtpu: 0.0.40
codegen_flags: <defaults>
</compile_context>

<pallas_src>
import functools
import math

import jax
import jax.numpy as jnp
from jax import lax
from jax.experimental import pallas as pl
from jax.experimental.pallas import tpu as pltpu


# ----------------------------- spec helpers ---------------------------------

def _full_spec(shape):
    """BlockSpec covering the whole array, independent of grid position."""
    n = len(shape)
    return pl.BlockSpec(shape, lambda *args, n=n: (0,) * n)


def _batch_spec(shape):
    """Leading block dim indexed by the single grid axis; rest start at 0."""
    n = len(shape)
    return pl.BlockSpec(shape, lambda b, n=n: (b,) + (0,) * (n - 1))


# ----------------------------- fused visual/semantic kernel -----------------

def vis_sem_kernel(q_ref, kmask_ref, role_ref, rmask_ref, obj_ref, sent_ref,
                   img_ref, wq_ref, bq_ref, wk_ref, bk_ref, wv_ref, bv_ref,
                   wo_ref, bo_ref, wa_ref, wg_ref, bg_ref, o_ref, *, num_heads):
    """Per batch element: pooling -> 4x cross-attention -> attention-GCN."""
    f32, bf16 = jnp.float32, jnp.bfloat16
    q_tok = q_ref[0]                                   # [T, h] question tokens (K/V)
    T, h = q_tok.shape
    nh = num_heads
    hd = h // nh

    # additive key-padding bias, kept in f32 so the softmax stays exact
    valid = kmask_ref[0]                               # [1, T]; 1 = attend
    kbias = (1.0 - valid) * (-1e9)

    # ---- role masked-mean pooling (single >0 mask for numerator and count;
    #      role ids are non-negative so this matches masked_fill(mask==0)) ----
    re = role_ref[0]                                   # [nk, 10, h]
    keep = (rmask_ref[0] > 0.0).astype(f32)            # [nk, 10, 1]
    cnt = jnp.sum(keep, axis=1)                        # [nk, 1]
    cnt = jnp.where(cnt == 0.0, 10.0, cnt)
    role_pooled = jnp.sum(re * keep, axis=1) / cnt     # [nk, h]

    # ---- object mean pooling ----
    obj_pooled = jnp.mean(obj_ref[0], axis=1)          # [ni, h]
    sent = sent_ref[0]                                 # [nk, h]
    img = img_ref[0]                                   # [ni, h]

    # K/V source is shared by all four attention modules; hoist its broadcast.
    kv_b = jnp.broadcast_to(q_tok.astype(bf16), (nh, T, h))
    scale = 1.0 / math.sqrt(hd)

    def cross_attn(m, query):
        # nn.MultiheadAttention(query, q_tok, q_tok, key_padding_mask=~q_mask)
        Lq = query.shape[0]
        q_b = jnp.broadcast_to(query.astype(bf16), (nh, Lq, h))
        Qh = jnp.einsum('hqe,hed->hqd', q_b, wq_ref[m],
                        preferred_element_type=f32) + bq_ref[m]
        Kh = jnp.einsum('hke,hed->hkd', kv_b, wk_ref[m],
                        preferred_element_type=f32) + bk_ref[m]
        Vh = jnp.einsum('hke,hed->hkd', kv_b, wv_ref[m],
                        preferred_element_type=f32) + bv_ref[m]
        s = jnp.einsum('hqd,hkd->hqk', Qh.astype(bf16), Kh.astype(bf16),
                       preferred_element_type=f32) * scale + kbias
        s = s - jnp.max(s, axis=-1, keepdims=True)
        p = jnp.exp(s)
        p = p * pl.reciprocal(jnp.sum(p, axis=-1, keepdims=True), approx=True)
        ctx = jnp.einsum('hqk,hkd->hqd', p.astype(bf16), Vh.astype(bf16),
                         preferred_element_type=f32)
        out_h = jnp.einsum('hqd,hdo->hqo', ctx.astype(bf16), wo_ref[m],
                           preferred_element_type=f32)
        return jnp.sum(out_h, axis=0) + bo_ref[m]      # [Lq, h]

    role_att = cross_attn(0, role_pooled)
    sent_att = cross_attn(1, sent)
    obj_att = cross_attn(2, obj_pooled)
    img_att = cross_attn(3, img)

    # TODO(synk): MultiGranularityVSEncoder source not provided; stand-in is
    # one attention-GCN layer over all visual+semantic nodes + mean pooling.
    nodes = jnp.concatenate([obj_att, img_att, role_att, sent_att], axis=0)
    xb = nodes.astype(bf16)
    sproj = jnp.dot(xb, wa_ref[...], preferred_element_type=f32)
    logits = lax.dot_general(sproj.astype(bf16), xb, (((1,), (1,)), ((), ())),
                             preferred_element_type=f32) * (1.0 / math.sqrt(h))
    logits = logits - jnp.max(logits, axis=-1, keepdims=True)
    pg = jnp.exp(logits)
    att = pg * pl.reciprocal(jnp.sum(pg, axis=-1, keepdims=True), approx=True)
    agg = jnp.dot(att.astype(bf16), xb, preferred_element_type=f32)
    hid = jnp.maximum(
        jnp.dot(agg.astype(bf16), wg_ref[...], preferred_element_type=f32)
        + bg_ref[...], 0.0)
    o_ref[0] = jnp.mean(hid, axis=0, keepdims=True)    # [1, h]


def vis_sem_forward(params, q_embed, q_mask, img_feat, obj_feat, sent_embed,
                    role_embed, role_mask, num_heads):
    bs, T, h = q_embed.shape
    nk = sent_embed.shape[1]
    ni = img_feat.shape[1]
    no = obj_feat.shape[2]
    nr = role_embed.shape[2]
    hd = h // num_heads
    f32, bf16 = jnp.float32, jnp.bfloat16

    kmask = q_mask.astype(f32).reshape(bs, 1, T)
    rmask4 = role_mask.astype(f32).reshape(bs, nk, nr, 1)

    mods = [params["sr"], params["sent"], params["or"], params["img"]]

    def stack(name):
        return jnp.stack([m[name] for m in mods], axis=0)

    # Per-head layouts prepared on the host so the kernel needs no reshapes.
    wq_h = stack("wq").reshape(4, h, num_heads, hd).transpose(0, 2, 1, 3).astype(bf16)
    wk_h = stack("wk").reshape(4, h, num_heads, hd).transpose(0, 2, 1, 3).astype(bf16)
    wv_h = stack("wv").reshape(4, h, num_heads, hd).transpose(0, 2, 1, 3).astype(bf16)
    wo_h = stack("wo").reshape(4, num_heads, hd, h).astype(bf16)
    bq_h = stack("bq").reshape(4, num_heads, hd)[:, :, None, :]
    bk_h = stack("bk").reshape(4, num_heads, hd)[:, :, None, :]
    bv_h = stack("bv").reshape(4, num_heads, hd)[:, :, None, :]
    bo_s = stack("bo")                                          # [4, 1, h] f32

    g = params["gcn"]
    wa = g["wa"].astype(bf16)
    wg = g["wg"].astype(bf16)
    bg = g["bg"]

    kern = functools.partial(vis_sem_kernel, num_heads=num_heads)
    out = pl.pallas_call(
        kern,
        out_shape=jax.ShapeDtypeStruct((bs, 1, h), f32),
        grid=(bs,),
        in_specs=[
            _batch_spec((1, T, h)),
            _batch_spec((1, 1, T)),
            _batch_spec((1, nk, nr, h)),
            _batch_spec((1, nk, nr, 1)),
            _batch_spec((1, ni, no, h)),
            _batch_spec((1, nk, h)),
            _batch_spec((1, ni, h)),
            _full_spec((4, num_heads, h, hd)),
            _full_spec((4, num_heads, 1, hd)),
            _full_spec((4, num_heads, h, hd)),
            _full_spec((4, num_heads, 1, hd)),
            _full_spec((4, num_heads, h, hd)),
            _full_spec((4, num_heads, 1, hd)),
            _full_spec((4, num_heads, hd, h)),
            _full_spec((4, 1, h)),
            _full_spec((h, h)),
            _full_spec((h, h)),
            _full_spec((1, h)),
        ],
        out_specs=_batch_spec((1, 1, h)),
        compiler_params=pltpu.CompilerParams(
            dimension_semantics=("parallel",),
            vmem_limit_bytes=64 * 1024 * 1024),
    )(q_embed, kmask, role_embed, rmask4, obj_feat, sent_embed, img_feat,
      wq_h, bq_h, wk_h, bk_h, wv_h, bv_h, wo_h, bo_s, wa, wg, bg)
    return out[:, 0, :]                                         # [bs, h]


# ----------------------------- BiLSTM kernel ---------------------------------

def bilstm_kernel(x_ref, mask_ref, wi_ref, wh_ref, b_ref, o_ref, xp_ref,
                  *, T, bs, H):
    """Packed-sequence BiLSTM final hidden states.

    x_ref:    [2, T*bs, h] bf16 (dir 0 = forward order, dir 1 = time-reversed)
    mask_ref: [T, 2, bs, 1] f32 (1 = valid timestep for that direction)
    wi_ref:   [2, h, 4H] bf16; wh_ref: [2, H, 4H] bf16; b_ref: [2, 1, 4H] f32
    o_ref:    [2, bs, H] final hidden per direction
    xp_ref:   VMEM scratch [T, 2, bs, 4H] f32 (hoisted input projection)
    """
    f32, bf16 = jnp.float32, jnp.bfloat16

    # Input projection hoisted out of the recurrence: one batched MXU matmul.
    xp = jnp.einsum('dnh,dhg->dng', x_ref[...], wi_ref[...],
                    preferred_element_type=f32) + b_ref[...]    # [2, T*bs, 4H]
    for t in range(T):                                          # static stores
        xp_ref[t] = xp[:, t * bs:(t + 1) * bs, :]

    Wh = wh_ref[...]
    h0 = jnp.zeros((2, bs, H), f32)
    c0 = jnp.zeros((2, bs, H), f32)

    def body(t, carry):
        hp, cp = carry                                          # [2, bs, H]
        g = xp_ref[t] + jnp.einsum('dbh,dhg->dbg', hp.astype(bf16), Wh,
                                   preferred_element_type=f32)  # [2, bs, 4H]
        i = jax.nn.sigmoid(g[..., 0:H])
        f = jax.nn.sigmoid(g[..., H:2 * H])
        cc = jnp.tanh(g[..., 2 * H:3 * H])
        o = jax.nn.sigmoid(g[..., 3 * H:4 * H])
        cn = f * cp + i * cc
        hn = o * jnp.tanh(cn)
        m = mask_ref[t]                                         # [2, bs, 1]
        return (jnp.where(m > 0.5, hn, hp), jnp.where(m > 0.5, cn, cp))

    hf, _ = lax.fori_loop(0, T, body, (h0, c0))
    o_ref[...] = hf


def bilstm(params, q_embed, q_mask):
    bs, T, h = q_embed.shape
    H = h // 2
    lens = q_mask.astype(jnp.int32).sum(axis=1)                 # [bs]

    # Per-step validity masks (precomputed so the serial loop does no mask math).
    t_idx = jnp.arange(T)
    valid_f = (t_idx[:, None] < lens[None, :]).astype(jnp.float32)       # [T, bs]
    valid_b = ((T - 1 - t_idx)[:, None] < lens[None, :]).astype(jnp.float32)
    step_mask = jnp.stack([valid_f, valid_b], axis=1)[..., None]         # [T,2,bs,1]

    xT = jnp.transpose(q_embed, (1, 0, 2))                               # [T, bs, h]
    x2 = jnp.stack([xT, xT[::-1]], axis=0).reshape(2, T * bs, h)
    x2 = x2.astype(jnp.bfloat16)

    p = params["lstm"]
    wi = jnp.stack([p["wih_f"], p["wih_b"]], axis=0).astype(jnp.bfloat16)
    wh = jnp.stack([p["whh_f"], p["whh_b"]], axis=0).astype(jnp.bfloat16)
    bb = jnp.stack([p["b_f"], p["b_b"]], axis=0)

    kern = functools.partial(bilstm_kernel, T=T, bs=bs, H=H)
    out = pl.pallas_call(
        kern,
        out_shape=jax.ShapeDtypeStruct((2, bs, H), jnp.float32),
        grid=(1,),
        in_specs=[
            _full_spec((2, T * bs, h)),
            _full_spec((T, 2, bs, 1)),
            _full_spec((2, h, 4 * H)),
            _full_spec((2, H, 4 * H)),
            _full_spec((2, 1, 4 * H)),
        ],
        out_specs=_full_spec((2, bs, H)),
        scratch_shapes=[pltpu.VMEM((T, 2, bs, 4 * H), jnp.float32)],
    )(x2, step_mask, wi, wh, bb)
    return jnp.concatenate([out[0], out[1]], axis=-1)                    # [bs, h]


# ----------------------------- classifier kernel -----------------------------

def classifier_kernel(vis_ref, q_ref, a_ref, w1v, w1q, w1a, b1, w2, b2, o_ref):
    """SimpleClassifier(3h -> h -> 1) on rows = (batch, answer) pairs.
    One fused matmul set (M = bs * n_ans) and a single dense store."""
    f32, bf16 = jnp.float32, jnp.bfloat16
    z = (jnp.dot(vis_ref[...], w1v[...], preferred_element_type=f32)
         + jnp.dot(q_ref[...], w1q[...], preferred_element_type=f32)
         + jnp.dot(a_ref[...], w1a[...], preferred_element_type=f32)
         + b1[...])
    z = jnp.maximum(z, 0.0)
    o_ref[...] = jnp.dot(z.astype(bf16), w2[...],
                         preferred_element_type=f32) + b2[...]


def classifier(params, vis, q_enc, a_embed):
    bs, h = vis.shape
    na = a_embed.shape[1]
    p = params["cls"]
    bf16 = jnp.bfloat16
    vis_rep = jnp.repeat(vis, na, axis=0).astype(bf16)          # [bs*na, h]
    q_rep = jnp.repeat(q_enc, na, axis=0).astype(bf16)
    a2 = a_embed.reshape(bs * na, h).astype(bf16)
    out = pl.pallas_call(
        classifier_kernel,
        out_shape=jax.ShapeDtypeStruct((bs * na, 1), jnp.float32),
        grid=(1,),
        in_specs=[
            _full_spec((bs * na, h)), _full_spec((bs * na, h)),
            _full_spec((bs * na, h)),
            _full_spec((h, h)), _full_spec((h, h)), _full_spec((h, h)),
            _full_spec((1, h)), _full_spec((h, 1)), _full_spec((1, 1)),
        ],
        out_specs=_full_spec((bs * na, 1)),
    )(vis_rep, q_rep, a2,
      p["w1v"].astype(bf16), p["w1q"].astype(bf16), p["w1a"].astype(bf16),
      p["b1"], p["w2"].astype(bf16), p["b2"])
    return out.reshape(bs, na)


# ----------------------------- parameters ------------------------------------

def _w(key, shape, scale=0.08):
    return scale * jax.random.normal(key, shape, jnp.float32)


def init_mha_params(key, h):
    ks = jax.random.split(key, 8)
    return {"wq": _w(ks[0], (h, h)), "bq": _w(ks[1], (1, h)),
            "wk": _w(ks[2], (h, h)), "bk": _w(ks[3], (1, h)),
            "wv": _w(ks[4], (h, h)), "bv": _w(ks[5], (1, h)),
            "wo": _w(ks[6], (h, h)), "bo": _w(ks[7], (1, h))}


def init_params(key, h):
    H = h // 2
    ks = jax.random.split(key, 16)
    return {
        "sr": init_mha_params(ks[0], h),
        "sent": init_mha_params(ks[1], h),
        "or": init_mha_params(ks[2], h),
        "img": init_mha_params(ks[3], h),
        "gcn": {"wa": _w(ks[4], (h, h)), "wg": _w(ks[5], (h, h)),
                "bg": _w(ks[6], (1, h))},
        "lstm": {"wih_f": _w(ks[7], (h, 4 * H)), "whh_f": _w(ks[8], (H, 4 * H)),
                 "b_f": _w(ks[9], (1, 4 * H)),
                 "wih_b": _w(ks[10], (h, 4 * H)), "whh_b": _w(ks[11], (H, 4 * H)),
                 "b_b": _w(ks[12], (1, 4 * H))},
        "cls": {"w1v": _w(ks[13], (h, h)), "w1q": _w(ks[14], (h, h)),
                "w1a": _w(ks[15], (h, h)),
                "b1": jnp.zeros((1, h), jnp.float32),
                "w2": _w(jax.random.fold_in(key, 99), (h, 1)),
                "b2": jnp.zeros((1, 1), jnp.float32)},
    }


# ----------------------------- forward ---------------------------------------

def relation_reasoning_forward(params, q_embed, q_mask, a_embed, img_feat,
                               obj_feat, sent_embed, role_embed, role_mask,
                               num_head=4):
    # pooling + 4x question cross-attention + attention-GCN (one fused kernel)
    vis_sem = vis_sem_forward(params, q_embed, q_mask, img_feat, obj_feat,
                              sent_embed, role_embed, role_mask, num_head)
    # question BiLSTM final hidden states (packed-sequence semantics)
    q_enc = bilstm(params, q_embed, q_mask)
    # per-answer classifier on cat([vis_sem, q_enc, a_i]), batched over answers
    return classifier(params, vis_sem, q_enc, a_embed)          # [bs, 5]


# ----------------------------- demo ------------------------------------------

if __name__ == "__main__":
    bs, n_token, n_img, n_obj, n_know, hidden = 2, 8, 4, 3, 6, 32
    num_head = 4

    key = jax.random.PRNGKey(0)
    k = jax.random.split(key, 10)
    q_embed = jax.random.normal(k[0], (bs, n_token, hidden), jnp.float32)
    lens = jnp.array([8, 5], dtype=jnp.int32)
    q_mask = jnp.arange(n_token)[None, :] < lens[:, None]          # bool [bs, T]
    a_embed = jax.random.normal(k[1], (bs, 5, hidden), jnp.float32)
    img_feat = jax.random.normal(k[2], (bs, n_img, hidden), jnp.float32)
    obj_feat = jax.random.normal(k[3], (bs, n_img, n_obj, hidden), jnp.float32)
    sent_embed = jax.random.normal(k[4], (bs, n_know, hidden), jnp.float32)
    role_embed = jax.random.normal(k[5], (bs, n_know, 10, hidden), jnp.float32)
    role_mask = (jax.random.uniform(k[6], (bs, n_know, 10)) > 0.4).astype(
        jnp.float32)

    params = init_params(k[7], hidden)

    out = relation_reasoning_forward(params, q_embed, q_mask, a_embed, img_feat,
                                     obj_feat, sent_embed, role_embed, role_mask,
                                     num_head=num_head)
    out = jax.block_until_ready(out)
    assert out.shape == (bs, 5), out.shape
    assert jnp.all(jnp.isfinite(out))
    print("KERNEL_OK")
</pallas_src>

<mosaic_0001>
module attributes {stable_mosaic.version = 11 : i64} {
  func.func @vis_sem_kernel(%arg0: i32, %arg1: memref<1x8x32xf32, #tpu.memory_space<vmem>>, %arg2: memref<1x1x8xf32, #tpu.memory_space<vmem>>, %arg3: memref<1x6x10x32xf32, #tpu.memory_space<vmem>>, %arg4: memref<1x6x10x1xf32, #tpu.memory_space<vmem>>, %arg5: memref<1x4x3x32xf32, #tpu.memory_space<vmem>>, %arg6: memref<1x6x32xf32, #tpu.memory_space<vmem>>, %arg7: memref<1x4x32xf32, #tpu.memory_space<vmem>>, %arg8: memref<4x4x32x8xbf16, #tpu.memory_space<vmem>>, %arg9: memref<4x4x1x8xf32, #tpu.memory_space<vmem>>, %arg10: memref<4x4x32x8xbf16, #tpu.memory_space<vmem>>, %arg11: memref<4x4x1x8xf32, #tpu.memory_space<vmem>>, %arg12: memref<4x4x32x8xbf16, #tpu.memory_space<vmem>>, %arg13: memref<4x4x1x8xf32, #tpu.memory_space<vmem>>, %arg14: memref<4x4x8x32xbf16, #tpu.memory_space<vmem>>, %arg15: memref<4x1x32xf32, #tpu.memory_space<vmem>>, %arg16: memref<32x32xbf16, #tpu.memory_space<vmem>>, %arg17: memref<32x32xbf16, #tpu.memory_space<vmem>>, %arg18: memref<1x32xf32, #tpu.memory_space<vmem>>, %arg19: memref<1x1x32xf32, #tpu.memory_space<vmem>>) attributes {dimension_semantics = [#tpu.dimension_semantics<parallel>], iteration_bounds = array<i64: 2>, scalar_prefetch = 0 : i64, scratch_operands = 0 : i64, tpu.core_type = #tpu.core_type<tc>, window_params = [{transform_indices = @transform_0, window_bounds = array<i64: 1, 8, 32>}, {transform_indices = @transform_1, window_bounds = array<i64: 1, 1, 8>}, {transform_indices = @transform_2, window_bounds = array<i64: 1, 6, 10, 32>}, {transform_indices = @transform_3, window_bounds = array<i64: 1, 6, 10, 1>}, {transform_indices = @transform_4, window_bounds = array<i64: 1, 4, 3, 32>}, {transform_indices = @transform_5, window_bounds = array<i64: 1, 6, 32>}, {transform_indices = @transform_6, window_bounds = array<i64: 1, 4, 32>}, {pipeline_mode = #tpu.pipeline_mode<synchronous>, transform_indices = @transform_7, window_bounds = array<i64: 4, 4, 32, 8>}, {pipeline_mode = #tpu.pipeline_mode<synchronous>, transform_indices = @transform_8, window_bounds = array<i64: 4, 4, 1, 8>}, {pipeline_mode = #tpu.pipeline_mode<synchronous>, transform_indices = @transform_9, window_bounds = array<i64: 4, 4, 32, 8>}, {pipeline_mode = #tpu.pipeline_mode<synchronous>, transform_indices = @transform_10, window_bounds = array<i64: 4, 4, 1, 8>}, {pipeline_mode = #tpu.pipeline_mode<synchronous>, transform_indices = @transform_11, window_bounds = array<i64: 4, 4, 32, 8>}, {pipeline_mode = #tpu.pipeline_mode<synchronous>, transform_indices = @transform_12, window_bounds = array<i64: 4, 4, 1, 8>}, {pipeline_mode = #tpu.pipeline_mode<synchronous>, transform_indices = @transform_13, window_bounds = array<i64: 4, 4, 8, 32>}, {pipeline_mode = #tpu.pipeline_mode<synchronous>, transform_indices = @transform_14, window_bounds = array<i64: 4, 1, 32>}, {pipeline_mode = #tpu.pipeline_mode<synchronous>, transform_indices = @transform_15, window_bounds = array<i64: 32, 32>}, {pipeline_mode = #tpu.pipeline_mode<synchronous>, transform_indices = @transform_16, window_bounds = array<i64: 32, 32>}, {pipeline_mode = #tpu.pipeline_mode<synchronous>, transform_indices = @transform_17, window_bounds = array<i64: 1, 32>}, {transform_indices = @transform_18, window_bounds = array<i64: 1, 1, 32>}]} {
    %c0 = arith.constant 0 : index
    %c0_0 = arith.constant 0 : index
    %c0_1 = arith.constant 0 : index
    %0 = vector.load %arg1[%c0, %c0_0, %c0_1] : memref<1x8x32xf32, #tpu.memory_space<vmem>>, vector<1x8x32xf32>
    %1 = vector.shape_cast %0 : vector<1x8x32xf32> to vector<8x32xf32>
    %c0_2 = arith.constant 0 : index
    %c0_3 = arith.constant 0 : index
    %c0_4 = arith.constant 0 : index
    %2 = vector.load %arg2[%c0_2, %c0_3, %c0_4] : memref<1x1x8xf32, #tpu.memory_space<vmem>>, vector<1x1x8xf32>
    %3 = vector.shape_cast %2 : vector<1x1x8xf32> to vector<1x8xf32>
    %cst = arith.constant 1.000000e+00 : f32
    %4 = vector.broadcast %cst : f32 to vector<1x8xf32>
    %5 = arith.subf %4, %3 : vector<1x8xf32>
    %cst_5 = arith.constant -1.000000e+09 : f32
    %6 = vector.broadcast %cst_5 : f32 to vector<1x8xf32>
    %7 = arith.mulf %5, %6 : vector<1x8xf32>
    %c0_6 = arith.constant 0 : index
    %c0_7 = arith.constant 0 : index
    %c0_8 = arith.constant 0 : index
    %c0_9 = arith.constant 0 : index
    %8 = vector.load %arg3[%c0_6, %c0_7, %c0_8, %c0_9] : memref<1x6x10x32xf32, #tpu.memory_space<vmem>>, vector<1x6x10x32xf32>
    %9 = vector.shape_cast %8 : vector<1x6x10x32xf32> to vector<6x10x32xf32>
    %c0_10 = arith.constant 0 : index
    %c0_11 = arith.constant 0 : index
    %c0_12 = arith.constant 0 : index
    %c0_13 = arith.constant 0 : index
    %10 = vector.load %arg4[%c0_10, %c0_11, %c0_12, %c0_13] : memref<1x6x10x1xf32, #tpu.memory_space<vmem>>, vector<1x6x10x1xf32>
    %11 = vector.shape_cast %10 : vector<1x6x10x1xf32> to vector<6x10x1xf32>
    %cst_14 = arith.constant 0.000000e+00 : f32
    %12 = vector.broadcast %cst_14 : f32 to vector<6x10x1xf32>
    %13 = arith.cmpf ogt, %11, %12 : vector<6x10x1xf32>
    %14 = arith.extui %13 : vector<6x10x1xi1> to vector<6x10x1xi32>
    %15 = arith.sitofp %14 : vector<6x10x1xi32> to vector<6x10x1xf32>
    %cst_15 = arith.constant dense<0.000000e+00> : vector<6x1xf32>
    %16 = vector.multi_reduction <add>, %15, %cst_15 [1] : vector<6x10x1xf32> to vector<6x1xf32>
    %cst_16 = arith.constant 0.000000e+00 : f32
    %17 = vector.broadcast %cst_16 : f32 to vector<6x1xf32>
    %18 = arith.cmpf oeq, %16, %17 : vector<6x1xf32>
    %cst_17 = arith.constant 1.000000e+01 : f32
    %19 = vector.broadcast %cst_17 : f32 to vector<6x1xf32>
    %20 = arith.select %18, %19, %16 : vector<6x1xi1>, vector<6x1xf32>
    %21 = vector.broadcast %15 : vector<6x10x1xf32> to vector<6x10x32xf32>
    %22 = arith.mulf %9, %21 : vector<6x10x32xf32>
    %cst_18 = arith.constant dense<0.000000e+00> : vector<6x32xf32>
    %23 = vector.multi_reduction <add>, %22, %cst_18 [1] : vector<6x10x32xf32> to vector<6x32xf32>
    %24 = vector.broadcast %20 : vector<6x1xf32> to vector<6x32xf32>
    %25 = arith.divf %23, %24 : vector<6x32xf32>
    %c0_19 = arith.constant 0 : index
    %c0_20 = arith.constant 0 : index
    %c0_21 = arith.constant 0 : index
    %c0_22 = arith.constant 0 : index
    %26 = vector.load %arg5[%c0_19, %c0_20, %c0_21, %c0_22] : memref<1x4x3x32xf32, #tpu.memory_space<vmem>>, vector<1x4x3x32xf32>
    %27 = vector.shape_cast %26 : vector<1x4x3x32xf32> to vector<4x3x32xf32>
    %cst_23 = arith.constant dense<0.000000e+00> : vector<4x32xf32>
    %28 = vector.multi_reduction <add>, %27, %cst_23 [1] : vector<4x3x32xf32> to vector<4x32xf32>
    %cst_24 = arith.constant 3.000000e+00 : f32
    %29 = vector.broadcast %cst_24 : f32 to vector<4x32xf32>
    %30 = arith.divf %28, %29 : vector<4x32xf32>
    %c0_25 = arith.constant 0 : index
    %c0_26 = arith.constant 0 : index
    %c0_27 = arith.constant 0 : index
    %31 = vector.load %arg6[%c0_25, %c0_26, %c0_27] : memref<1x6x32xf32, #tpu.memory_space<vmem>>, vector<1x6x32xf32>
    %32 = vector.shape_cast %31 : vector<1x6x32xf32> to vector<6x32xf32>
    %c0_28 = arith.constant 0 : index
    %c0_29 = arith.constant 0 : index
    %c0_30 = arith.constant 0 : index
    %33 = vector.load %arg7[%c0_28, %c0_29, %c0_30] : memref<1x4x32xf32, #tpu.memory_space<vmem>>, vector<1x4x32xf32>
    %34 = vector.shape_cast %33 : vector<1x4x32xf32> to vector<4x32xf32>
    %35 = arith.truncf %1 : vector<8x32xf32> to vector<8x32xbf16>
    %36 = vector.shape_cast %35 : vector<8x32xbf16> to vector<1x8x32xbf16>
    %37 = vector.broadcast %36 : vector<1x8x32xbf16> to vector<4x8x32xbf16>
    %38 = arith.truncf %25 : vector<6x32xf32> to vector<6x32xbf16>
    %39 = vector.shape_cast %38 : vector<6x32xbf16> to vector<1x6x32xbf16>
    %40 = vector.broadcast %39 : vector<1x6x32xbf16> to vector<4x6x32xbf16>
    %c0_31 = arith.constant 0 : index
    %c0_32 = arith.constant 0 : index
    %c0_33 = arith.constant 0 : index
    %c0_34 = arith.constant 0 : index
    %41 = vector.load %arg8[%c0_31, %c0_32, %c0_33, %c0_34] : memref<4x4x32x8xbf16, #tpu.memory_space<vmem>>, vector<1x4x32x8xbf16>
    %42 = vector.shape_cast %41 : vector<1x4x32x8xbf16> to vector<4x32x8xbf16>
    "tpu.trace_start"() <{level = 10 : i32, message = "hqe,hed->hqd"}> : () -> ()
    %cst_35 = arith.constant dense<0.000000e+00> : vector<4x6x8xf32>
    %43 = tpu.matmul %40, %42, %cst_35 {dimension_numbers = #tpu.dot_dimension_numbers<[2], [1], [1], [2], [0, 0, 0, 1, 1, 2], [0], [0]>} : vector<4x6x32xbf16>, vector<4x32x8xbf16>, vector<4x6x8xf32> -> vector<4x6x8xf32>
    "tpu.trace_stop"() : () -> ()
    %c0_36 = arith.constant 0 : index
    %c0_37 = arith.constant 0 : index
    %c0_38 = arith.constant 0 : index
    %c0_39 = arith.constant 0 : index
    %44 = vector.load %arg9[%c0_36, %c0_37, %c0_38, %c0_39] : memref<4x4x1x8xf32, #tpu.memory_space<vmem>>, vector<1x4x1x8xf32>
    %45 = vector.shape_cast %44 : vector<1x4x1x8xf32> to vector<4x1x8xf32>
    %46 = vector.broadcast %45 : vector<4x1x8xf32> to vector<4x6x8xf32>
    %47 = arith.addf %43, %46 : vector<4x6x8xf32>
    %c0_40 = arith.constant 0 : index
    %c0_41 = arith.constant 0 : index
    %c0_42 = arith.constant 0 : index
    %c0_43 = arith.constant 0 : index
    %48 = vector.load %arg10[%c0_40, %c0_41, %c0_42, %c0_43] : memref<4x4x32x8xbf16, #tpu.memory_space<vmem>>, vector<1x4x32x8xbf16>
    %49 = vector.shape_cast %48 : vector<1x4x32x8xbf16> to vector<4x32x8xbf16>
    "tpu.trace_start"() <{level = 10 : i32, message = "hke,hed->hkd"}> : () -> ()
    %cst_44 = arith.constant dense<0.000000e+00> : vector<4x8x8xf32>
    %50 = tpu.matmul %37, %49, %cst_44 {dimension_numbers = #tpu.dot_dimension_numbers<[2], [1], [1], [2], [0, 0, 0, 1, 1, 2], [0], [0]>} : vector<4x8x32xbf16>, vector<4x32x8xbf16>, vector<4x8x8xf32> -> vector<4x8x8xf32>
    "tpu.trace_stop"() : () -> ()
    %c0_45 = arith.constant 0 : index
    %c0_46 = arith.constant 0 : index
    %c0_47 = arith.constant 0 : index
    %c0_48 = arith.constant 0 : index
    %51 = vector.load %arg11[%c0_45, %c0_46, %c0_47, %c0_48] : memref<4x4x1x8xf32, #tpu.memory_space<vmem>>, vector<1x4x1x8xf32>
    %52 = vector.shape_cast %51 : vector<1x4x1x8xf32> to vector<4x1x8xf32>
    %53 = vector.broadcast %52 : vector<4x1x8xf32> to vector<4x8x8xf32>
    %54 = arith.addf %50, %53 : vector<4x8x8xf32>
    %c0_49 = arith.constant 0 : index
    %c0_50 = arith.constant 0 : index
    %c0_51 = arith.constant 0 : index
    %c0_52 = arith.constant 0 : index
    %55 = vector.load %arg12[%c0_49, %c0_50, %c0_51, %c0_52] : memref<4x4x32x8xbf16, #tpu.memory_space<vmem>>, vector<1x4x32x8xbf16>
    %56 = vector.shape_cast %55 : vector<1x4x32x8xbf16> to vector<4x32x8xbf16>
    "tpu.trace_start"() <{level = 10 : i32, message = "hke,hed->hkd"}> : () -> ()
    %cst_53 = arith.constant dense<0.000000e+00> : vector<4x8x8xf32>
    %57 = tpu.matmul %37, %56, %cst_53 {dimension_numbers = #tpu.dot_dimension_numbers<[2], [1], [1], [2], [0, 0, 0, 1, 1, 2], [0], [0]>} : vector<4x8x32xbf16>, vector<4x32x8xbf16>, vector<4x8x8xf32> -> vector<4x8x8xf32>
    "tpu.trace_stop"() : () -> ()
    %c0_54 = arith.constant 0 : index
    %c0_55 = arith.constant 0 : index
    %c0_56 = arith.constant 0 : index
    %c0_57 = arith.constant 0 : index
    %58 = vector.load %arg13[%c0_54, %c0_55, %c0_56, %c0_57] : memref<4x4x1x8xf32, #tpu.memory_space<vmem>>, vector<1x4x1x8xf32>
    %59 = vector.shape_cast %58 : vector<1x4x1x8xf32> to vector<4x1x8xf32>
    %60 = vector.broadcast %59 : vector<4x1x8xf32> to vector<4x8x8xf32>
    %61 = arith.addf %57, %60 : vector<4x8x8xf32>
    %62 = arith.truncf %47 : vector<4x6x8xf32> to vector<4x6x8xbf16>
    %63 = arith.truncf %54 : vector<4x8x8xf32> to vector<4x8x8xbf16>
    "tpu.trace_start"() <{level = 10 : i32, message = "hqd,hkd->hqk"}> : () -> ()
    %cst_58 = arith.constant dense<0.000000e+00> : vector<4x6x8xf32>
    %64 = tpu.matmul %62, %63, %cst_58 {dimension_numbers = #tpu.dot_dimension_numbers<[2], [2], [1], [1], [0, 0, 0, 1, 1, 1], [0], [0]>} : vector<4x6x8xbf16>, vector<4x8x8xbf16>, vector<4x6x8xf32> -> vector<4x6x8xf32>
    "tpu.trace_stop"() : () -> ()
    %cst_59 = arith.constant 0.353553385 : f32
    %65 = vector.broadcast %cst_59 : f32 to vector<4x6x8xf32>
    %66 = arith.mulf %64, %65 : vector<4x6x8xf32>
    %67 = vector.shape_cast %7 : vector<1x8xf32> to vector<1x1x8xf32>
    %68 = vector.broadcast %67 : vector<1x1x8xf32> to vector<4x6x8xf32>
    %69 = arith.addf %66, %68 : vector<4x6x8xf32>
    %cst_60 = arith.constant dense<0xFF800000> : vector<4x6xf32>
    %70 = vector.multi_reduction <maximumf>, %69, %cst_60 [2] : vector<4x6x8xf32> to vector<4x6xf32>
    %71 = vector.shape_cast %70 : vector<4x6xf32> to vector<4x6x1xf32>
    %72 = vector.broadcast %71 : vector<4x6x1xf32> to vector<4x6x8xf32>
    %73 = arith.subf %69, %72 : vector<4x6x8xf32>
    %74 = math.exp %73 : vector<4x6x8xf32>
    %cst_61 = arith.constant dense<0.000000e+00> : vector<4x6xf32>
    %75 = vector.multi_reduction <add>, %74, %cst_61 [2] : vector<4x6x8xf32> to vector<4x6xf32>
    %76 = vector.shape_cast %75 : vector<4x6xf32> to vector<4x6x1xf32>
    %77 = tpu.reciprocal %76 {approx = true} : vector<4x6x1xf32> -> vector<4x6x1xf32>
    %78 = vector.broadcast %77 : vector<4x6x1xf32> to vector<4x6x8xf32>
    %79 = arith.mulf %74, %78 : vector<4x6x8xf32>
    %80 = arith.truncf %79 : vector<4x6x8xf32> to vector<4x6x8xbf16>
    %81 = arith.truncf %61 : vector<4x8x8xf32> to vector<4x8x8xbf16>
    "tpu.trace_start"() <{level = 10 : i32, message = "hqk,hkd->hqd"}> : () -> ()
    %cst_62 = arith.constant dense<0.000000e+00> : vector<4x6x8xf32>
    %82 = tpu.matmul %80, %81, %cst_62 {dimension_numbers = #tpu.dot_dimension_numbers<[2], [1], [1], [2], [0, 0, 0, 1, 1, 2], [0], [0]>} : vector<4x6x8xbf16>, vector<4x8x8xbf16>, vector<4x6x8xf32> -> vector<4x6x8xf32>
    "tpu.trace_stop"() : () -> ()
    %83 = arith.truncf %82 : vector<4x6x8xf32> to vector<4x6x8xbf16>
    %c0_63 = arith.constant 0 : index
    %c0_64 = arith.constant 0 : index
    %c0_65 = arith.constant 0 : index
    %c0_66 = arith.constant 0 : index
    %84 = vector.load %arg14[%c0_63, %c0_64, %c0_65, %c0_66] : memref<4x4x8x32xbf16, #tpu.memory_space<vmem>>, vector<1x4x8x32xbf16>
    %85 = vector.shape_cast %84 : vector<1x4x8x32xbf16> to vector<4x8x32xbf16>
    "tpu.trace_start"() <{level = 10 : i32, message = "hqd,hdo->hqo"}> : () -> ()
    %cst_67 = arith.constant dense<0.000000e+00> : vector<4x6x32xf32>
    %86 = tpu.matmul %83, %85, %cst_67 {dimension_numbers = #tpu.dot_dimension_numbers<[2], [1], [1], [2], [0, 0, 0, 1, 1, 2], [0], [0]>} : vector<4x6x8xbf16>, vector<4x8x32xbf16>, vector<4x6x32xf32> -> vector<4x6x32xf32>
    "tpu.trace_stop"() : () -> ()
    %cst_68 = arith.constant dense<0.000000e+00> : vector<6x32xf32>
    %87 = vector.multi_reduction <add>, %86, %cst_68 [0] : vector<4x6x32xf32> to vector<6x32xf32>
    %c0_69 = arith.constant 0 : index
    %c0_70 = arith.constant 0 : index
    %c0_71 = arith.constant 0 : index
    %88 = vector.load %arg15[%c0_69, %c0_70, %c0_71] : memref<4x1x32xf32, #tpu.memory_space<vmem>>, vector<1x1x32xf32>
    %89 = vector.shape_cast %88 : vector<1x1x32xf32> to vector<1x32xf32>
    %90 = vector.broadcast %89 : vector<1x32xf32> to vector<6x32xf32>
    %91 = arith.addf %87, %90 : vector<6x32xf32>
    %92 = arith.truncf %32 : vector<6x32xf32> to vector<6x32xbf16>
    %93 = vector.shape_cast %92 : vector<6x32xbf16> to vector<1x6x32xbf16>
    %94 = vector.broadcast %93 : vector<1x6x32xbf16> to vector<4x6x32xbf16>
    %c1 = arith.constant 1 : index
    %c0_72 = arith.constant 0 : index
    %c0_73 = arith.constant 0 : index
    %c0_74 = arith.constant 0 : index
    %95 = vector.load %arg8[%c1, %c0_72, %c0_73, %c0_74] : memref<4x4x32x8xbf16, #tpu.memory_space<vmem>>, vector<1x4x32x8xbf16>
    %96 = vector.shape_cast %95 : vector<1x4x32x8xbf16> to vector<4x32x8xbf16>
    "tpu.trace_start"() <{level = 10 : i32, message = "hqe,hed->hqd"}> : () -> ()
    %cst_75 = arith.constant dense<0.000000e+00> : vector<4x6x8xf32>
    %97 = tpu.matmul %94, %96, %cst_75 {dimension_numbers = #tpu.dot_dimension_numbers<[2], [1], [1], [2], [0, 0, 0, 1, 1, 2], [0], [0]>} : vector<4x6x32xbf16>, vector<4x32x8xbf16>, vector<4x6x8xf32> -> vector<4x6x8xf32>
    "tpu.trace_stop"() : () -> ()
    %c1_76 = arith.constant 1 : index
    %c0_77 = arith.constant 0 : index
    %c0_78 = arith.constant 0 : index
    %c0_79 = arith.constant 0 : index
    %98 = vector.load %arg9[%c1_76, %c0_77, %c0_78, %c0_79] : memref<4x4x1x8xf32, #tpu.memory_space<vmem>>, vector<1x4x1x8xf32>
    %99 = vector.shape_cast %98 : vector<1x4x1x8xf32> to vector<4x1x8xf32>
    %100 = vector.broadcast %99 : vector<4x1x8xf32> to vector<4x6x8xf32>
    %101 = arith.addf %97, %100 : vector<4x6x8xf32>
    %c1_80 = arith.constant 1 : index
    %c0_81 = arith.constant 0 : index
    %c0_82 = arith.constant 0 : index
    %c0_83 = arith.constant 0 : index
    %102 = vector.load %arg10[%c1_80, %c0_81, %c0_82, %c0_83] : memref<4x4x32x8xbf16, #tpu.memory_space<vmem>>, vector<1x4x32x8xbf16>
    %103 = vector.shape_cast %102 : vector<1x4x32x8xbf16> to vector<4x32x8xbf16>
    "tpu.trace_start"() <{level = 10 : i32, message = "hke,hed->hkd"}> : () -> ()
    %cst_84 = arith.constant dense<0.000000e+00> : vector<4x8x8xf32>
    %104 = tpu.matmul %37, %103, %cst_84 {dimension_numbers = #tpu.dot_dimension_numbers<[2], [1], [1], [2], [0, 0, 0, 1, 1, 2], [0], [0]>} : vector<4x8x32xbf16>, vector<4x32x8xbf16>, vector<4x8x8xf32> -> vector<4x8x8xf32>
    "tpu.trace_stop"() : () -> ()
    %c1_85 = arith.constant 1 : index
    %c0_86 = arith.constant 0 : index
    %c0_87 = arith.constant 0 : index
    %c0_88 = arith.constant 0 : index
    %105 = vector.load %arg11[%c1_85, %c0_86, %c0_87, %c0_88] : memref<4x4x1x8xf32, #tpu.memory_space<vmem>>, vector<1x4x1x8xf32>
    %106 = vector.shape_cast %105 : vector<1x4x1x8xf32> to vector<4x1x8xf32>
    %107 = vector.broadcast %106 : vector<4x1x8xf32> to vector<4x8x8xf32>
    %108 = arith.addf %104, %107 : vector<4x8x8xf32>
    %c1_89 = arith.constant 1 : index
    %c0_90 = arith.constant 0 : index
    %c0_91 = arith.constant 0 : index
    %c0_92 = arith.constant 0 : index
    %109 = vector.load %arg12[%c1_89, %c0_90, %c0_91, %c0_92] : memref<4x4x32x8xbf16, #tpu.memory_space<vmem>>, vector<1x4x32x8xbf16>
    %110 = vector.shape_cast %109 : vector<1x4x32x8xbf16> to vector<4x32x8xbf16>
    "tpu.trace_start"() <{level = 10 : i32, message = "hke,hed->hkd"}> : () -> ()
    %cst_93 = arith.constant dense<0.000000e+00> : vector<4x8x8xf32>
    %111 = tpu.matmul %37, %110, %cst_93 {dimension_numbers = #tpu.dot_dimension_numbers<[2], [1], [1], [2], [0, 0, 0, 1, 1, 2], [0], [0]>} : vector<4x8x32xbf16>, vector<4x32x8xbf16>, vector<4x8x8xf32> -> vector<4x8x8xf32>
    "tpu.trace_stop"() : () -> ()
    %c1_94 = arith.constant 1 : index
    %c0_95 = arith.constant 0 : index
    %c0_96 = arith.constant 0 : index
    %c0_97 = arith.constant 0 : index
    %112 = vector.load %arg13[%c1_94, %c0_95, %c0_96, %c0_97] : memref<4x4x1x8xf32, #tpu.memory_space<vmem>>, vector<1x4x1x8xf32>
    %113 = vector.shape_cast %112 : vector<1x4x1x8xf32> to vector<4x1x8xf32>
    %114 = vector.broadcast %113 : vector<4x1x8xf32> to vector<4x8x8xf32>
    %115 = arith.addf %111, %114 : vector<4x8x8xf32>
    %116 = arith.truncf %101 : vector<4x6x8xf32> to vector<4x6x8xbf16>
    %117 = arith.truncf %108 : vector<4x8x8xf32> to vector<4x8x8xbf16>
    "tpu.trace_start"() <{level = 10 : i32, message = "hqd,hkd->hqk"}> : () -> ()
    %cst_98 = arith.constant dense<0.000000e+00> : vector<4x6x8xf32>
    %118 = tpu.matmul %116, %117, %cst_98 {dimension_numbers = #tpu.dot_dimension_numbers<[2], [2], [1], [1], [0, 0, 0, 1, 1, 1], [0], [0]>} : vector<4x6x8xbf16>, vector<4x8x8xbf16>, vector<4x6x8xf32> -> vector<4x6x8xf32>
    "tpu.trace_stop"() : () -> ()
    %cst_99 = arith.constant 0.353553385 : f32
    %119 = vector.broadcast %cst_99 : f32 to vector<4x6x8xf32>
    %120 = arith.mulf %118, %119 : vector<4x6x8xf32>
    %121 = vector.shape_cast %7 : vector<1x8xf32> to vector<1x1x8xf32>
    %122 = vector.broadcast %121 : vector<1x1x8xf32> to vector<4x6x8xf32>
    %123 = arith.addf %120, %122 : vector<4x6x8xf32>
    %cst_100 = arith.constant dense<0xFF800000> : vector<4x6xf32>
    %124 = vector.multi_reduction <maximumf>, %123, %cst_100 [2] : vector<4x6x8xf32> to vector<4x6xf32>
    %125 = vector.shape_cast %124 : vector<4x6xf32> to vector<4x6x1xf32>
    %126 = vector.broadcast %125 : vector<4x6x1xf32> to vector<4x6x8xf32>
    %127 = arith.subf %123, %126 : vector<4x6x8xf32>
    %128 = math.exp %127 : vector<4x6x8xf32>
    %cst_101 = arith.constant dense<0.000000e+00> : vector<4x6xf32>
    %129 = vector.multi_reduction <add>, %128, %cst_101 [2] : vector<4x6x8xf32> to vector<4x6xf32>
    %130 = vector.shape_cast %129 : vector<4x6xf32> to vector<4x6x1xf32>
    %131 = tpu.reciprocal %130 {approx = true} : vector<4x6x1xf32> -> vector<4x6x1xf32>
    %132 = vector.broadcast %131 : vector<4x6x1xf32> to vector<4x6x8xf32>
    %133 = arith.mulf %128, %132 : vector<4x6x8xf32>
    %134 = arith.truncf %133 : vector<4x6x8xf32> to vector<4x6x8xbf16>
    %135 = arith.truncf %115 : vector<4x8x8xf32> to vector<4x8x8xbf16>
    "tpu.trace_start"() <{level = 10 : i32, message = "hqk,hkd->hqd"}> : () -> ()
    %cst_102 = arith.constant dense<0.000000e+00> : vector<4x6x8xf32>
    %136 = tpu.matmul %134, %135, %cst_102 {dimension_numbers = #tpu.dot_dimension_numbers<[2], [1], [1], [2], [0, 0, 0, 1, 1, 2], [0], [0]>} : vector<4x6x8xbf16>, vector<4x8x8xbf16>, vector<4x6x8xf32> -> vector<4x6x8xf32>
    "tpu.trace_stop"() : () -> ()
    %137 = arith.truncf %136 : vector<4x6x8xf32> to vector<4x6x8xbf16>
    %c1_103 = arith.constant 1 : index
    %c0_104 = arith.constant 0 : index
    %c0_105 = arith.constant 0 : index
    %c0_106 = arith.constant 0 : index
    %138 = vector.load %arg14[%c1_103, %c0_104, %c0_105, %c0_106] : memref<4x4x8x32xbf16, #tpu.memory_space<vmem>>, vector<1x4x8x32xbf16>
    %139 = vector.shape_cast %138 : vector<1x4x8x32xbf16> to vector<4x8x32xbf16>
    "tpu.trace_start"() <{level = 10 : i32, message = "hqd,hdo->hqo"}> : () -> ()
    %cst_107 = arith.constant dense<0.000000e+00> : vector<4x6x32xf32>
    %140 = tpu.matmul %137, %139, %cst_107 {dimension_numbers = #tpu.dot_dimension_numbers<[2], [1], [1], [2], [0, 0, 0, 1, 1, 2], [0], [0]>} : vector<4x6x8xbf16>, vector<4x8x32xbf16>, vector<4x6x32xf32> -> vector<4x6x32xf32>
    "tpu.trace_stop"() : () -> ()
    %cst_108 = arith.constant dense<0.000000e+00> : vector<6x32xf32>
    %141 = vector.multi_reduction <add>, %140, %cst_108 [0] : vector<4x6x32xf32> to vector<6x32xf32>
    %c1_109 = arith.constant 1 : index
    %c0_110 = arith.constant 0 : index
    %c0_111 = arith.constant 0 : index
    %142 = vector.load %arg15[%c1_109, %c0_110, %c0_111] : memref<4x1x32xf32, #tpu.memory_space<vmem>>, vector<1x1x32xf32>
    %143 = vector.shape_cast %142 : vector<1x1x32xf32> to vector<1x32xf32>
    %144 = vector.broadcast %143 : vector<1x32xf32> to vector<6x32xf32>
    %145 = arith.addf %141, %144 : vector<6x32xf32>
    %146 = arith.truncf %30 : vector<4x32xf32> to vector<4x32xbf16>
    %147 = vector.shape_cast %146 : vector<4x32xbf16> to vector<1x4x32xbf16>
    %148 = vector.broadcast %147 : vector<1x4x32xbf16> to vector<4x4x32xbf16>
    %c2 = arith.constant 2 : index
    %c0_112 = arith.constant 0 : index
    %c0_113 = arith.constant 0 : index
    %c0_114 = arith.constant 0 : index
    %149 = vector.load %arg8[%c2, %c0_112, %c0_113, %c0_114] : memref<4x4x32x8xbf16, #tpu.memory_space<vmem>>, vector<1x4x32x8xbf16>
    %150 = vector.shape_cast %149 : vector<1x4x32x8xbf16> to vector<4x32x8xbf16>
    "tpu.trace_start"() <{level = 10 : i32, message = "hqe,hed->hqd"}> : () -> ()
    %cst_115 = arith.constant dense<0.000000e+00> : vector<4x4x8xf32>
    %151 = tpu.matmul %148, %150, %cst_115 {dimension_numbers = #tpu.dot_dimension_numbers<[2], [1], [1], [2], [0, 0, 0, 1, 1, 2], [0], [0]>} : vector<4x4x32xbf16>, vector<4x32x8xbf16>, vector<4x4x8xf32> -> vector<4x4x8xf32>
    "tpu.trace_stop"() : () -> ()
    %c2_116 = arith.constant 2 : index
    %c0_117 = arith.constant 0 : index
    %c0_118 = arith.constant 0 : index
    %c0_119 = arith.constant 0 : index
    %152 = vector.load %arg9[%c2_116, %c0_117, %c0_118, %c0_119] : memref<4x4x1x8xf32, #tpu.memory_space<vmem>>, vector<1x4x1x8xf32>
    %153 = vector.shape_cast %152 : vector<1x4x1x8xf32> to vector<4x1x8xf32>
    %154 = vector.broadcast %153 : vector<4x1x8xf32> to vector<4x4x8xf32>
    %155 = arith.addf %151, %154 : vector<4x4x8xf32>
    %c2_120 = arith.constant 2 : index
    %c0_121 = arith.constant 0 : index
    %c0_122 = arith.constant 0 : index
    %c0_123 = arith.constant 0 : index
    %156 = vector.load %arg10[%c2_120, %c0_121, %c0_122, %c0_123] : memref<4x4x32x8xbf16, #tpu.memory_space<vmem>>, vector<1x4x32x8xbf16>
    %157 = vector.shape_cast %156 : vector<1x4x32x8xbf16> to vector<4x32x8xbf16>
    "tpu.trace_start"() <{level = 10 : i32, message = "hke,hed->hkd"}> : () -> ()
    %cst_124 = arith.constant dense<0.000000e+00> : vector<4x8x8xf32>
    %158 = tpu.matmul %37, %157, %cst_124 {dimension_numbers = #tpu.dot_dimension_numbers<[2], [1], [1], [2], [0, 0, 0, 1, 1, 2], [0], [0]>} : vector<4x8x32xbf16>, vector<4x32x8xbf16>, vector<4x8x8xf32> -> vector<4x8x8xf32>
    "tpu.trace_stop"() : () -> ()
    %c2_125 = arith.constant 2 : index
    %c0_126 = arith.constant 0 : index
    %c0_127 = arith.constant 0 : index
    %c0_128 = arith.constant 0 : index
    %159 = vector.load %arg11[%c2_125, %c0_126, %c0_127, %c0_128] : memref<4x4x1x8xf32, #tpu.memory_space<vmem>>, vector<1x4x1x8xf32>
    %160 = vector.shape_cast %159 : vector<1x4x1x8xf32> to vector<4x1x8xf32>
    %161 = vector.broadcast %160 : vector<4x1x8xf32> to vector<4x8x8xf32>
    %162 = arith.addf %158, %161 : vector<4x8x8xf32>
    %c2_129 = arith.constant 2 : index
    %c0_130 = arith.constant 0 : index
    %c0_131 = arith.constant 0 : index
    %c0_132 = arith.constant 0 : index
    %163 = vector.load %arg12[%c2_129, %c0_130, %c0_131, %c0_132] : memref<4x4x32x8xbf16, #tpu.memory_space<vmem>>, vector<1x4x32x8xbf16>
    %164 = vector.shape_cast %163 : vector<1x4x32x8xbf16> to vector<4x32x8xbf16>
    "tpu.trace_start"() <{level = 10 : i32, message = "hke,hed->hkd"}> : () -> ()
    %cst_133 = arith.constant dense<0.000000e+00> : vector<4x8x8xf32>
    %165 = tpu.matmul %37, %164, %cst_133 {dimension_numbers = #tpu.dot_dimension_numbers<[2], [1], [1], [2], [0, 0, 0, 1, 1, 2], [0], [0]>} : vector<4x8x32xbf16>, vector<4x32x8xbf16>, vector<4x8x8xf32> -> vector<4x8x8xf32>
    "tpu.trace_stop"() : () -> ()
    %c2_134 = arith.constant 2 : index
    %c0_135 = arith.constant 0 : index
    %c0_136 = arith.constant 0 : index
    %c0_137 = arith.constant 0 : index
    %166 = vector.load %arg13[%c2_134, %c0_135, %c0_136, %c0_137] : memref<4x4x1x8xf32, #tpu.memory_space<vmem>>, vector<1x4x1x8xf32>
    %167 = vector.shape_cast %166 : vector<1x4x1x8xf32> to vector<4x1x8xf32>
    %168 = vector.broadcast %167 : vector<4x1x8xf32> to vector<4x8x8xf32>
    %169 = arith.addf %165, %168 : vector<4x8x8xf32>
    %170 = arith.truncf %155 : vector<4x4x8xf32> to vector<4x4x8xbf16>
    %171 = arith.truncf %162 : vector<4x8x8xf32> to vector<4x8x8xbf16>
    "tpu.trace_start"() <{level = 10 : i32, message = "hqd,hkd->hqk"}> : () -> ()
    %cst_138 = arith.constant dense<0.000000e+00> : vector<4x4x8xf32>
    %172 = tpu.matmul %170, %171, %cst_138 {dimension_numbers = #tpu.dot_dimension_numbers<[2], [2], [1], [1], [0, 0, 0, 1, 1, 1], [0], [0]>} : vector<4x4x8xbf16>, vector<4x8x8xbf16>, vector<4x4x8xf32> -> vector<4x4x8xf32>
    "tpu.trace_stop"() : () -> ()
    %cst_139 = arith.constant 0.353553385 : f32
    %173 = vector.broadcast %cst_139 : f32 to vector<4x4x8xf32>
    %174 = arith.mulf %172, %173 : vector<4x4x8xf32>
    %175 = vector.shape_cast %7 : vector<1x8xf32> to vector<1x1x8xf32>
    %176 = vector.broadcast %175 : vector<1x1x8xf32> to vector<4x4x8xf32>
    %177 = arith.addf %174, %176 : vector<4x4x8xf32>
    %cst_140 = arith.constant dense<0xFF800000> : vector<4x4xf32>
    %178 = vector.multi_reduction <maximumf>, %177, %cst_140 [2] : vector<4x4x8xf32> to vector<4x4xf32>
    %179 = vector.shape_cast %178 : vector<4x4xf32> to vector<4x4x1xf32>
    %180 = vector.broadcast %179 : vector<4x4x1xf32> to vector<4x4x8xf32>
    %181 = arith.subf %177, %180 : vector<4x4x8xf32>
    %182 = math.exp %181 : vector<4x4x8xf32>
    %cst_141 = arith.constant dense<0.000000e+00> : vector<4x4xf32>
    %183 = vector.multi_reduction <add>, %182, %cst_141 [2] : vector<4x4x8xf32> to vector<4x4xf32>
    %184 = vector.shape_cast %183 : vector<4x4xf32> to vector<4x4x1xf32>
    %185 = tpu.reciprocal %184 {approx = true} : vector<4x4x1xf32> -> vector<4x4x1xf32>
    %186 = vector.broadcast %185 : vector<4x4x1xf32> to vector<4x4x8xf32>
    %187 = arith.mulf %182, %186 : vector<4x4x8xf32>
    %188 = arith.truncf %187 : vector<4x4x8xf32> to vector<4x4x8xbf16>
    %189 = arith.truncf %169 : vector<4x8x8xf32> to vector<4x8x8xbf16>
    "tpu.trace_start"() <{level = 10 : i32, message = "hqk,hkd->hqd"}> : () -> ()
    %cst_142 = arith.constant dense<0.000000e+00> : vector<4x4x8xf32>
    %190 = tpu.matmul %188, %189, %cst_142 {dimension_numbers = #tpu.dot_dimension_numbers<[2], [1], [1], [2], [0, 0, 0, 1, 1, 2], [0], [0]>} : vector<4x4x8xbf16>, vector<4x8x8xbf16>, vector<4x4x8xf32> -> vector<4x4x8xf32>
    "tpu.trace_stop"() : () -> ()
    %191 = arith.truncf %190 : vector<4x4x8xf32> to vector<4x4x8xbf16>
    %c2_143 = arith.constant 2 : index
    %c0_144 = arith.constant 0 : index
    %c0_145 = arith.constant 0 : index
    %c0_146 = arith.constant 0 : index
    %192 = vector.load %arg14[%c2_143, %c0_144, %c0_145, %c0_146] : memref<4x4x8x32xbf16, #tpu.memory_space<vmem>>, vector<1x4x8x32xbf16>
    %193 = vector.shape_cast %192 : vector<1x4x8x32xbf16> to vector<4x8x32xbf16>
    "tpu.trace_start"() <{level = 10 : i32, message = "hqd,hdo->hqo"}> : () -> ()
    %cst_147 = arith.constant dense<0.000000e+00> : vector<4x4x32xf32>
    %194 = tpu.matmul %191, %193, %cst_147 {dimension_numbers = #tpu.dot_dimension_numbers<[2], [1], [1], [2], [0, 0, 0, 1, 1, 2], [0], [0]>} : vector<4x4x8xbf16>, vector<4x8x32xbf16>, vector<4x4x32xf32> -> vector<4x4x32xf32>
    "tpu.trace_stop"() : () -> ()
    %cst_148 = arith.constant dense<0.000000e+00> : vector<4x32xf32>
    %195 = vector.multi_reduction <add>, %194, %cst_148 [0] : vector<4x4x32xf32> to vector<4x32xf32>
    %c2_149 = arith.constant 2 : index
    %c0_150 = arith.constant 0 : index
    %c0_151 = arith.constant 0 : index
    %196 = vector.load %arg15[%c2_149, %c0_150, %c0_151] : memref<4x1x32xf32, #tpu.memory_space<vmem>>, vector<1x1x32xf32>
    %197 = vector.shape_cast %196 : vector<1x1x32xf32> to vector<1x32xf32>
    %198 = vector.broadcast %197 : vector<1x32xf32> to vector<4x32xf32>
    %199 = arith.addf %195, %198 : vector<4x32xf32>
    %200 = arith.truncf %34 : vector<4x32xf32> to vector<4x32xbf16>
    %201 = vector.shape_cast %200 : vector<4x32xbf16> to vector<1x4x32xbf16>
    %202 = vector.broadcast %201 : vector<1x4x32xbf16> to vector<4x4x32xbf16>
    %c3 = arith.constant 3 : index
    %c0_152 = arith.constant 0 : index
    %c0_153 = arith.constant 0 : index
    %c0_154 = arith.constant 0 : index
    %203 = vector.load %arg8[%c3, %c0_152, %c0_153, %c0_154] : memref<4x4x32x8xbf16, #tpu.memory_space<vmem>>, vector<1x4x32x8xbf16>
    %204 = vector.shape_cast %203 : vector<1x4x32x8xbf16> to vector<4x32x8xbf16>
    "tpu.trace_start"() <{level = 10 : i32, message = "hqe,hed->hqd"}> : () -> ()
    %cst_155 = arith.constant dense<0.000000e+00> : vector<4x4x8xf32>
    %205 = tpu.matmul %202, %204, %cst_155 {dimension_numbers = #tpu.dot_dimension_numbers<[2], [1], [1], [2], [0, 0, 0, 1, 1, 2], [0], [0]>} : vector<4x4x32xbf16>, vector<4x32x8xbf16>, vector<4x4x8xf32> -> vector<4x4x8xf32>
    "tpu.trace_stop"() : () -> ()
    %c3_156 = arith.constant 3 : index
    %c0_157 = arith.constant 0 : index
    %c0_158 = arith.constant 0 : index
    %c0_159 = arith.constant 0 : index
    %206 = vector.load %arg9[%c3_156, %c0_157, %c0_158, %c0_159] : memref<4x4x1x8xf32, #tpu.memory_space<vmem>>, vector<1x4x1x8xf32>
    %207 = vector.shape_cast %206 : vector<1x4x1x8xf32> to vector<4x1x8xf32>
    %208 = vector.broadcast %207 : vector<4x1x8xf32> to vector<4x4x8xf32>
    %209 = arith.addf %205, %208 : vector<4x4x8xf32>
    %c3_160 = arith.constant 3 : index
    %c0_161 = arith.constant 0 : index
    %c0_162 = arith.constant 0 : index
    %c0_163 = arith.constant 0 : index
    %210 = vector.load %arg10[%c3_160, %c0_161, %c0_162, %c0_163] : memref<4x4x32x8xbf16, #tpu.memory_space<vmem>>, vector<1x4x32x8xbf16>
    %211 = vector.shape_cast %210 : vector<1x4x32x8xbf16> to vector<4x32x8xbf16>
    "tpu.trace_start"() <{level = 10 : i32, message = "hke,hed->hkd"}> : () -> ()
    %cst_164 = arith.constant dense<0.000000e+00> : vector<4x8x8xf32>
    %212 = tpu.matmul %37, %211, %cst_164 {dimension_numbers = #tpu.dot_dimension_numbers<[2], [1], [1], [2], [0, 0, 0, 1, 1, 2], [0], [0]>} : vector<4x8x32xbf16>, vector<4x32x8xbf16>, vector<4x8x8xf32> -> vector<4x8x8xf32>
    "tpu.trace_stop"() : () -> ()
    %c3_165 = arith.constant 3 : index
    %c0_166 = arith.constant 0 : index
    %c0_167 = arith.constant 0 : index
    %c0_168 = arith.constant 0 : index
    %213 = vector.load %arg11[%c3_165, %c0_166, %c0_167, %c0_168] : memref<4x4x1x8xf32, #tpu.memory_space<vmem>>, vector<1x4x1x8xf32>
    %214 = vector.shape_cast %213 : vector<1x4x1x8xf32> to vector<4x1x8xf32>
    %215 = vector.broadcast %214 : vector<4x1x8xf32> to vector<4x8x8xf32>
    %216 = arith.addf %212, %215 : vector<4x8x8xf32>
    %c3_169 = arith.constant 3 : index
    %c0_170 = arith.constant 0 : index
    %c0_171 = arith.constant 0 : index
    %c0_172 = arith.constant 0 : index
    %217 = vector.load %arg12[%c3_169, %c0_170, %c0_171, %c0_172] : memref<4x4x32x8xbf16, #tpu.memory_space<vmem>>, vector<1x4x32x8xbf16>
    %218 = vector.shape_cast %217 : vector<1x4x32x8xbf16> to vector<4x32x8xbf16>
    "tpu.trace_start"() <{level = 10 : i32, message = "hke,hed->hkd"}> : () -> ()
    %cst_173 = arith.constant dense<0.000000e+00> : vector<4x8x8xf32>
    %219 = tpu.matmul %37, %218, %cst_173 {dimension_numbers = #tpu.dot_dimension_numbers<[2], [1], [1], [2], [0, 0, 0, 1, 1, 2], [0], [0]>} : vector<4x8x32xbf16>, vector<4x32x8xbf16>, vector<4x8x8xf32> -> vector<4x8x8xf32>
    "tpu.trace_stop"() : () -> ()
    %c3_174 = arith.constant 3 : index
    %c0_175 = arith.constant 0 : index
    %c0_176 = arith.constant 0 : index
    %c0_177 = arith.constant 0 : index
    %220 = vector.load %arg13[%c3_174, %c0_175, %c0_176, %c0_177] : memref<4x4x1x8xf32, #tpu.memory_space<vmem>>, vector<1x4x1x8xf32>
    %221 = vector.shape_cast %220 : vector<1x4x1x8xf32> to vector<4x1x8xf32>
    %222 = vector.broadcast %221 : vector<4x1x8xf32> to vector<4x8x8xf32>
    %223 = arith.addf %219, %222 : vector<4x8x8xf32>
    %224 = arith.truncf %209 : vector<4x4x8xf32> to vector<4x4x8xbf16>
    %225 = arith.truncf %216 : vector<4x8x8xf32> to vector<4x8x8xbf16>
    "tpu.trace_start"() <{level = 10 : i32, message = "hqd,hkd->hqk"}> : () -> ()
    %cst_178 = arith.constant dense<0.000000e+00> : vector<4x4x8xf32>
    %226 = tpu.matmul %224, %225, %cst_178 {dimension_numbers = #tpu.dot_dimension_numbers<[2], [2], [1], [1], [0, 0, 0, 1, 1, 1], [0], [0]>} : vector<4x4x8xbf16>, vector<4x8x8xbf16>, vector<4x4x8xf32> -> vector<4x4x8xf32>
    "tpu.trace_stop"() : () -> ()
    %cst_179 = arith.constant 0.353553385 : f32
    %227 = vector.broadcast %cst_179 : f32 to vector<4x4x8xf32>
    %228 = arith.mulf %226, %227 : vector<4x4x8xf32>
    %229 = vector.shape_cast %7 : vector<1x8xf32> to vector<1x1x8xf32>
    %230 = vector.broadcast %229 : vector<1x1x8xf32> to vector<4x4x8xf32>
    %231 = arith.addf %228, %230 : vector<4x4x8xf32>
    %cst_180 = arith.constant dense<0xFF800000> : vector<4x4xf32>
    %232 = vector.multi_reduction <maximumf>, %231, %cst_180 [2] : vector<4x4x8xf32> to vector<4x4xf32>
    %233 = vector.shape_cast %232 : vector<4x4xf32> to vector<4x4x1xf32>
    %234 = vector.broadcast %233 : vector<4x4x1xf32> to vector<4x4x8xf32>
    %235 = arith.subf %231, %234 : vector<4x4x8xf32>
    %236 = math.exp %235 : vector<4x4x8xf32>
    %cst_181 = arith.constant dense<0.000000e+00> : vector<4x4xf32>
    %237 = vector.multi_reduction <add>, %236, %cst_181 [2] : vector<4x4x8xf32> to vector<4x4xf32>
    %238 = vector.shape_cast %237 : vector<4x4xf32> to vector<4x4x1xf32>
    %239 = tpu.reciprocal %238 {approx = true} : vector<4x4x1xf32> -> vector<4x4x1xf32>
    %240 = vector.broadcast %239 : vector<4x4x1xf32> to vector<4x4x8xf32>
    %241 = arith.mulf %236, %240 : vector<4x4x8xf32>
    %242 = arith.truncf %241 : vector<4x4x8xf32> to vector<4x4x8xbf16>
    %243 = arith.truncf %223 : vector<4x8x8xf32> to vector<4x8x8xbf16>
    "tpu.trace_start"() <{level = 10 : i32, message = "hqk,hkd->hqd"}> : () -> ()
    %cst_182 = arith.constant dense<0.000000e+00> : vector<4x4x8xf32>
    %244 = tpu.matmul %242, %243, %cst_182 {dimension_numbers = #tpu.dot_dimension_numbers<[2], [1], [1], [2], [0, 0, 0, 1, 1, 2], [0], [0]>} : vector<4x4x8xbf16>, vector<4x8x8xbf16>, vector<4x4x8xf32> -> vector<4x4x8xf32>
    "tpu.trace_stop"() : () -> ()
    %245 = arith.truncf %244 : vector<4x4x8xf32> to vector<4x4x8xbf16>
    %c3_183 = arith.constant 3 : index
    %c0_184 = arith.constant 0 : index
    %c0_185 = arith.constant 0 : index
    %c0_186 = arith.constant 0 : index
    %246 = vector.load %arg14[%c3_183, %c0_184, %c0_185, %c0_186] : memref<4x4x8x32xbf16, #tpu.memory_space<vmem>>, vector<1x4x8x32xbf16>
    %247 = vector.shape_cast %246 : vector<1x4x8x32xbf16> to vector<4x8x32xbf16>
    "tpu.trace_start"() <{level = 10 : i32, message = "hqd,hdo->hqo"}> : () -> ()
    %cst_187 = arith.constant dense<0.000000e+00> : vector<4x4x32xf32>
    %248 = tpu.matmul %245, %247, %cst_187 {dimension_numbers = #tpu.dot_dimension_numbers<[2], [1], [1], [2], [0, 0, 0, 1, 1, 2], [0], [0]>} : vector<4x4x8xbf16>, vector<4x8x32xbf16>, vector<4x4x32xf32> -> vector<4x4x32xf32>
    "tpu.trace_stop"() : () -> ()
    %cst_188 = arith.constant dense<0.000000e+00> : vector<4x32xf32>
    %249 = vector.multi_reduction <add>, %248, %cst_188 [0] : vector<4x4x32xf32> to vector<4x32xf32>
    %c3_189 = arith.constant 3 : index
    %c0_190 = arith.constant 0 : index
    %c0_191 = arith.constant 0 : index
    %250 = vector.load %arg15[%c3_189, %c0_190, %c0_191] : memref<4x1x32xf32, #tpu.memory_space<vmem>>, vector<1x1x32xf32>
    %251 = vector.shape_cast %250 : vector<1x1x32xf32> to vector<1x32xf32>
    %252 = vector.broadcast %251 : vector<1x32xf32> to vector<4x32xf32>
    %253 = arith.addf %249, %252 : vector<4x32xf32>
    %254 = tpu.concatenate %199, %253, %91, %145 in 0 : vector<4x32xf32>, vector<4x32xf32>, vector<6x32xf32>, vector<6x32xf32> -> vector<20x32xf32>
    %255 = arith.truncf %254 : vector<20x32xf32> to vector<20x32xbf16>
    %c0_192 = arith.constant 0 : index
    %c0_193 = arith.constant 0 : index
    %256 = vector.load %arg16[%c0_192, %c0_193] : memref<32x32xbf16, #tpu.memory_space<vmem>>, vector<32x32xbf16>
    %cst_194 = arith.constant dense<0.000000e+00> : vector<20x32xf32>
    %257 = tpu.matmul %255, %256, %cst_194 {dimension_numbers = #tpu.dot_dimension_numbers<[1], [0], [0], [1], [0, 0, 1, 1], [], []>} : vector<20x32xbf16>, vector<32x32xbf16>, vector<20x32xf32> -> vector<20x32xf32>
    %258 = arith.truncf %257 : vector<20x32xf32> to vector<20x32xbf16>
    %cst_195 = arith.constant dense<0.000000e+00> : vector<20x20xf32>
    %259 = tpu.matmul %258, %255, %cst_195 {dimension_numbers = #tpu.dot_dimension_numbers<[1], [1], [0], [0], [0, 0, 1, 0], [], []>} : vector<20x32xbf16>, vector<20x32xbf16>, vector<20x20xf32> -> vector<20x20xf32>
    %cst_196 = arith.constant 0.176776692 : f32
    %260 = vector.broadcast %cst_196 : f32 to vector<20x20xf32>
    %261 = arith.mulf %259, %260 : vector<20x20xf32>
    %cst_197 = arith.constant dense<0xFF800000> : vector<20xf32>
    %262 = vector.multi_reduction <maximumf>, %261, %cst_197 [1] : vector<20x20xf32> to vector<20xf32>
    %263 = vector.shape_cast %262 : vector<20xf32> to vector<20x1xf32>
    %264 = vector.broadcast %263 : vector<20x1xf32> to vector<20x20xf32>
    %265 = arith.subf %261, %264 : vector<20x20xf32>
    %266 = math.exp %265 : vector<20x20xf32>
    %cst_198 = arith.constant dense<0.000000e+00> : vector<20xf32>
    %267 = vector.multi_reduction <add>, %266, %cst_198 [1] : vector<20x20xf32> to vector<20xf32>
    %268 = vector.shape_cast %267 : vector<20xf32> to vector<20x1xf32>
    %269 = tpu.reciprocal %268 {approx = true} : vector<20x1xf32> -> vector<20x1xf32>
    %270 = vector.broadcast %269 : vector<20x1xf32> to vector<20x20xf32>
    %271 = arith.mulf %266, %270 : vector<20x20xf32>
    %272 = arith.truncf %271 : vector<20x20xf32> to vector<20x20xbf16>
    %cst_199 = arith.constant dense<0.000000e+00> : vector<20x32xf32>
    %273 = tpu.matmul %272, %255, %cst_199 {dimension_numbers = #tpu.dot_dimension_numbers<[1], [0], [0], [1], [0, 0, 1, 1], [], []>} : vector<20x20xbf16>, vector<20x32xbf16>, vector<20x32xf32> -> vector<20x32xf32>
    %274 = arith.truncf %273 : vector<20x32xf32> to vector<20x32xbf16>
    %c0_200 = arith.constant 0 : index
    %c0_201 = arith.constant 0 : index
    %275 = vector.load %arg17[%c0_200, %c0_201] : memref<32x32xbf16, #tpu.memory_space<vmem>>, vector<32x32xbf16>
    %cst_202 = arith.constant dense<0.000000e+00> : vector<20x32xf32>
    %276 = tpu.matmul %274, %275, %cst_202 {dimension_numbers = #tpu.dot_dimension_numbers<[1], [0], [0], [1], [0, 0, 1, 1], [], []>} : vector<20x32xbf16>, vector<32x32xbf16>, vector<20x32xf32> -> vector<20x32xf32>
    %c0_203 = arith.constant 0 : index
    %c0_204 = arith.constant 0 : index
    %277 = vector.load %arg18[%c0_203, %c0_204] : memref<1x32xf32, #tpu.memory_space<vmem>>, vector<1x32xf32>
    %278 = vector.broadcast %277 : vector<1x32xf32> to vector<20x32xf32>
    %279 = arith.addf %276, %278 : vector<20x32xf32>
    %cst_205 = arith.constant 0.000000e+00 : f32
    %280 = vector.broadcast %cst_205 : f32 to vector<20x32xf32>
    %281 = arith.maximumf %279, %280 : vector<20x32xf32>
    %cst_206 = arith.constant dense<0.000000e+00> : vector<32xf32>
    %282 = vector.multi_reduction <add>, %281, %cst_206 [0] : vector<20x32xf32> to vector<32xf32>
    %283 = vector.shape_cast %282 : vector<32xf32> to vector<1x32xf32>
    %cst_207 = arith.constant 2.000000e+01 : f32
    %284 = vector.broadcast %cst_207 : f32 to vector<1x32xf32>
    %285 = arith.divf %283, %284 : vector<1x32xf32>
    %c0_208 = arith.constant 0 : index
    %c0_209 = arith.constant 0 : index
    %c0_210 = arith.constant 0 : index
    %286 = vector.load %arg19[%c0_208, %c0_209, %c0_210] : memref<1x1x32xf32, #tpu.memory_space<vmem>>, vector<1x1x32xf32>
    %287 = vector.shape_cast %286 : vector<1x1x32xf32> to vector<1x32xf32>
    %288 = vector.shape_cast %285 : vector<1x32xf32> to vector<1x1x32xf32>
    tpu.vector_store %arg19[%c0_208, %c0_209, %c0_210], %288 {strides = array<i32>} : memref<1x1x32xf32, #tpu.memory_space<vmem>>, vector<1x1x32xf32>,
    return
  }
  func.func @transform_0(%arg0: i32) -> (i32, i32, i32) {
    %c0_i32 = arith.constant 0 : i32
    %c0_i32_0 = arith.constant 0 : i32
    %c0_i32_1 = arith.constant 0 : i32
    return %arg0, %c0_i32, %c0_i32_0 : i32, i32, i32
  }
  func.func @transform_1(%arg0: i32) -> (i32, i32, i32) {
    %c0_i32 = arith.constant 0 : i32
    %c0_i32_0 = arith.constant 0 : i32
    %c0_i32_1 = arith.constant 0 : i32
    return %arg0, %c0_i32, %c0_i32_0 : i32, i32, i32
  }
  func.func @transform_2(%arg0: i32) -> (i32, i32, i32, i32) {
    %c0_i32 = arith.constant 0 : i32
    %c0_i32_0 = arith.constant 0 : i32
    %c0_i32_1 = arith.constant 0 : i32
    %c0_i32_2 = arith.constant 0 : i32
    return %arg0, %c0_i32, %c0_i32_0, %c0_i32_1 : i32, i32, i32, i32
  }
  func.func @transform_3(%arg0: i32) -> (i32, i32, i32, i32) {
    %c0_i32 = arith.constant 0 : i32
    %c0_i32_0 = arith.constant 0 : i32
    %c0_i32_1 = arith.constant 0 : i32
    %c0_i32_2 = arith.constant 0 : i32
    return %arg0, %c0_i32, %c0_i32_0, %c0_i32_1 : i32, i32, i32, i32
  }
  func.func @transform_4(%arg0: i32) -> (i32, i32, i32, i32) {
    %c0_i32 = arith.constant 0 : i32
    %c0_i32_0 = arith.constant 0 : i32
    %c0_i32_1 = arith.constant 0 : i32
    %c0_i32_2 = arith.constant 0 : i32
    return %arg0, %c0_i32, %c0_i32_0, %c0_i32_1 : i32, i32, i32, i32
  }
  func.func @transform_5(%arg0: i32) -> (i32, i32, i32) {
    %c0_i32 = arith.constant 0 : i32
    %c0_i32_0 = arith.constant 0 : i32
    %c0_i32_1 = arith.constant 0 : i32
    return %arg0, %c0_i32, %c0_i32_0 : i32, i32, i32
  }
  func.func @transform_6(%arg0: i32) -> (i32, i32, i32) {
    %c0_i32 = arith.constant 0 : i32
    %c0_i32_0 = arith.constant 0 : i32
    %c0_i32_1 = arith.constant 0 : i32
    return %arg0, %c0_i32, %c0_i32_0 : i32, i32, i32
  }
  func.func @transform_7(%arg0: i32) -> (i32, i32, i32, i32) {
    %c0_i32 = arith.constant 0 : i32
    %c0_i32_0 = arith.constant 0 : i32
    %c0_i32_1 = arith.constant 0 : i32
    %c0_i32_2 = arith.constant 0 : i32
    %c0_i32_3 = arith.constant 0 : i32
    return %c0_i32, %c0_i32_0, %c0_i32_1, %c0_i32_2 : i32, i32, i32, i32
  }
  func.func @transform_8(%arg0: i32) -> (i32, i32, i32, i32) {
    %c0_i32 = arith.constant 0 : i32
    %c0_i32_0 = arith.constant 0 : i32
    %c0_i32_1 = arith.constant 0 : i32
    %c0_i32_2 = arith.constant 0 : i32
    %c0_i32_3 = arith.constant 0 : i32
    return %c0_i32, %c0_i32_0, %c0_i32_1, %c0_i32_2 : i32, i32, i32, i32
  }
  func.func @transform_9(%arg0: i32) -> (i32, i32, i32, i32) {
    %c0_i32 = arith.constant 0 : i32
    %c0_i32_0 = arith.constant 0 : i32
    %c0_i32_1 = arith.constant 0 : i32
    %c0_i32_2 = arith.constant 0 : i32
    %c0_i32_3 = arith.constant 0 : i32
    return %c0_i32, %c0_i32_0, %c0_i32_1, %c0_i32_2 : i32, i32, i32, i32
  }
  func.func @transform_10(%arg0: i32) -> (i32, i32, i32, i32) {
    %c0_i32 = arith.constant 0 : i32
    %c0_i32_0 = arith.constant 0 : i32
    %c0_i32_1 = arith.constant 0 : i32
    %c0_i32_2 = arith.constant 0 : i32
    %c0_i32_3 = arith.constant 0 : i32
    return %c0_i32, %c0_i32_0, %c0_i32_1, %c0_i32_2 : i32, i32, i32, i32
  }
  func.func @transform_11(%arg0: i32) -> (i32, i32, i32, i32) {
    %c0_i32 = arith.constant 0 : i32
    %c0_i32_0 = arith.constant 0 : i32
    %c0_i32_1 = arith.constant 0 : i32
    %c0_i32_2 = arith.constant 0 : i32
    %c0_i32_3 = arith.constant 0 : i32
    return %c0_i32, %c0_i32_0, %c0_i32_1, %c0_i32_2 : i32, i32, i32, i32
  }
  func.func @transform_12(%arg0: i32) -> (i32, i32, i32, i32) {
    %c0_i32 = arith.constant 0 : i32
    %c0_i32_0 = arith.constant 0 : i32
    %c0_i32_1 = arith.constant 0 : i32
    %c0_i32_2 = arith.constant 0 : i32
    %c0_i32_3 = arith.constant 0 : i32
    return %c0_i32, %c0_i32_0, %c0_i32_1, %c0_i32_2 : i32, i32, i32, i32
  }
  func.func @transform_13(%arg0: i32) -> (i32, i32, i32, i32) {
    %c0_i32 = arith.constant 0 : i32
    %c0_i32_0 = arith.constant 0 : i32
    %c0_i32_1 = arith.constant 0 : i32
    %c0_i32_2 = arith.constant 0 : i32
    %c0_i32_3 = arith.constant 0 : i32
    return %c0_i32, %c0_i32_0, %c0_i32_1, %c0_i32_2 : i32, i32, i32, i32
  }
  func.func @transform_14(%arg0: i32) -> (i32, i32, i32) {
    %c0_i32 = arith.constant 0 : i32
    %c0_i32_0 = arith.constant 0 : i32
    %c0_i32_1 = arith.constant 0 : i32
    %c0_i32_2 = arith.constant 0 : i32
    return %c0_i32, %c0_i32_0, %c0_i32_1 : i32, i32, i32
  }
  func.func @transform_15(%arg0: i32) -> (i32, i32) {
    %c0_i32 = arith.constant 0 : i32
    %c0_i32_0 = arith.constant 0 : i32
    %c0_i32_1 = arith.constant 0 : i32
    return %c0_i32, %c0_i32_0 : i32, i32
  }
  func.func @transform_16(%arg0: i32) -> (i32, i32) {
    %c0_i32 = arith.constant 0 : i32
    %c0_i32_0 = arith.constant 0 : i32
    %c0_i32_1 = arith.constant 0 : i32
    return %c0_i32, %c0_i32_0 : i32, i32
  }
  func.func @transform_17(%arg0: i32) -> (i32, i32) {
    %c0_i32 = arith.constant 0 : i32
    %c0_i32_0 = arith.constant 0 : i32
    %c0_i32_1 = arith.constant 0 : i32
    return %c0_i32, %c0_i32_0 : i32, i32
  }
  func.func @transform_18(%arg0: i32) -> (i32, i32, i32) {
    %c0_i32 = arith.constant 0 : i32
    %c0_i32_0 = arith.constant 0 : i32
    %c0_i32_1 = arith.constant 0 : i32
    return %arg0, %c0_i32, %c0_i32_0 : i32, i32, i32
  }
}

</mosaic_0001>

<bundles_post_ra>
// kernel: tpu_custom_call.1
= control target key start
LH: loop header
LB: loop body
LE: loop exit
PB: predicated region body
PF: predicated region fallthrough
CT: control target
= control target key end

     0   :  { %s11502_s0 = inlined_call_operand.hbm [shape: f32[2,8,32], index: 0, kind: input, shape index: {}]   ;;  %s11503_s1 = inlined_call_operand.hbm [shape: f32[2,1,8], index: 1, kind: input, shape index: {}]   ;;  %s11504_s2 = inlined_call_operand.hbm [shape: f32[2,6,10,32], index: 2, kind: input, shape index: {}]   ;;  %s11505_s3 = inlined_call_operand.hbm [shape: f32[2,6,10,1], index: 3, kind: input, shape index: {}]   ;;  %s11506_s4 = inlined_call_operand.hbm [shape: f32[2,4,3,32], index: 4, kind: input, shape index: {}]   ;;  %s11507_s5 = inlined_call_operand.hbm [shape: f32[2,6,32], index: 5, kind: input, shape index: {}]   ;;  %s11508_s6 = inlined_call_operand.hbm [shape: f32[2,4,32], index: 6, kind: input, shape index: {}]   ;;  %s11509_s7 = inlined_call_operand.hbm [shape: bf16[4,4,32,8], index: 7, kind: input, shape index: {}]   ;;  %s11510_s8 = inlined_call_operand.hbm [shape: f32[4,4,1,8], index: 8, kind: input, shape index: {}]   ;;  %s11511_s9 = inlined_call_operand.hbm [shape: bf16[4,4,32,8], index: 9, kind: input, shape index: {}]   ;;  %s11512_s10 = inlined_call_operand.hbm [shape: f32[4,4,1,8], index: 10, kind: input, shape index: {}]   ;;  %s11513_s11 = inlined_call_operand.hbm [shape: bf16[4,4,32,8], index: 11, kind: input, shape index: {}]   ;;  %s11514_s12 = inlined_call_operand.hbm [shape: f32[4,4,1,8], index: 12, kind: input, shape index: {}]   ;;  %s11515_s13 = inlined_call_operand.hbm [shape: bf16[4,4,8,32], index: 13, kind: input, shape index: {}]   ;;  %s11516_s14 = inlined_call_operand.hbm [shape: f32[4,1,32], index: 14, kind: input, shape index: {}]   ;;  %s11517_s15 = inlined_call_operand.hbm [shape: bf16[32,32], index: 15, kind: input, shape index: {}]   ;;  %s11518_s16 = inlined_call_operand.hbm [shape: bf16[32,32], index: 16, kind: input, shape index: {}]   ;;  %s11519_s17 = inlined_call_operand.hbm [shape: f32[1,32], index: 17, kind: input, shape index: {}]   ;;  %s11520_s18 = inlined_call_operand.hbm [shape: f32[2,1,32], index: 18, kind: output, shape index: {}]  }
   0x1   :  { %11563 = sst [smem:[#allocation48_spill]] %s11502_s0 }
   0x2   :  { %11564 = sst [smem:[#allocation49_spill]] %s11503_s1 }
   0x3   :  { %11565 = sst [smem:[#allocation50_spill]] %s11504_s2 }
   0x4   :  { %11566 = sst [smem:[#allocation51_spill]] %s11505_s3 }
   0x5   :  { %11567 = sst [smem:[#allocation52_spill]] %s11506_s4 }
   0x6   :  { %11568 = sst [smem:[#allocation53_spill]] %s11507_s5 }
   0x7   :  { %11569 = sst [smem:[#allocation54_spill]] %s11508_s6 }
   0x8   :  { %11570 = sst [smem:[#allocation55_spill]] %s11509_s7 }
   0x9   :  { %11571 = sst [smem:[#allocation56_spill]] %s11510_s8 }
   0xa   :  { %11572 = sst [smem:[#allocation57_spill]] %s11511_s9 }
   0xb   :  { %11573 = sst [smem:[#allocation58_spill]] %s11512_s10 }
   0xc   :  { %11574 = sst [smem:[#allocation59_spill]] %s11513_s11 }
   0xd   :  { %11575 = sst [smem:[#allocation60_spill]] %s11515_s13 }
   0xe   :  { %11576 = sst [smem:[#allocation61_spill]] %s11516_s14 }
   0xf   :  { %11577 = sst [smem:[#allocation62_spill]] %s11517_s15 }
  0x10   :  { %11578 = sst [smem:[#allocation63_spill]] %s11518_s16 }
  0x11   :  { %11579 = sst [smem:[#allocation64_spill]] %s11519_s17 }
  0x12   :  { %11580 = sst [smem:[#allocation65_spill]] %s11520_s18 }
  0x13   :  { %23 = vsyncpa [#allocation3], 0 }
  0x14   :  { %25 = vsyncpa [#allocation3 + $0x1], 0 }
  0x15   :  { %26 = vsyncpa [#allocation6], 0 }
  0x16   :  { %28 = vsyncpa [#allocation6 + $0x1], 0 }
  0x17   :  { %29 = vsyncpa [#allocation9], 0 }
  0x18   :  { %31 = vsyncpa [#allocation9 + $0x1], 0 }
  0x19   :  { %32 = vsyncpa [#allocation12], 0 }
  0x1a   :  { %34 = vsyncpa [#allocation12 + $0x1], 0 }
  0x1b   :  { %35 = vsyncpa [#allocation15], 0 }
  0x1c   :  { %36 = vsyncpa [#allocation18], 0 }
  0x1d   :  { %37 = vsyncpa [#allocation21], 0 }
  0x1e   :  { %38 = vsyncpa [#allocation24], 0 }
  0x1f   :  { %39 = vsyncpa [#allocation27], 0 }
  0x20   :  { %40 = vsyncpa [#allocation30], 0 }
  0x21   :  { %41 = vsyncpa [#allocation4], 0 }
  0x22   :  { %43 = vsyncpa [#allocation4 + $0x1], 0  ;;  %s10090_s27 = smov 0   ;;  %s10092_s28 = smov 0  }
  0x23   :  { %s10094_s29 = smov 0   ;;  %s10096_s30 = smov 0  }
  0x24 LB: > { %11581 = sst [smem:[#allocation43_spill]] %s9961_s29  ;;  %s9967_s0 = smov [#allocation14]   ;;  %s9965_s30 = sphi %s10096_s30, %s11651_s30   ;;  %s9961_s29 = sphi %s10094_s29, %s11653_s29   ;;  %s9957_s28 = sphi %s10092_s28, %s11655_s28   ;;  %s9953_s27 = sphi %s10090_s27, %s11654_s27  }
  0x25   : > { %s505_s19 = sshll.u32 %s9967_s0, 4  ;;  %s10111_s1 = sadd.s32 4294967295, %s9965_s30   ;;  %s10116_s19 = int_to_ptr.vmem [resolvable:$true] %s505_s19 }
  0x26   : > { %p7647_p0 = scmp.ge.s32.totalorder %s9965_s30, 1  ;;  %p11531_p1 = scmp.eq.s32.totalorder %s10111_s1, 0 }
  0x27   : > { %p493_p2 = scmp.lt.s32.totalorder %s9965_s30, 3  ;;  %s9968_s21 = smov [#allocation17]  }
  0x28   : > { %s531_s22 = sshll.u32 %s9968_s21, 4  ;;  %s9969_s23 = smov [#allocation20]   ;;  %s10131_s22 = int_to_ptr.vmem [resolvable:$true] %s531_s22 }
  0x29   : > { %p10118_p3 = pnand %p7647_p0, %p493_p2  ;;  %s557_s24 = sshll.u32 %s9969_s23, 4  ;;  %s10133_s24 = int_to_ptr.vmem [resolvable:$true] %s557_s24 }
  0x2a   : > { %s11585_s7 = sld [smem:[#allocation55_spill]] }
  0x2b   : > { %s11582_s20 = scalar_select %p10118_p3, 1, 0 }
  0x2c   : > { %p8989_p5 = pneg %p10118_p3 }
  0x2d   : > { %11583 = sst [smem:[#allocation44_spill]] %s11582_s20 }
  0x2e   : > { %p10127_p6 = pnand %p8989_p5, %p11531_p1 }
  0x30   : > { %s11584_s2 = scalar_select %p10127_p6, 1, 0 }
  0x31   : > { %s9345_s0 = scalar_lea.hbm %s11585_s7, 4096  ;;  %p10143_p8 = pneg %p10127_p6 }
  0x32   : > { %p9346_p7 = scmp.ne.s32.totalorder %s11585_s7, %s9345_s0  ;;  %p9352_p11 = scmp.lt.u32.totalorder %s9345_s0, %s11585_s7 }
  0x33   : > { %s11586_s21 = scalar_select %p10143_p8, 1, 0 }
  0x34   : > { %p9348_p9 = pnand %p10143_p8, %p9346_p7 }
  0x36   : > { %p9349_p10 = pneg %p9348_p9 }
  0x38   : > { %p9354_p12 = pnand %p9352_p11, %p9349_p10 }
  0x3a   : > { %9357 = shalt.err (!%p9354_p12)
}
  0x3b   : > { %s9358_s18 = scalar_lea.vmem %s10116_s19, 4096  ;;  %p9366_p5 = scmp.lt.s32.totalorder %s10116_s19, %s10116_s19 }
  0x3c   : > { %p9359_p13 = scmp.ne.s32.totalorder %s10116_s19, %s9358_s18  ;;  %p9367_p4 = scmp.lt.s32.totalorder %s9358_s18, %s9358_s18 }
  0x3e   : > { %p9361_p0 = pnand %p9359_p13, %p10143_p8  ;;  %p9368_p7 = por %p9367_p4, %p9366_p5 }
  0x40   : > { %p9362_p2 = pneg %p9361_p0 }
  0x42   : > { %p9369_p9 = pnand %p9368_p7, %p9362_p2 }
  0x44   : > { %9372 = shalt.err (!%p9369_p9)
}
  0x45   : > { %s11533_s20 = smov 64   ;;  %s11535_s6 = smov 4  }
  0x46   : > { %8992 = dma.hbm_to_vmem [thread:$0]  (!%p10127_p6), %s11585_s7, 4096, %s10116_s19, [#allocation15], %s11533_s20, %s11533_s20, %s11535_s6  }
  0x47   : > { %s11587_s9 = sld [smem:[#allocation57_spill]] }
  0x4d   : > { %s9373_s18 = scalar_lea.hbm %s11587_s9, 4096 }
  0x4e   : > { %p9374_p4 = scmp.ne.s32.totalorder %s11587_s9, %s9373_s18  ;;  %p9380_p12 = scmp.lt.u32.totalorder %s9373_s18, %s11587_s9 }
  0x50   : > { %p9376_p10 = pnand %p9374_p4, %p10143_p8 }
  0x52   : > { %p9377_p11 = pneg %p9376_p10 }
  0x54   : > { %p9382_p13 = pnand %p9380_p12, %p9377_p11 }
  0x56   : > { %9385 = shalt.err (!%p9382_p13)
}
  0x57   : > { %s9386_s19 = scalar_lea.vmem %s10131_s22, 4096  ;;  %p9394_p7 = scmp.lt.s32.totalorder %s10131_s22, %s10131_s22 }
  0x58   : > { %p9387_p0 = scmp.ne.s32.totalorder %s10131_s22, %s9386_s19  ;;  %p9395_p9 = scmp.lt.s32.totalorder %s9386_s19, %s9386_s19 }
  0x5a   : > { %p9389_p2 = pnand %p9387_p0, %p10143_p8  ;;  %p9396_p4 = por %p9395_p9, %p9394_p7 }
  0x5c   : > { %p9390_p5 = pneg %p9389_p2 }
  0x5e   : > { %p9397_p10 = pnand %p9396_p4, %p9390_p5 }
  0x60   : > { %9400 = shalt.err (!%p9397_p10)
}
  0x61   : > { %8998 = dma.hbm_to_vmem [thread:$0]  (!%p10127_p6), %s11587_s9, 4096, %s10131_s22, [#allocation18], %s11533_s20, %s11533_s20, %s11535_s6  }
  0x62   : > { %s11588_s11 = sld [smem:[#allocation59_spill]] }
  0x68   : > { %s9401_s25 = scalar_lea.hbm %s11588_s11, 4096 }
  0x69   : > { %p9402_p11 = scmp.ne.s32.totalorder %s11588_s11, %s9401_s25  ;;  %p9408_p0 = scmp.lt.u32.totalorder %s9401_s25, %s11588_s11 }
  0x6b   : > { %p9404_p12 = pnand %p9402_p11, %p10143_p8 }
  0x6d   : > { %p9405_p13 = pneg %p9404_p12 }
  0x6f   : > { %p9410_p2 = pnand %p9408_p0, %p9405_p13 }
  0x71   : > { %9413 = shalt.err (!%p9410_p2)
}
  0x72   : > { %s9414_s22 = scalar_lea.vmem %s10133_s24, 4096  ;;  %p9422_p4 = scmp.lt.s32.totalorder %s10133_s24, %s10133_s24 }
  0x73   : > { %p9415_p5 = scmp.ne.s32.totalorder %s10133_s24, %s9414_s22  ;;  %p9423_p10 = scmp.lt.s32.totalorder %s9414_s22, %s9414_s22 }
  0x75   : > { %p9417_p7 = pnand %p9415_p5, %p10143_p8  ;;  %p9424_p11 = por %p9423_p10, %p9422_p4 }
  0x77   : > { %p9418_p9 = pneg %p9417_p7 }
  0x79   : > { %p9425_p12 = pnand %p9424_p11, %p9418_p9 }
  0x7b   : > { %9428 = shalt.err (!%p9425_p12)
}
  0x7c   : > { %9004 = dma.hbm_to_vmem [thread:$0]  (!%p10127_p6), %s11588_s11, 4096, %s10133_s24, [#allocation21], %s11533_s20, %s11533_s20, %s11535_s6  }
  0x7d   : > { %s9972_s14 = smov [#allocation23]   ;;  %s9973_s17 = smov [#allocation26]  }
  0x7e   : > { %s583_s16 = sshll.u32 %s9972_s14, 4  ;;  %s609_s25 = sshll.u32 %s9973_s17, 4  ;;  %s584_s16 = int_to_ptr.vmem [resolvable:$true] %s583_s16  ;;  %s610_s25 = int_to_ptr.vmem [resolvable:$true] %s609_s25 }
  0x7f   : > { %s11589_s13 = sld [smem:[#allocation60_spill]] }
  0x85   : > { %s9429_s23 = scalar_lea.hbm %s11589_s13, 1024 }
  0x86   : > { %p9430_p13 = scmp.ne.s32.totalorder %s11589_s13, %s9429_s23  ;;  %p9436_p5 = scmp.lt.u32.totalorder %s9429_s23, %s11589_s13 }
  0x88   : > { %p9432_p0 = pnand %p9430_p13, %p10143_p8 }
  0x8a   : > { %p9433_p2 = pneg %p9432_p0 }
  0x8c   : > { %p9438_p7 = pnand %p9436_p5, %p9433_p2 }
  0x8e   : > { %9441 = shalt.err (!%p9438_p7)
}
  0x8f   : > { %s9442_s24 = scalar_lea.vmem %s584_s16, 1024  ;;  %p9450_p11 = scmp.lt.s32.totalorder %s584_s16, %s584_s16 }
  0x90   : > { %p9443_p9 = scmp.ne.s32.totalorder %s584_s16, %s9442_s24  ;;  %p9451_p12 = scmp.lt.s32.totalorder %s9442_s24, %s9442_s24 }
  0x92   : > { %p9445_p4 = pnand %p9443_p9, %p10143_p8  ;;  %p9452_p1 = por %p9451_p12, %p9450_p11 }
  0x94   : > { %p9446_p10 = pneg %p9445_p4 }
  0x96   : > { %p9453_p3 = pnand %p9452_p1, %p9446_p10 }
  0x98   : > { %9456 = shalt.err (!%p9453_p3)
}
  0x99   : > { %9010 = dma.hbm_to_vmem [thread:$0]  (!%p10127_p6), %s11589_s13, 1024, %s584_s16, [#allocation24], %s11533_s20, %s11533_s20, %s11535_s6  }
  0x9a   : > { %s11590_s15 = sld [smem:[#allocation62_spill]] }
  0xa0   : > { %s9457_s26 = scalar_lea.hbm %s11590_s15, 256 }
  0xa1   : > { %p9458_p1 = scmp.ne.s32.totalorder %s11590_s15, %s9457_s26  ;;  %p9464_p0 = scmp.lt.u32.totalorder %s9457_s26, %s11590_s15 }
  0xa3   : > { %p9460_p3 = pnand %p9458_p1, %p10143_p8 }
  0xa5   : > { %p9461_p13 = pneg %p9460_p3 }
  0xa7   : > { %p9466_p2 = pnand %p9464_p0, %p9461_p13 }
  0xa9   : > { %9469 = shalt.err (!%p9466_p2)
}
  0xaa   : > { %s9470_s19 = scalar_lea.vmem %s610_s25, 256  ;;  %p9478_p4 = scmp.lt.s32.totalorder %s610_s25, %s610_s25 }
  0xab   : > { %p9471_p5 = scmp.ne.s32.totalorder %s610_s25, %s9470_s19  ;;  %p9479_p10 = scmp.lt.s32.totalorder %s9470_s19, %s9470_s19 }
  0xad   : > { %p9473_p7 = pnand %p9471_p5, %p10143_p8  ;;  %p9480_p11 = por %p9479_p10, %p9478_p4 }
  0xaf   : > { %p9474_p9 = pneg %p9473_p7 }
  0xb1   : > { %p9481_p12 = pnand %p9480_p11, %p9474_p9 }
  0xb3   : > { %9484 = shalt.err (!%p9481_p12)
}
  0xb4   : > { %9016 = dma.hbm_to_vmem [thread:$0]  (!%p10127_p6), %s11590_s15, 256, %s610_s25, [#allocation27], %s11533_s20, %s11533_s20, %s11535_s6  }
  0xb5   : > { %s7646_s7 = sadd.s32 4294967294, %s9965_s30   ;;  %s10263_s4 = sadd.s32 1, %s9965_s30  }
  0xb6   : > { %11591 = sst [smem:[#allocation45_spill]] %s10263_s4  ;;  %s56_s14 = sadd.s32 1, %s9961_s29 }
  0xb7   : > { %s53_s17 = ssub.s32 %s9965_s30, %s10263_s4  ;;  %p63_p1 = scmp.ne.s32.totalorder %s9961_s29, %s9957_s28 }
  0xb8   : > { %p54_p3 = scmp.eq.s32.totalorder %s53_s17, 0  ;;  %p64_p13 = scmp.eq.s32.totalorder %s9965_s30, 0 }
  0xb9   : > { %p69_p0 = scmp.ne.s32.totalorder %s9957_s28, %s9953_s27  ;;  %p480_p2 = scmp.eq.s32.totalorder %s10111_s1, 1 }
  0xba   : > { %s10275_s26 = scalar_select %p54_p3, %s9961_s29, %s56_s14  }
  0xbb   : > { %p65_p5 = por %p64_p13, %p63_p1  ;;  %p11593_p7 = scmp.eq.s32.totalorder %s10111_s1, 0 }
  0xbc   : > { %11592 = sst [smem:[#allocation46_spill]] %s10275_s26  ;;  %p10283_p4 = por %p480_p2, %p63_p1 }
  0xbd   : > { %p10279_p9 = por %p11593_p7, %p69_p0  ;;  %p486_p10 = scmp.eq.s32.totalorder %s7646_s7, 1 }
  0xbe   : > { %s11595_s0 = scalar_select %p10283_p4, 1, 0 }
  0xbf   : > { %s11594_s25 = scalar_select %p10279_p9, 1, 0 }
  0xc0   : > { %p9060_p11 = scmp.lt.s32.totalorder %s9965_s30, 2  ;;  %s10289_s23 = sand.u32 1, %s9961_s29  }
  0xc1   : > { %p10291_p12 = por %p486_p10, %p69_p0  ;;  %s10296_s22 = sand.u32 1, %s9965_s30  }
  0xc2   : > { %p10298_p3 = pnand %p9060_p11, %p65_p5  ;;  %s7662_s16 = sshll.u32 %s9965_s30, 4 }
  0xc3   : > { %s11596_s18 = scalar_select %p10291_p12, 1, 0 }
  0xc4   : > { %s11598_s19 = scalar_select %p10298_p3, 1, 0 }
  0xc5   : > { %11597 = sst [smem:[#allocation47_spill]] %s11596_s18  ;;  %s11599_s14 = sld [smem:[#allocation49_spill]] }
  0xc6   : > { %s668_s20 = scalar_lea.vmem [#allocation5], %s10289_s23  ;;  %s11547_s11 = scalar_lea.sflag [#allocation6], %s10296_s22 }
  0xc7   : > { %s675_s6 = sshll.u32 %s668_s20, 4  ;;  %p10317_p13 = pneg %p10298_p3  ;;  %s10309_s6 = int_to_ptr.vmem [resolvable:$true] %s675_s6 }
  0xc9   : > { %s11600_s15 = scalar_select %p10317_p13, 1, 0 }
  0xcb   : > { %s10306_s17 = scalar_lea.hbm %s11599_s14, %s7662_s16  ;;  %s9490_s7 = scalar_lea.hbm %s11599_s14, 32 }
  0xcc   : > { %s9485_s13 = scalar_lea.hbm %s10306_s17, 16  ;;  %p9491_p5 = scmp.lt.u32.totalorder %s10306_s17, %s11599_s14 }
  0xcd   : > { %p9486_p1 = scmp.ne.s32.totalorder %s10306_s17, %s9485_s13  ;;  %p9492_p7 = scmp.lt.u32.totalorder %s9490_s7, %s9485_s13 }
  0xce   : > { %p9494_p11 = scmp.lt.u32.totalorder %s9485_s13, %s10306_s17 }
  0xcf   : > { %p9488_p0 = pnand %p10317_p13, %p9486_p1  ;;  %p9493_p10 = por %p9492_p7, %p9491_p5 }
  0xd1   : > { %p9489_p2 = pneg %p9488_p0  ;;  %p9495_p12 = por %p9494_p11, %p9493_p10 }
  0xd3   : > { %p9496_p4 = pnand %p9495_p12, %p9489_p2 }
  0xd5   : > { %9499 = shalt.err (!%p9496_p4)
}
  0xd6   : > { %s9500_s9 = scalar_lea.vmem %s10309_s6, 16  ;;  %s9974_s16 = smov [#allocation5]  }
  0xd7   : > { %p9501_p1 = scmp.ne.s32.totalorder %s10309_s6, %s9500_s9  ;;  %s9505_s24 = sshll.u32 %s9974_s16, 4  ;;  %s9506_s24 = int_to_ptr.vmem [resolvable:$false] %s9505_s24 }
  0xd8   : > { %s9507_s26 = scalar_lea.vmem %s9506_s24, 32  ;;  %p9508_p6 = scmp.lt.s32.totalorder %s10309_s6, %s9506_s24 }
  0xd9   : > { %p9503_p0 = pnand %p9501_p1, %p10317_p13  ;;  %p9509_p8 = scmp.lt.s32.totalorder %s9507_s26, %s9500_s9 }
  0xdb   : > { %p9504_p9 = pneg %p9503_p0  ;;  %p9510_p5 = por %p9509_p8, %p9508_p6 }
  0xdd   : > { %p9511_p7 = pnand %p9510_p5, %p9504_p9 }
  0xdf   : > { %9514 = shalt.err (!%p9511_p7)
}
  0xe0   : > { %9029 = dma.hbm_to_vmem [thread:$0]  (!%p10298_p3), %s10306_s17, 16, %s10309_s6, %s11547_s11  }
  0xe1   : > { %s11548_s13 = smul.u32 1536, %s9965_s30  ;;  %s11601_s3 = sld [smem:[#allocation51_spill]] }
  0xe2   : > { %s11602_s16 = smul.u32 96, %s10289_s23  ;;  %s11555_s14 = sshll.u32 %s10289_s23, 3 }
  0xe3   : > { %s11549_s29 = scalar_lea.sflag [#allocation9], %s10296_s22 }
  0xe4   : > { %s707_s24 = scalar_lea.vmem [#allocation8], %s11602_s16 }
  0xe5   : > { %s714_s26 = sshll.u32 %s707_s24, 4  ;;  %s10352_s26 = int_to_ptr.vmem [resolvable:$true] %s714_s26 }
  0xe7   : > { %s10348_s20 = scalar_lea.hbm %s11601_s3, %s11548_s13  ;;  %s9520_s7 = scalar_lea.hbm %s11601_s3, 3072 }
  0xe8   : > { %s9515_s4 = scalar_lea.hbm %s10348_s20, 1536  ;;  %p9521_p4 = scmp.lt.u32.totalorder %s10348_s20, %s11601_s3 }
  0xe9   : > { %p9516_p6 = scmp.ne.s32.totalorder %s10348_s20, %s9515_s4  ;;  %p9522_p12 = scmp.lt.u32.totalorder %s9520_s7, %s9515_s4 }
  0xea   : > { %p9524_p10 = scmp.lt.u32.totalorder %s9515_s4, %s10348_s20 }
  0xeb   : > { %p9518_p8 = pnand %p9516_p6, %p10317_p13  ;;  %p9523_p2 = por %p9522_p12, %p9521_p4 }
  0xed   : > { %p9519_p9 = pneg %p9518_p8  ;;  %p9525_p11 = por %p9524_p10, %p9523_p2 }
  0xef   : > { %p9526_p1 = pnand %p9525_p11, %p9519_p9 }
  0xf1   : > { %9529 = shalt.err (!%p9526_p1)
}
  0xf2   : > { %s9530_s16 = scalar_lea.vmem %s10352_s26, 1536  ;;  %s9975_s24 = smov [#allocation8]  }
  0xf3   : > { %p9531_p0 = scmp.ne.s32.totalorder %s10352_s26, %s9530_s16  ;;  %s9535_s6 = sshll.u32 %s9975_s24, 4  ;;  %s9536_s6 = int_to_ptr.vmem [resolvable:$false] %s9535_s6 }
  0xf4   : > { %s9537_s11 = scalar_lea.vmem %s9536_s6, 3072  ;;  %p9538_p6 = scmp.lt.s32.totalorder %s10352_s26, %s9536_s6 }
  0xf5   : > { %p9533_p5 = pnand %p9531_p0, %p10317_p13  ;;  %p9539_p8 = scmp.lt.s32.totalorder %s9537_s11, %s9530_s16 }
  0xf7   : > { %p9534_p7 = pneg %p9533_p5  ;;  %p9540_p4 = por %p9539_p8, %p9538_p6 }
  0xf9   : > { %p9541_p12 = pnand %p9540_p4, %p9534_p7 }
  0xfb   : > { %9544 = shalt.err (!%p9541_p12)
}
  0xfc   : > { %s11550_s4 = smov 128   ;;  %s11551_s17 = smov 8  }
  0xfd   : > { %9035 = dma.hbm_to_vmem [thread:$0]  (!%p10298_p3), %s10348_s20, 1536, %s10352_s26, %s11549_s29, %s11550_s4, %s11550_s4, %s11551_s17  }
  0xfe   : > { %s11556_s7 = sshll.u32 %s9965_s30, 7  ;;  %s11603_s5 = sld [smem:[#allocation53_spill]] }
  0xff   : > { %s749_s6 = scalar_lea.vmem [#allocation11], %s11555_s14  ;;  %s9978_s13 = smov [#allocation16]  }
 0x100   : > { %s756_s11 = sshll.u32 %s749_s6, 4  ;;  %s10394_s3 = sshll.u32 %s9978_s13, 4  ;;  %s10392_s11 = int_to_ptr.vmem [resolvable:$true] %s756_s11  ;;  %s519_s3 = int_to_ptr.vmem [resolvable:$true] %s10394_s3 }
 0x101   : > { %s11554_s20 = scalar_lea.sflag [#allocation12], %s10296_s22 }
 0x104   : > { %s10388_s24 = scalar_lea.hbm %s11603_s5, %s11556_s7  ;;  %s9550_s29 = scalar_lea.hbm %s11603_s5, 256 }
 0x105   : > { %s9545_s26 = scalar_lea.hbm %s10388_s24, 128  ;;  %p9551_p11 = scmp.lt.u32.totalorder %s10388_s24, %s11603_s5 }
 0x106   : > { %p9546_p9 = scmp.ne.s32.totalorder %s10388_s24, %s9545_s26  ;;  %p9552_p1 = scmp.lt.u32.totalorder %s9550_s29, %s9545_s26 }
 0x107   : > { %p9554_p5 = scmp.lt.u32.totalorder %s9545_s26, %s10388_s24 }
 0x108   : > { %p9548_p2 = pnand %p9546_p9, %p10317_p13  ;;  %p9553_p0 = por %p9552_p1, %p9551_p11 }
 0x10a   : > { %p9549_p10 = pneg %p9548_p2  ;;  %p9555_p7 = por %p9554_p5, %p9553_p0 }
 0x10c   : > { %p9556_p6 = pnand %p9555_p7, %p9549_p10 }
 0x10e   : > { %9559 = shalt.err (!%p9556_p6)
}
 0x10f   : > { %s9560_s13 = scalar_lea.vmem %s10392_s11, 128  ;;  %s9979_s6 = smov [#allocation11]  }
 0x110   : > { %p9561_p8 = scmp.ne.s32.totalorder %s10392_s11, %s9560_s13  ;;  %s9565_s9 = sshll.u32 %s9979_s6, 4  ;;  %s9566_s9 = int_to_ptr.vmem [resolvable:$false] %s9565_s9 }
 0x111   : > { %s9567_s4 = scalar_lea.vmem %s9566_s9, 256  ;;  %p9568_p9 = scmp.lt.s32.totalorder %s10392_s11, %s9566_s9 }
 0x112   : > { %p9563_p4 = pnand %p9561_p8, %p10317_p13  ;;  %p9569_p2 = scmp.lt.s32.totalorder %s9567_s4, %s9560_s13 }
 0x114   : > { %p9564_p12 = pneg %p9563_p4  ;;  %p9570_p11 = por %p9569_p2, %p9568_p9 }
 0x116   : > { %p9571_p1 = pnand %p9570_p11, %p9564_p12 }
 0x118   : > { %9574 = shalt.err (!%p9571_p1)
}
 0x119   : > { %9041 = dma.hbm_to_vmem [thread:$0]  (!%p10298_p3), %s10388_s24, 128, %s10392_s11, %s11554_s20  }
 0x11a   : > { %s11604_s8 = sld [smem:[#allocation56_spill]]  ;;  %p11605_p0 = scmp.ne.s32.totalorder %s11586_s21, 0 }
 0x120   : > { %s9575_s26 = scalar_lea.hbm %s11604_s8, 256 }
 0x121   : > { %p9576_p10 = scmp.ne.s32.totalorder %s11604_s8, %s9575_s26  ;;  %p9582_p6 = scmp.lt.u32.totalorder %s9575_s26, %s11604_s8 }
 0x123   : > { %p9578_p5 = pnand %p9576_p10, %p11605_p0 }
 0x125   : > { %p9579_p7 = pneg %p9578_p5 }
 0x127   : > { %p9584_p8 = pnand %p9582_p6, %p9579_p7 }
 0x129   : > { %9587 = shalt.err (!%p9584_p8)
}
 0x12a   : > { %s9588_s4 = scalar_lea.vmem %s519_s3, 256  ;;  %p9596_p2 = scmp.lt.s32.totalorder %s519_s3, %s519_s3 }
 0x12b   : > { %p9589_p4 = scmp.ne.s32.totalorder %s519_s3, %s9588_s4  ;;  %p9597_p11 = scmp.lt.s32.totalorder %s9588_s4, %s9588_s4 }
 0x12d   : > { %p9591_p12 = pnand %p9589_p4, %p11605_p0  ;;  %p9598_p1 = por %p9597_p11, %p9596_p2 }
 0x12f   : > { %p9592_p9 = pneg %p9591_p12 }
 0x131   : > { %p9599_p3 = pnand %p9598_p1, %p9592_p9 }
 0x133   : > { %9602 = shalt.err (!%p9599_p3)
}
 0x134   : > { %s9980_s24 = smov 16   ;;  %s9981_s11 = smov 1  }
 0x135   : > { %p11606_p10 = scmp.ne.s32.totalorder %s11584_s2, 0  ;;  %s9982_s26 = smov [#allocation19]  }
 0x136   : > { %s544_s16 = sshll.u32 %s9982_s26, 4  ;;  %s9983_s6 = smov [#allocation22]   ;;  %s545_s16 = int_to_ptr.vmem [resolvable:$true] %s544_s16 }
 0x137   : > { %8995 = dma.hbm_to_vmem [thread:$0]  (!%p11606_p10), %s11604_s8, 256, %s519_s3, [#allocation15], %s9980_s24, %s9980_s24, %s9981_s11  }
 0x138   : > { %s570_s13 = sshll.u32 %s9983_s6, 4  ;;  %s11607_s10 = sld [smem:[#allocation58_spill]]  ;;  %s571_s13 = int_to_ptr.vmem [resolvable:$true] %s570_s13 }
 0x13e   : > { %s9603_s20 = scalar_lea.hbm %s11607_s10, 256 }
 0x13f   : > { %p9604_p3 = scmp.ne.s32.totalorder %s11607_s10, %s9603_s20  ;;  %p9610_p6 = scmp.lt.u32.totalorder %s9603_s20, %s11607_s10 }
 0x141   : > { %p9606_p5 = pnand %p9604_p3, %p11605_p0 }
 0x143   : > { %p9607_p7 = pneg %p9606_p5 }
 0x145   : > { %p9612_p8 = pnand %p9610_p6, %p9607_p7 }
 0x147   : > { %9615 = shalt.err (!%p9612_p8)
}
 0x148   : > { %s9616_s3 = scalar_lea.vmem %s545_s16, 256  ;;  %p9624_p2 = scmp.lt.s32.totalorder %s545_s16, %s545_s16 }
 0x149   : > { %p9617_p4 = scmp.ne.s32.totalorder %s545_s16, %s9616_s3  ;;  %p9625_p11 = scmp.lt.s32.totalorder %s9616_s3, %s9616_s3 }
 0x14b   : > { %p9619_p12 = pnand %p9617_p4, %p11605_p0  ;;  %p9626_p1 = por %p9625_p11, %p9624_p2 }
 0x14d   : > { %p9620_p9 = pneg %p9619_p12 }
 0x14f   : > { %p9627_p13 = pnand %p9626_p1, %p9620_p9 }
 0x151   : > { %9630 = shalt.err (!%p9627_p13)
}
 0x152   : > { %9001 = dma.hbm_to_vmem [thread:$0]  (!%p11606_p10), %s11607_s10, 256, %s545_s16, [#allocation18], %s9980_s24, %s9980_s24, %s9981_s11  }
 0x153   : > { %s9631_s20 = scalar_lea.hbm %s11514_s12, 256 }
 0x154   : > { %p9632_p3 = scmp.ne.s32.totalorder %s11514_s12, %s9631_s20  ;;  %p9638_p7 = scmp.lt.u32.totalorder %s9631_s20, %s11514_s12 }
 0x156   : > { %p9634_p13 = pnand %p9632_p3, %p11605_p0 }
 0x158   : > { %p9635_p5 = pneg %p9634_p13 }
 0x15a   : > { %p9640_p6 = pnand %p9638_p7, %p9635_p5 }
 0x15c   : > { %9643 = shalt.err (!%p9640_p6)
}
 0x15d   : > { %s9644_s9 = scalar_lea.vmem %s571_s13, 256  ;;  %p9652_p9 = scmp.lt.s32.totalorder %s571_s13, %s571_s13 }
 0x15e   : > { %p9645_p8 = scmp.ne.s32.totalorder %s571_s13, %s9644_s9  ;;  %p9653_p2 = scmp.lt.s32.totalorder %s9644_s9, %s9644_s9 }
 0x160   : > { %p9647_p4 = pnand %p9645_p8, %p11605_p0  ;;  %p9654_p11 = por %p9653_p2, %p9652_p9 }
 0x162   : > { %p9648_p12 = pneg %p9647_p4 }
 0x164   : > { %p9655_p1 = pnand %p9654_p11, %p9648_p12 }
 0x166   : > { %9658 = shalt.err (!%p9655_p1)
}
 0x167   : > { %9007 = dma.hbm_to_vmem [thread:$0]  (!%p11606_p10), %s11514_s12, 256, %s571_s13, [#allocation21], %s9980_s24, %s9980_s24, %s9981_s11  }
 0x168   : > { %s9984_s3 = smov [#allocation25]   ;;  %s9985_s18 = smov [#allocation28]  }
 0x169   : > { %s596_s5 = sshll.u32 %s9984_s3, 4  ;;  %s622_s14 = sshll.u32 %s9985_s18, 4  ;;  %s597_s5 = int_to_ptr.vmem [resolvable:$true] %s596_s5  ;;  %s623_s14 = int_to_ptr.vmem [resolvable:$true] %s622_s14 }
 0x16a   : > { %s11608_s29 = sld [smem:[#allocation61_spill]] }
 0x170   : > { %s11609_s17 = smov %s11608_s29  ;;  %s9659_s26 = scalar_lea.hbm %s11608_s29, 64 }
 0x171   : > { %p9660_p3 = scmp.ne.s32.totalorder %s11609_s17, %s9659_s26  ;;  %p9666_p7 = scmp.lt.u32.totalorder %s9659_s26, %s11609_s17 }
 0x173   : > { %p9662_p13 = pnand %p9660_p3, %p11605_p0 }
 0x175   : > { %p9663_p5 = pneg %p9662_p13 }
 0x177   : > { %p9668_p6 = pnand %p9666_p7, %p9663_p5 }
 0x179   : > { %9671 = shalt.err (!%p9668_p6)
}
 0x17a   : > { %s9672_s13 = scalar_lea.vmem %s597_s5, 64  ;;  %p9680_p9 = scmp.lt.s32.totalorder %s597_s5, %s597_s5 }
 0x17b   : > { %p9673_p8 = scmp.ne.s32.totalorder %s597_s5, %s9672_s13  ;;  %p9681_p2 = scmp.lt.s32.totalorder %s9672_s13, %s9672_s13 }
 0x17d   : > { %p9675_p4 = pnand %p9673_p8, %p11605_p0  ;;  %p9682_p11 = por %p9681_p2, %p9680_p9 }
 0x17f   : > { %p9676_p12 = pneg %p9675_p4 }
 0x181   : > { %p9683_p1 = pnand %p9682_p11, %p9676_p12 }
 0x183   : > { %9686 = shalt.err (!%p9683_p1)
}
 0x184   : > { %9013 = dma.hbm_to_vmem [thread:$0]  (!%p11606_p10), %s11609_s17, 64, %s597_s5, [#allocation24], %s9980_s24, %s9980_s24, %s9981_s11  }
 0x185   : > { %s11610_s7 = sld [smem:[#allocation63_spill]] }
 0x18b   : > { %s9687_s20 = scalar_lea.hbm %s11610_s7, 256 }
 0x18c   : > { %p9688_p3 = scmp.ne.s32.totalorder %s11610_s7, %s9687_s20  ;;  %p9694_p7 = scmp.lt.u32.totalorder %s9687_s20, %s11610_s7 }
 0x18e   : > { %p9690_p13 = pnand %p9688_p3, %p11605_p0 }
 0x190   : > { %p9691_p5 = pneg %p9690_p13 }
 0x192   : > { %p9696_p6 = pnand %p9694_p7, %p9691_p5 }
 0x194   : > { %9699 = shalt.err (!%p9696_p6)
}
 0x195   : > { %s9700_s16 = scalar_lea.vmem %s623_s14, 256  ;;  %p9708_p9 = scmp.lt.s32.totalorder %s623_s14, %s623_s14 }
 0x196   : > { %p9701_p8 = scmp.ne.s32.totalorder %s623_s14, %s9700_s16  ;;  %p9709_p2 = scmp.lt.s32.totalorder %s9700_s16, %s9700_s16 }
 0x198   : > { %p9703_p4 = pnand %p9701_p8, %p11605_p0  ;;  %p9710_p11 = por %p9709_p2, %p9708_p9 }
 0x19a   : > { %p9704_p12 = pneg %p9703_p4 }
 0x19c   : > { %p9711_p1 = pnand %p9710_p11, %p9704_p12 }
 0x19e   : > { %9714 = shalt.err (!%p9711_p1)
}
 0x19f   : > { %s11611_s24 = smov 4   ;;  %s11612_s11 = smov 64  }
 0x1a0   : > { %9019 = dma.hbm_to_vmem [thread:$0]  (!%p11606_p10), %s11610_s7, 256, %s623_s14, [#allocation27], %s11612_s11, %s11612_s11, %s11611_s24  }
 0x1a1   : > { %s9986_s8 = smov [#allocation29]   ;;  %s11613_s20 = sld [smem:[#allocation64_spill]] }
 0x1a2   : > { %s636_s4 = sshll.u32 %s9986_s8, 4  ;;  %s637_s4 = int_to_ptr.vmem [resolvable:$true] %s636_s4 }
 0x1a7   : > { %s9715_s29 = scalar_lea.hbm %s11613_s20, 16 }
 0x1a8   : > { %p9716_p3 = scmp.ne.s32.totalorder %s11613_s20, %s9715_s29  ;;  %p9722_p7 = scmp.lt.u32.totalorder %s9715_s29, %s11613_s20 }
 0x1aa   : > { %p9718_p13 = pnand %p9716_p3, %p11605_p0 }
 0x1ac   : > { %p9719_p5 = pneg %p9718_p13 }
 0x1ae   : > { %p9724_p6 = pnand %p9722_p7, %p9719_p5 }
 0x1b0   : > { %9727 = shalt.err (!%p9724_p6)
}
 0x1b1   : > { %s9728_s14 = scalar_lea.vmem %s637_s4, 16  ;;  %s9735_s5 = scalar_lea.vmem %s637_s4, 32 }
 0x1b2   : > { %p9729_p8 = scmp.ne.s32.totalorder %s637_s4, %s9728_s14  ;;  %p9736_p9 = scmp.lt.s32.totalorder %s637_s4, %s637_s4 }
 0x1b3   : > { %p9737_p2 = scmp.lt.s32.totalorder %s9735_s5, %s9728_s14 }
 0x1b4   : > { %p9731_p4 = pnand %p9729_p8, %p11605_p0 }
 0x1b5   : > { %p9738_p11 = por %p9737_p2, %p9736_p9 }
 0x1b6   : > { %p9732_p12 = pneg %p9731_p4 }
 0x1b8   : > { %p9739_p1 = pnand %p9738_p11, %p9732_p12 }
 0x1ba   : > { %9742 = shalt.err (!%p9739_p1)
}
 0x1bb   : > { %9022 = dma.hbm_to_vmem [thread:$0]  (!%p11606_p10), %s11613_s20, 16, %s637_s4, [#allocation30]  }
 0x1bc   : > { %s11614_s3 = sshll.u32 %s9965_s30, 7  ;;  %s11615_s29 = sld [smem:[#allocation48_spill]] }
 0x1bd   : > { %s11617_s9 = sshll.u32 %s10289_s23, 3  ;;  %s648_s14 = scalar_lea.sflag [#allocation3], %s10289_s23 }
 0x1be   : > { %s651_s2 = scalar_lea.vmem [#allocation2], %s11617_s9  ;;  %p11618_p3 = scmp.ne.s32.totalorder %s11600_s15, 0 }
 0x1bf   : > { %s658_s16 = sshll.u32 %s651_s2, 4  ;;  %s659_s16 = int_to_ptr.vmem [resolvable:$true] %s658_s16 }
 0x1c2   : > { %s11616_s26 = smov %s11615_s29  ;;  %s10549_s6 = scalar_lea.hbm %s11615_s29, %s11614_s3 }
 0x1c3   : > { %s9743_s5 = scalar_lea.hbm %s10549_s6, 128  ;;  %s9748_s8 = scalar_lea.hbm %s11616_s26, 256 }
 0x1c4   : > { %p9744_p0 = scmp.ne.s32.totalorder %s10549_s6, %s9743_s5  ;;  %p9749_p5 = scmp.lt.u32.totalorder %s10549_s6, %s11616_s26 }
 0x1c5   : > { %p9750_p7 = scmp.lt.u32.totalorder %s9748_s8, %s9743_s5  ;;  %p9752_p8 = scmp.lt.u32.totalorder %s9743_s5, %s10549_s6 }
 0x1c6   : > { %p9746_p13 = pnand %p9744_p0, %p11618_p3 }
 0x1c7   : > { %p9751_p6 = por %p9750_p7, %p9749_p5 }
 0x1c8   : > { %p9747_p10 = pneg %p9746_p13 }
 0x1c9   : > { %p9753_p4 = por %p9752_p8, %p9751_p6 }
 0x1cb   : > { %p9754_p12 = pnand %p9753_p4, %p9747_p10 }
 0x1cd   : > { %9757 = shalt.err (!%p9754_p12)
}
 0x1ce   : > { %s9758_s18 = scalar_lea.vmem %s659_s16, 128  ;;  %s9987_s29 = smov [#allocation2]  }
 0x1cf   : > { %p9759_p9 = scmp.ne.s32.totalorder %s659_s16, %s9758_s18  ;;  %s9763_s9 = sshll.u32 %s9987_s29, 4  ;;  %s9764_s9 = int_to_ptr.vmem [resolvable:$false] %s9763_s9 }
 0x1d0   : > { %s9765_s2 = scalar_lea.vmem %s9764_s9, 256  ;;  %p9766_p1 = scmp.lt.s32.totalorder %s659_s16, %s9764_s9 }
 0x1d1   : > { %p9761_p2 = pnand %p9759_p9, %p11618_p3  ;;  %p9767_p0 = scmp.lt.s32.totalorder %s9765_s2, %s9758_s18 }
 0x1d3   : > { %p9762_p11 = pneg %p9761_p2  ;;  %p9768_p13 = por %p9767_p0, %p9766_p1 }
 0x1d5   : > { %p9769_p5 = pnand %p9768_p13, %p9762_p11 }
 0x1d7   : > { %9772 = shalt.err (!%p9769_p5)
}
 0x1d8   : > { %p11619_p7 = scmp.ne.s32.totalorder %s11598_s19, 0  ;;  %s11620_s5 = smul.u32 1536, %s9965_s30 }
 0x1d9   : > { %s11621_s8 = sld [smem:[#allocation50_spill]]  ;;  %s11622_s21 = smul.u32 96, %s10289_s23 }
 0x1da   : > { %9026 = dma.hbm_to_vmem [thread:$0]  (!%p11619_p7), %s10549_s6, 128, %s659_s16, %s648_s14  }
 0x1db   : > { %s686_s18 = scalar_lea.vmem [#allocation7], %s11622_s21  ;;  %s7665_s9 = sshll.u32 %s10289_s23, 4 }
 0x1dc   : > { %s693_s29 = sshll.u32 %s686_s18, 4  ;;  %s10580_s29 = int_to_ptr.vmem [resolvable:$true] %s693_s29 }
 0x1df   : > { %s10576_s3 = scalar_lea.hbm %s11621_s8, %s11620_s5  ;;  %s9778_s14 = scalar_lea.hbm %s11621_s8, 3072 }
 0x1e0   : > { %s9773_s2 = scalar_lea.hbm %s10576_s3, 1536  ;;  %p9779_p4 = scmp.lt.u32.totalorder %s10576_s3, %s11621_s8 }
 0x1e1   : > { %p9774_p10 = scmp.ne.s32.totalorder %s10576_s3, %s9773_s2  ;;  %p9780_p12 = scmp.lt.u32.totalorder %s9778_s14, %s9773_s2 }
 0x1e2   : > { %p9782_p2 = scmp.lt.u32.totalorder %s9773_s2, %s10576_s3 }
 0x1e3   : > { %p9776_p6 = pnand %p9774_p10, %p11618_p3  ;;  %p9781_p9 = por %p9780_p12, %p9779_p4 }
 0x1e5   : > { %p9777_p8 = pneg %p9776_p6  ;;  %p9783_p11 = por %p9782_p2, %p9781_p9 }
 0x1e7   : > { %p9784_p1 = pnand %p9783_p11, %p9777_p8 }
 0x1e9   : > { %9787 = shalt.err (!%p9784_p1)
}
 0x1ea   : > { %s9788_s13 = scalar_lea.vmem %s10580_s29, 1536  ;;  %s9988_s21 = smov [#allocation7]  }
 0x1eb   : > { %p9789_p0 = scmp.ne.s32.totalorder %s10580_s29, %s9788_s13  ;;  %s9793_s18 = sshll.u32 %s9988_s21, 4  ;;  %s9794_s18 = int_to_ptr.vmem [resolvable:$false] %s9793_s18 }
 0x1ec   : > { %s9795_s6 = scalar_lea.vmem %s9794_s18, 3072  ;;  %p9796_p10 = scmp.lt.s32.totalorder %s10580_s29, %s9794_s18 }
 0x1ed   : > { %p9791_p13 = pnand %p9789_p0, %p11618_p3  ;;  %p9797_p6 = scmp.lt.s32.totalorder %s9795_s6, %s9788_s13 }
 0x1ef   : > { %p9792_p5 = pneg %p9791_p13  ;;  %p9798_p4 = por %p9797_p6, %p9796_p10 }
 0x1f1   : > { %p9799_p12 = pnand %p9798_p4, %p9792_p5 }
 0x1f3   : > { %9802 = shalt.err (!%p9799_p12)
}
 0x1f4   : > { %s11623_s2 = smov 8   ;;  %s11624_s16 = smov 128  }
 0x1f5   : > { %s11625_s14 = scalar_lea.sflag [#allocation6], %s10296_s22  ;;  %s7960_s5 = sshll.u32 %s9965_s30, 8 }
 0x1f6   : > { %9032 = dma.hbm_to_vmem [thread:$0]  (!%p11619_p7), %s10576_s3, 1536, %s10580_s29, %s11625_s14, %s11624_s16, %s11624_s16, %s11623_s2  }
 0x1f7   : > { %s11626_s21 = sld [smem:[#allocation52_spill]]  ;;  %s728_s6 = scalar_lea.vmem [#allocation10], %s7665_s9 }
 0x1f8   : > { %s735_s7 = sshll.u32 %s728_s6, 4  ;;  %s7670_s8 = sshll.u32 %s10289_s23, 2  ;;  %s10617_s7 = int_to_ptr.vmem [resolvable:$true] %s735_s7 }
 0x1fd   : > { %s10613_s18 = scalar_lea.hbm %s11626_s21, %s7960_s5  ;;  %s9808_s2 = scalar_lea.hbm %s11626_s21, 512 }
 0x1fe   : > { %s9803_s10 = scalar_lea.hbm %s10613_s18, 256  ;;  %p9809_p11 = scmp.lt.u32.totalorder %s10613_s18, %s11626_s21 }
 0x1ff   : > { %p9804_p8 = scmp.ne.s32.totalorder %s10613_s18, %s9803_s10  ;;  %p9810_p1 = scmp.lt.u32.totalorder %s9808_s2, %s9803_s10 }
 0x200   : > { %p9812_p13 = scmp.lt.u32.totalorder %s9803_s10, %s10613_s18 }
 0x201   : > { %p9806_p9 = pnand %p9804_p8, %p11618_p3  ;;  %p9811_p0 = por %p9810_p1, %p9809_p11 }
 0x203   : > { %p9807_p2 = pneg %p9806_p9  ;;  %p9813_p5 = por %p9812_p13, %p9811_p0 }
 0x205   : > { %p9814_p10 = pnand %p9813_p5, %p9807_p2 }
 0x207   : > { %9817 = shalt.err (!%p9814_p10)
}
 0x208   : > { %s9818_s9 = scalar_lea.vmem %s10617_s7, 256  ;;  %s9989_s5 = smov [#allocation10]  }
 0x209   : > { %p9819_p6 = scmp.ne.s32.totalorder %s10617_s7, %s9818_s9  ;;  %s9823_s4 = sshll.u32 %s9989_s5, 4  ;;  %s9824_s4 = int_to_ptr.vmem [resolvable:$false] %s9823_s4 }
 0x20a   : > { %s9825_s13 = scalar_lea.vmem %s9824_s4, 512  ;;  %p9826_p8 = scmp.lt.s32.totalorder %s10617_s7, %s9824_s4 }
 0x20b   : > { %p9821_p4 = pnand %p9819_p6, %p11618_p3  ;;  %p9827_p9 = scmp.lt.s32.totalorder %s9825_s13, %s9818_s9 }
 0x20d   : > { %p9822_p12 = pneg %p9821_p4  ;;  %p9828_p11 = por %p9827_p9, %p9826_p8 }
 0x20f   : > { %p9829_p1 = pnand %p9828_p11, %p9822_p12 }
 0x211   : > { %9832 = shalt.err (!%p9829_p1)
}
 0x212   : > { %s11627_s10 = scalar_lea.sflag [#allocation9], %s10296_s22  ;;  %s7671_s6 = sshll.u32 %s9965_s30, 6 }
 0x213   : > { %9038 = dma.hbm_to_vmem [thread:$0]  (!%p11619_p7), %s10613_s18, 256, %s10617_s7, %s11627_s10, %s11612_s11, %s11612_s11, %s11611_s24  }
 0x214   : > { %s11628_s2 = sld [smem:[#allocation54_spill]]  ;;  %s767_s14 = scalar_lea.vmem [#allocation13], %s7670_s8 }
 0x215   : > { %s774_s9 = sshll.u32 %s767_s14, 4  ;;  %s775_s9 = int_to_ptr.vmem [resolvable:$true] %s774_s9 }
 0x21a   : > { %s10650_s16 = scalar_lea.hbm %s11628_s2, %s7671_s6  ;;  %s9838_s11 = scalar_lea.hbm %s11628_s2, 128 }
 0x21b   : > { %s9833_s5 = scalar_lea.hbm %s10650_s16, 64  ;;  %p9839_p5 = scmp.lt.u32.totalorder %s10650_s16, %s11628_s2 }
 0x21c   : > { %p9834_p2 = scmp.ne.s32.totalorder %s10650_s16, %s9833_s5  ;;  %p9840_p10 = scmp.lt.u32.totalorder %s9838_s11, %s9833_s5 }
 0x21d   : > { %p9842_p4 = scmp.lt.u32.totalorder %s9833_s5, %s10650_s16 }
 0x21e   : > { %p9836_p0 = pnand %p9834_p2, %p11618_p3  ;;  %p9841_p6 = por %p9840_p10, %p9839_p5 }
 0x220   : > { %p9837_p13 = pneg %p9836_p0  ;;  %p9843_p12 = por %p9842_p4, %p9841_p6 }
 0x222   : > { %p9844_p8 = pnand %p9843_p12, %p9837_p13 }
 0x224   : > { %9847 = shalt.err (!%p9844_p8)
}
 0x225   : > { %s9848_s23 = scalar_lea.vmem %s775_s9, 64  ;;  %s9990_s8 = smov [#allocation13]  }
 0x226   : > { %p9849_p9 = scmp.ne.s32.totalorder %s775_s9, %s9848_s23  ;;  %s9853_s13 = sshll.u32 %s9990_s8, 4  ;;  %s9854_s13 = int_to_ptr.vmem [resolvable:$false] %s9853_s13 }
 0x227   : > { %s9855_s10 = scalar_lea.vmem %s9854_s13, 128  ;;  %p9856_p2 = scmp.lt.s32.totalorder %s775_s9, %s9854_s13 }
 0x228   : > { %p9851_p11 = pnand %p9849_p9, %p11618_p3  ;;  %p9857_p0 = scmp.lt.s32.totalorder %s9855_s10, %s9848_s23 }
 0x22a   : > { %p9852_p1 = pneg %p9851_p11  ;;  %p9858_p7 = por %p9857_p0, %p9856_p2 }
 0x22c   : > { %p9859_p5 = pnand %p9858_p7, %p9852_p1 }
 0x22e   : > { %9862 = shalt.err (!%p9859_p5)
}
 0x22f   : > { %p11629_p10 = scmp.ne.s32.totalorder %s11598_s19, 0  ;;  %s11630_s6 = scalar_lea.sflag [#allocation12], %s10296_s22 }
 0x230   : > { %s11631_s3 = sld [smem:[#allocation44_spill]] }
 0x231   : > { %9044 = dma.hbm_to_vmem [thread:$0]  (!%p11629_p10), %s10650_s16, 64, %s775_s9, %s11630_s6  }
 0x236   : > { %p11632_p13 = scmp.ne.s32.totalorder %s11631_s3, 0 }
 0x237   : > { %s10676_s15 = sand.u32 (!%p11632_p13), 1, %s9957_s28   ;;  %p11633_p3 = scmp.ne.s32.totalorder (!%p11632_p13), %s11594_s25, 0 }
 0x238   : > { %783 = sbr.rel (%p11632_p13) target bundleno = 6239 (0x185f), region = 92  ;;  %s7673_s29 = sshll.u32 (!%p11632_p13), %s10676_s15, 3 }
 0x239   : > { %s786_s14 = scalar_lea.sflag (!%p11632_p13), [#allocation3], %s10676_s15  ;;  %s10680_s5 = scalar_lea.vmem (!%p11632_p13), [#allocation2], %s7673_s29 }
 0x23f   : > { %9908 = dma.done.wait (%p11633_p3), %s786_s14, 128  }
 0x240   : > { %9910 = vsyncadd (%p11633_p3), %s786_s14, 4294967168  ;;  %s794_s22 = sand.u32 1, %s10111_s1   ;;  %s797_s16 = scalar_lea.vmem [#allocation5], %s10676_s15 }
 0x241   : > { %s795_s19 = scalar_lea.sflag [#allocation6], %s794_s22 }
 0x242   : > { %9912 = dma.done.wait (%p11633_p3), %s795_s19, 1552  }
 0x243   : > { %9914 = vsyncadd (%p11633_p3), %s795_s19, 4294965744  ;;  %s8928_s9 = smul.u32 96, %s10676_s15  ;;  %s812_s24 = scalar_lea.sflag [#allocation9], %s794_s22 }
 0x245   : > { %s10693_s7 = scalar_lea.vmem [#allocation7], %s8928_s9  ;;  %s10695_s11 = scalar_lea.vmem [#allocation8], %s8928_s9 }
 0x246   : > { %9916 = dma.done.wait (%p11633_p3), %s812_s24, 1792  }
 0x247   : > { %9918 = vsyncadd (%p11633_p3), %s812_s24, 4294965504  ;;  %s7674_s18 = sshll.u32 %s10676_s15, 4  ;;  %s830_s23 = scalar_lea.sflag [#allocation12], %s794_s22 }
 0x248   : > { %s10702_s4 = scalar_lea.vmem [#allocation10], %s7674_s18  ;;  %s10704_s8 = scalar_lea.vmem [#allocation11], %s7673_s29 }
 0x249   : > { %9920 = dma.done.wait (%p11633_p3), %s830_s23, 192  }
 0x24a   : > { %9922 = vsyncadd (%p11633_p3), %s830_s23, 4294967104  ;;  %s7676_s13 = sshll.u32 %s10676_s15, 2  ;;  %p11634_p7 = scmp.eq.s32.totalorder %s10111_s1, 0 }
 0x24b   : > { %s10711_s10 = scalar_lea.vmem [#allocation13], %s7676_s13 }
 0x24c   : > { %9924 = dma.done.wait (%p11634_p7), [#allocation15], 4352   ;;  %p11635_p6 = pmov %p11634_p7 }
 0x24e   : > { %9926 = vsyncadd (%p11635_p6), [#allocation15], 4294962944  ;;  %p11636_p4 = pmov %p11635_p6 }
 0x250   : > { %9928 = dma.done.wait (%p11636_p4), [#allocation18], 4352   ;;  %p11637_p12 = pmov %p11636_p4 }
 0x251   : > { %p11638_p8 = pmov %p11636_p4 }
 0x252   : > { %9930 = vsyncadd (%p11637_p12), [#allocation18], 4294962944 }
 0x253   : > { %9932 = dma.done.wait (%p11638_p8), [#allocation21], 4352   ;;  %p11639_p9 = pmov %p11636_p4 }
 0x254   : > { %p11640_p11 = pmov %p11636_p4 }
 0x255   : > { %9934 = vsyncadd (%p11639_p9), [#allocation21], 4294962944 }
 0x256   : > { %9936 = dma.done.wait (%p11640_p11), [#allocation24], 1088   ;;  %p11641_p1 = pmov %p11636_p4 }
 0x258   : > { %9938 = vsyncadd (%p11641_p1), [#allocation24], 4294966208  ;;  %p11642_p2 = pmov %p11641_p1 }
 0x259   : > { %p11643_p0 = pmov %p11641_p1 }
 0x25a   : > { %9940 = dma.done.wait (%p11642_p2), [#allocation27], 512  }
 0x25b   : > { %9942 = vsyncadd (%p11643_p0), [#allocation27], 4294966784  ;;  %p11644_p5 = pmov %p11643_p0 }
 0x25c   : > { %p11645_p10 = pmov %p11643_p0 }
 0x25d   : > { %9944 = dma.done.wait (%p11644_p5), [#allocation30], 16  }
 0x25e   : > { %9946 = vsyncadd (%p11645_p10), [#allocation30], 4294967280  ;;  %v9991_v0 = vmov 0   ;;  %v9992_v1 = vmov 0.0   ;;  %v988_v2 = vld [vmem:[%s10695_s11 + $0x20] sm:$0xff]  ;;  %vm1032_vm0 = vcmask 7168  }
 0x25f   : > { %9136 = vset.pattern.permute.xlu1 %v9991_v0  ;;  %9125 = vset.pattern.permute.xlu0 %v9991_v0  ;;  %v989_v3 = vld [vmem:[%s10695_s11 + $0x28] sm:$0x3]  ;;  %vm1034_vm1 = vcmask 1024   ;;  %v984_v4 = vld [vmem:[%s10695_s11] sm:$0xff]  ;;  %vm1000_vm2 = vcmp.gt.f32.partialorder %v988_v2, 0.0  ;;  %v990_v6 = vld [vmem:[%s10695_s11 + $0x30] sm:$0xff] }
 0x260   : > { %8217 = vmatprep.subr.bf16.mxu0 %v9992_v1  ;;  %8225 = vmatprep.subr.bf16.mxu1 %v9992_v1  ;;  %vm1001_vm3 = vcmp.gt.f32.partialorder %v989_v3, 0.0  ;;  %v985_v5 = vld [vmem:[%s10695_s11 + $0x8] sm:$0x3]  ;;  %vm996_vm4 = vcmp.gt.f32.partialorder %v984_v4, 0.0  ;;  %v7692_v7 = vsel %vm1000_vm2, 1.0, %v9992_v1  ;;  %v986_v15 = vld [vmem:[%s10695_s11 + $0x10] sm:$0xff] }
 0x261   : > { %v7693_v8 = vsel %vm1001_vm3, 1.0, %v9992_v1  ;;  %vm997_vm5 = vcmp.gt.f32.partialorder %v985_v5, 0.0  ;;  %v7688_v9 = vsel %vm996_vm4, 1.0, %v9992_v1  ;;  %v991_v10 = vld [vmem:[%s10695_s11 + $0x38] sm:$0x3]  ;;  %v1052_v13 = vsel %vm1032_vm0, %v7692_v7, 0.0 }
 0x262   : > { %v1053_v11 = vsel %vm1034_vm1, %v7693_v8, 0.0  ;;  %v9137_v12 = vpack.i.bf16 %v7693_v8, %v7692_v7  ;;  %v7689_v14 = vsel %vm997_vm5, 1.0, %v9992_v1  ;;  %v987_v16 = vld [vmem:[%s10695_s11 + $0x18] sm:$0x3]  ;;  %v1033_v20 = vsel %vm1032_vm0, %v7688_v9, 0.0  ;;  %v994_v22 = vld [vmem:[%s10695_s11 + $0x50] sm:$0xff] }
 0x263   : > { %v1054_v17 = vadd.f32 %v1053_v11, %v1052_v13  ;;  %v1035_v18 = vsel %vm1034_vm1, %v7689_v14, 0.0  ;;  %v9126_v19 = vpack.i.bf16 %v7689_v14, %v7688_v9  ;;  %vm1002_vm6 = vcmp.gt.f32.partialorder %v990_v6, 0.0  ;;  %v995_v23 = vld [vmem:[%s10695_s11 + $0x58] sm:$0x3]  ;;  %v993_v27 = vld [vmem:[%s10695_s11 + $0x48] sm:$0x3] }
 0x264   : > { %9138 = vperm.xlu1 %9136, %v9137_v12   ;;  %v1036_v21 = vadd.f32 %v1035_v18, %v1033_v20  ;;  %vm1003_vm7 = vcmp.gt.f32.partialorder %v991_v10, 0.0  ;;  %vm998_vm8 = vcmp.gt.f32.partialorder %v986_v15, 0.0  ;;  %v7694_v25 = vsel %vm1002_vm6, 1.0, %v9992_v1  ;;  %v992_v32 = vld [vmem:[%s10695_s11 + $0x40] sm:$0xff]  ;;  %s7957_s25 = sshll.u32 %s10111_s1, 4  ;;  %s966_s6 = scalar_lea.vmem [#allocation31], %s10676_s15 }
 0x265   : > { %v1055_v24 = vrot.slane %v1054_v17, 4  ;;  %9127 = vperm.xlu0 %9125, %v9126_v19   ;;  %v7695_v26 = vsel %vm1003_vm7, 1.0, %v9992_v1  ;;  %vm999_vm9 = vcmp.gt.f32.partialorder %v987_v16, 0.0  ;;  %v1061_v31 = vsel %vm1032_vm0, %v7694_v25, 0.0  ;;  %s7349_s3 = sshll.u32 %s966_s6, 4  ;;  %s7337_s19 = scalar_lea.sflag [#allocation4], %s10676_s15  ;;  %s11460_s3 = int_to_ptr.vmem [resolvable:$true] %s7349_s3 }
 0x266   : > { %v1037_v28 = vrot.slane %v1036_v21, 4  ;;  %v1062_v29 = vsel %vm1034_vm1, %v7695_v26, 0.0  ;;  %v9142_v30 = vpack.i.bf16 %v7695_v26, %v7694_v25  ;;  %v7690_v35 = vsel %vm998_vm8, 1.0, %v9992_v1  ;;  %p11647_p3 = scmp.ne.s32.totalorder %s11595_s0, 0  ;;  %s9994_s1 = smov [#allocation31]  }
 0x267   : > { %v1056_v33 = vadd.f32 %v1055_v24, %v1054_v17  ;;  %v1063_v34 = vadd.f32 %v1062_v29, %v1061_v31  ;;  %v7691_v36 = vsel %vm999_vm9, 1.0, %v9992_v1  ;;  %v1043_v40 = vsel %vm1032_vm0, %v7690_v35, 0.0  ;;  %v9157_v29 = vld [vmem:[#allocation14] sm:$0xff]   ;;  %v9159_v31 = vld [vmem:[#allocation14 + $0x8] sm:$0xff]   ;;  %s9867_s9 = sshll.u32 %s9994_s1, 4  ;;  %s9868_s9 = int_to_ptr.vmem [resolvable:$false] %s9867_s9 }
 0x268   : > { %v1038_v37 = vadd.f32 %v1037_v28, %v1036_v21  ;;  %9143 = vperm.xlu1 %9136, %v9142_v30   ;;  %v1044_v38 = vsel %vm1034_vm1, %v7691_v36, 0.0  ;;  %v9131_v39 = vpack.i.bf16 %v7691_v36, %v7690_v35  ;;  %vm1006_vm10 = vcmp.gt.f32.partialorder %v994_v22, 0.0  ;;  %v9158_v30 = vld [vmem:[#allocation14 + $0x10] sm:$0xff]   ;;  %8218 = vmatpush3.bf16.msra.mxu0 %v9157_v29  ;;  %p9870_p4 = scmp.lt.s32.totalorder %s11460_s3, %s9868_s9 }
 0x269   : > { %v1064_v41 = vrot.slane %v1063_v34, 4  ;;  %v1045_v42 = vadd.f32 %v1044_v38, %v1043_v40  ;;  %vm1007_vm11 = vcmp.gt.f32.partialorder %v995_v23, 0.0  ;;  %v7698_v43 = vsel %vm1006_vm10, 1.0, %v9992_v1  ;;  %8226 = vmatpush3.bf16.msra.mxu1 %v9158_v30  ;;  %8219 = vmatprep.subr.bf16.mxu0 %v9992_v1  ;;  %v977_v35 = vld [vmem:[%s10693_s7 + $0x28] sm:$0x3] }
 0x26a   : > { %9132 = vperm.xlu0 %9125, %v9131_v39   ;;  %v7699_v44 = vsel %vm1007_vm11, 1.0, %v9992_v1  ;;  %vm1004_vm12 = vcmp.gt.f32.partialorder %v992_v32, 0.0  ;;  %vm1005_vm13 = vcmp.gt.f32.partialorder %v993_v27, 0.0  ;;  %v1079_v48 = vsel %vm1032_vm0, %v7698_v43, 0.0  ;;  %v9160_v32 = vld [vmem:[#allocation14 + $0x18] sm:$0xff]   ;;  %8227 = vmatprep.subr.bf16.mxu1 %v9992_v1  ;;  %v972_v39 = vld [vmem:[%s10693_s7] sm:$0xff] }
 0x26b   : > { %v1046_v45 = vrot.slane %v1045_v42, 4  ;;  %v1080_v46 = vsel %vm1034_vm1, %v7699_v44, 0.0  ;;  %v9152_v47 = vpack.i.bf16 %v7699_v44, %v7698_v43  ;;  %v7696_v50 = vsel %vm1004_vm12, 1.0, %v9992_v1  ;;  %v973_v40 = vld [vmem:[%s10693_s7 + $0x8] sm:$0x3] }
 0x26c   : > { %v1081_v49 = vadd.f32 %v1080_v46, %v1079_v48  ;;  %v7697_v51 = vsel %vm1005_vm13, 1.0, %v9992_v1  ;;  %v1039_v52 = vrot.slane %v1038_v37, 2  ;;  %v1070_v55 = vsel %vm1032_vm0, %v7696_v50, 0.0  ;;  %8220 = vmatpush3.bf16.msra.mxu0 %v9159_v31  ;;  %v978_v48 = vld [vmem:[%s10693_s7 + $0x30] sm:$0xff] }
 0x26d   : > { %9153 = vperm.xlu1 %9136, %v9152_v47   ;;  %v1071_v53 = vsel %vm1034_vm1, %v7697_v51, 0.0  ;;  %v9147_v54 = vpack.i.bf16 %v7697_v51, %v7696_v50  ;;  %v1047_v56 = vadd.f32 %v1046_v45, %v1045_v42  ;;  %v1065_v60 = vadd.f32 %v1064_v41, %v1063_v34  ;;  %8228 = vmatpush3.bf16.msra.mxu1 %v9160_v32  ;;  %v976_v34 = vld [vmem:[%s10693_s7 + $0x20] sm:$0xff] }
 0x26e   : > { %v1082_v57 = vrot.slane %v1081_v49, 4  ;;  %v1072_v58 = vadd.f32 %v1071_v53, %v1070_v55  ;;  %v1040_v59 = vadd.f32 %v1039_v52, %v1038_v37  ;;  %v1057_v62 = vrot.slane %v1056_v33, 2  ;;  %8233 = vmatprep.subr.bf16.mxu0 %v9992_v1  ;;  %8241 = vmatprep.subr.bf16.mxu1 %v9992_v1 }
 0x26f   : > { %9148 = vperm.xlu0 %9125, %v9147_v54   ;;  %v1048_v61 = vrot.slane %v1047_v56, 2  ;;  %v1066_v2 = vrot.slane %v1065_v60, 2  ;;  %vm9993_vm4 = vmmov 0   ;;  %vm1172_vm5 = vcmask 261120  }
 0x270   : > { %v1073_v63 = vrot.slane %v1072_v58, 4  ;;  %v1041_v0 = vrot.slane %v1040_v59, 1  ;;  %v1083_v3 = vadd.f32 %v1082_v57, %v1081_v49  ;;  %v1058_v5 = vadd.f32 %v1057_v62, %v1056_v33  ;;  %8221 = vmatprep.mubr.msk.bf16.mxu0 %vm9993_vm4, %v9992_v1  ;;  %8229 = vmatprep.mubr.msk.bf16.mxu1 %vm9993_vm4, %v9992_v1  ;;  %v979_v49 = vld [vmem:[%s10693_s7 + $0x38] sm:$0x3]  ;;  %v974_v62 = vld [vmem:[%s10693_s7 + $0x10] sm:$0xff] }
 0x271   : > { %v1049_v4 = vadd.f32 %v1048_v61, %v1047_v56  ;;  %v1067_v7 = vadd.f32 %v1066_v2, %v1065_v60  ;;  %vm1174_vm6 = vcmask 254976   ;;  %v975_v57 = vld [vmem:[%s10693_s7 + $0x18] sm:$0x3]  ;;  %vm1373_vm7 = vcmask 1041409  }
 0x272   : > { %v1042_v6 = vadd.f32 %v1041_v0, %v1040_v59  ;;  %v1084_v8 = vrot.slane %v1083_v3, 2  ;;  %v1074_v9 = vadd.f32 %v1073_v63, %v1072_v58  ;;  %v1059_v11 = vrot.slane %v1058_v5, 1 }
 0x273   : > { %v1050_v10 = vrot.slane %v1049_v4, 1  ;;  %v1068_v12 = vrot.slane %v1067_v7, 1  ;;  %vm1375_vm8 = vcmask 1042434   ;;  %vm1377_vm9 = vcmask 1043459  }
 0x274   : > { %vm1088_vm14 = vcmp.eq.f32.partialorder %v1042_v6, 0.0  ;;  %v1085_v13 = vadd.f32 %v1084_v8, %v1083_v3  ;;  %v1075_v14 = vrot.slane %v1074_v9, 2  ;;  %v1060_v17 = vadd.f32 %v1059_v11, %v1058_v5  ;;  %v982_v11 = vld [vmem:[%s10693_s7 + $0x50] sm:$0xff] }
 0x275   : > { %v1051_v15 = vadd.f32 %v1050_v10, %v1049_v4  ;;  %v1094_v16 = vsel %vm1088_vm14, 10.0, %v1042_v6  ;;  %v1069_v18 = vadd.f32 %v1068_v12, %v1067_v7  ;;  %v983_v7 = vld [vmem:[%s10693_s7 + $0x58] sm:$0x3]  ;;  %vm1379_vm10 = vcmask 1044484  }
 0x276   : > { %1230 = vperm.xlu0 %9125, %v1094_v16   ;;  %v1086_v19 = vrot.slane %v1085_v13, 1  ;;  %v1076_v20 = vadd.f32 %v1075_v14, %v1074_v9  ;;  %vm1090_vm0 = vcmp.eq.f32.partialorder %v1060_v17, 0.0  ;;  %vm1381_vm11 = vcmask 1045509  }
 0x277   : > { %vm1089_vm15 = vcmp.eq.f32.partialorder %v1051_v15, 0.0  ;;  %vm1091_vm1 = vcmp.eq.f32.partialorder %v1069_v18, 0.0  ;;  %v1096_v22 = vsel %vm1090_vm0, 10.0, %v1060_v17  ;;  %vm2110_vm12 = vcmask 64512  }
 0x278   : > { %v1095_v21 = vsel %vm1089_vm15, 10.0, %v1051_v15  ;;  %v1087_v23 = vadd.f32 %v1086_v19, %v1085_v13  ;;  %v1077_v24 = vrot.slane %v1076_v20, 1  ;;  %v1097_v25 = vsel %vm1091_vm1, 10.0, %v1069_v18  ;;  %v981_v19 = vld [vmem:[%s10693_s7 + $0x48] sm:$0x3] }
 0x279   : > { %1235 = vperm.xlu1 %9136, %v1095_v21   ;;  %vm2365_vm13 = vcmask 1043456   ;;  %vm2309_vm14 = vcmask 62464   ;;  %vm2739_vm15 = vcmask 259072   ;;  %vm1274_vm0 = vcmask 256000  }
 0x27a   : > { %1240 = vperm.xlu0 %9125, %v1096_v22   ;;  %vm1093_vm2 = vcmp.eq.f32.partialorder %v1087_v23, 0.0  ;;  %v1078_v26 = vadd.f32 %v1077_v24, %v1076_v20  ;;  %vm7012_vm1 = vcmask 1045504  }
 0x27b   : > { %v1099_v27 = vsel %vm1093_vm2, 10.0, %v1087_v23  ;;  %v980_v23 = vld [vmem:[%s10693_s7 + $0x40] sm:$0xff]  ;;  %vm5147_vm2 = vcmask 60416   ;;  %s9869_s7 = scalar_lea.vmem %s9868_s9, 32 }
 0x27c   : > { %vm1092_vm3 = vcmp.eq.f32.partialorder %v1078_v26, 0.0 }
 0x27d   : > { %1245 = vperm.xlu1 %9136, %v1097_v25   ;;  %v1098_v28 = vsel %vm1092_vm3, 10.0, %v1078_v26  ;;  %vm5577_vm3 = vcmask 257024  }
 0x27e   : > { %1250 = vperm.xlu0 %9125, %v1098_v28  }
 0x281   : > { %1255 = vperm.xlu1 %9136, %v1099_v27  }
 0x2e3   : > { %v9139_v33 = vpop.permute.xlu1 %9138 }
 0x2e4   : > { %v9141_v36 = vunpack.i.h.bf16 %v9139_v33  ;;  %v9140_v37 = vunpack.i.l.bf16 %v9139_v33  ;;  %v9128_v38 = vpop.permute.xlu0 %9127 }
 0x2e5   : > { %v9130_v41 = vunpack.i.h.bf16 %v9128_v38  ;;  %v9129_v42 = vunpack.i.l.bf16 %v9128_v38 }
 0x2e6   : > { %v1164_v43 = vmul.f32 %v9140_v37, %v976_v34  ;;  %v1165_v44 = vmul.f32 %v9141_v36, %v977_v35 }
 0x2e7   : > { %v1160_v45 = vmul.f32 %v9129_v42, %v972_v39  ;;  %v1161_v46 = vmul.f32 %v9130_v41, %v973_v40  ;;  %v9144_v47 = vpop.permute.xlu1 %9143 }
 0x2e8   : > { %v1192_v50 = vsel %vm1172_vm5, %v1164_v43, 0.0  ;;  %v1193_v51 = vsel %vm1174_vm6, %v1165_v44, 0.0  ;;  %v9146_v52 = vunpack.i.h.bf16 %v9144_v47  ;;  %v9145_v53 = vunpack.i.l.bf16 %v9144_v47 }
 0x2e9   : > { %v1173_v54 = vsel %vm1172_vm5, %v1160_v45, 0.0  ;;  %v1175_v55 = vsel %vm1174_vm6, %v1161_v46, 0.0  ;;  %v9133_v56 = vpop.permute.xlu0 %9132  ;;  %v1194_v63 = vadd.f32 %v1193_v51, %v1192_v50 }
 0x2ea   : > { %v1176_v58 = vadd.f32 %v1175_v55, %v1173_v54  ;;  %v1166_v59 = vmul.f32 %v9145_v53, %v978_v48  ;;  %v1167_v60 = vmul.f32 %v9146_v52, %v979_v49  ;;  %v9135_v61 = vunpack.i.h.bf16 %v9133_v56 }
 0x2eb   : > { %v9134_v0 = vunpack.i.l.bf16 %v9133_v56  ;;  %v1195_v15 = vrot.slane %v1194_v63, 4 }
 0x2ec   : > { %v1177_v2 = vrot.slane %v1176_v58, 4  ;;  %v1201_v3 = vsel %vm1172_vm5, %v1166_v59, 0.0  ;;  %v1202_v4 = vsel %vm1174_vm6, %v1167_v60, 0.0  ;;  %v1163_v5 = vmul.f32 %v9135_v61, %v975_v57  ;;  %v9154_v6 = vpop.permute.xlu1 %9153 }
 0x2ed   : > { %v1203_v8 = vadd.f32 %v1202_v4, %v1201_v3  ;;  %v1162_v9 = vmul.f32 %v9134_v0, %v974_v62  ;;  %v9156_v10 = vunpack.i.h.bf16 %v9154_v6  ;;  %v9155_v13 = vunpack.i.l.bf16 %v9154_v6 }
 0x2ee   : > { %v1184_v12 = vsel %vm1174_vm6, %v1163_v5, 0.0  ;;  %v9149_v14 = vpop.permute.xlu0 %9148  ;;  %v1178_v16 = vadd.f32 %v1177_v2, %v1176_v58  ;;  %v1196_v30 = vadd.f32 %v1195_v15, %v1194_v63 }
 0x2ef   : > { %v1183_v17 = vsel %vm1172_vm5, %v1162_v9, 0.0  ;;  %v1171_v18 = vmul.f32 %v9156_v10, %v983_v7  ;;  %v1170_v21 = vmul.f32 %v9155_v13, %v982_v11  ;;  %v9151_v22 = vunpack.i.h.bf16 %v9149_v14 }
 0x2f0   : > { %v1185_v20 = vadd.f32 %v1184_v12, %v1183_v17  ;;  %v1204_v24 = vrot.slane %v1203_v8, 4  ;;  %v9150_v26 = vunpack.i.l.bf16 %v9149_v14  ;;  %v1179_v31 = vrot.slane %v1178_v16, 2 }
 0x2f1   : > { %v1220_v25 = vsel %vm1174_vm6, %v1171_v18, 0.0  ;;  %v1219_v28 = vsel %vm1172_vm5, %v1170_v21, 0.0  ;;  %v1169_v29 = vmul.f32 %v9151_v22, %v981_v19  ;;  %v1197_v42 = vrot.slane %v1196_v30, 2 }
 0x2f2   : > { %v1186_v27 = vrot.slane %v1185_v20, 4  ;;  %v1221_v32 = vadd.f32 %v1220_v25, %v1219_v28  ;;  %v1168_v33 = vmul.f32 %v9150_v26, %v980_v23  ;;  %v1205_v36 = vadd.f32 %v1204_v24, %v1203_v8 }
 0x2f3   : > { %v1211_v35 = vsel %vm1174_vm6, %v1169_v29, 0.0  ;;  %v1180_v43 = vadd.f32 %v1179_v31, %v1178_v16  ;;  %v1198_v51 = vadd.f32 %v1197_v42, %v1196_v30  ;;  %v9164_v42 = vld [vmem:[#allocation14 + $0x38] sm:$0xff]   ;;  %vm7145_vm6 = vcmask 162816  }
 0x2f4   : > { %v1187_v34 = vadd.f32 %v1186_v27, %v1185_v20  ;;  %v1210_v37 = vsel %vm1172_vm5, %v1168_v33, 0.0  ;;  %v1222_v40 = vrot.slane %v1221_v32, 4  ;;  %v1206_v46 = vrot.slane %v1205_v36, 2 }
 0x2f5   : > { %v1231_v38 = vpop.permute.xlu0 %1230  ;;  %v1212_v41 = vadd.f32 %v1211_v35, %v1210_v37  ;;  %v1181_v52 = vrot.slane %v1180_v43, 1  ;;  %v1199_v59 = vrot.slane %v1198_v51, 1 }
 0x2f6   : > { %v1188_v39 = vrot.slane %v1187_v34, 2  ;;  %9257 = vrcp.f32 %v1231_v38  ;;  %v1223_v49 = vadd.f32 %v1222_v40, %v1221_v32  ;;  %v1207_v55 = vadd.f32 %v1206_v46, %v1205_v36  ;;  %v9161_v38 = vld [vmem:[#allocation14 + $0x20] sm:$0xff]   ;;  %v9168_v46 = vld [vmem:[#allocation17 + $0x18] sm:$0xff]  }
 0x2f7   : > { %v1213_v44 = vrot.slane %v1212_v41, 4  ;;  %v1182_v60 = vadd.f32 %v1181_v52, %v1180_v43  ;;  %v1200_v6 = vadd.f32 %v1199_v59, %v1198_v51  ;;  %v9165_v43 = vld [vmem:[#allocation17] sm:$0xff]   ;;  %v9171_v51 = vld [vmem:[#allocation17 + $0x28] sm:$0xff]   ;;  %v9172_v52 = vld [vmem:[#allocation17 + $0x38] sm:$0xff]  }
 0x2f8   : > { %v1236_v45 = vpop.permute.xlu1 %1235  ;;  %v1189_v48 = vadd.f32 %v1188_v39, %v1187_v34  ;;  %v1224_v57 = vrot.slane %v1223_v49, 2  ;;  %v1208_v2 = vrot.slane %v1207_v55, 1  ;;  %v9162_v39 = vld [vmem:[#allocation14 + $0x30] sm:$0xff]   ;;  %v9179_v59 = vld [vmem:[#allocation20 + $0x28] sm:$0xff]  }
 0x2f9   : > { %9259 = vrcp.f32 %v1236_v45  ;;  %v1241_v47 = vpop.permute.xlu0 %1240  ;;  %v1214_v50 = vadd.f32 %v1213_v44, %v1212_v41  ;;  %v9163_v41 = vld [vmem:[#allocation14 + $0x28] sm:$0xff]   ;;  %v9166_v44 = vld [vmem:[#allocation17 + $0x10] sm:$0xff]   ;;  %v9167_v45 = vld [vmem:[#allocation17 + $0x8] sm:$0xff]  }
 0x2fa   : > { %9261 = vrcp.f32 %v1241_v47  ;;  %v1190_v56 = vrot.slane %v1189_v48, 1  ;;  %v1225_v4 = vadd.f32 %v1224_v57, %v1223_v49  ;;  %v1209_v12 = vadd.f32 %v1208_v2, %v1207_v55  ;;  %v968_v47 = vld [vmem:[%s10680_s5] sm:$0xff]  ;;  %v9175_v55 = vld [vmem:[#allocation20 + $0x8] sm:$0xff]   ;;  %s11646_s5 = sld [smem:[#allocation65_spill]] }
 0x2fb   : > { %v1215_v53 = vrot.slane %v1214_v50, 2  ;;  %v9169_v49 = vld [vmem:[#allocation17 + $0x20] sm:$0xff]   ;;  %v9177_v57 = vld [vmem:[#allocation20 + $0x20] sm:$0xff]  }
 0x2fc   : > { %v1246_v54 = vpop.permute.xlu1 %1245  ;;  %v1191_v3 = vadd.f32 %v1190_v56, %v1189_v48  ;;  %v1226_v13 = vrot.slane %v1225_v4, 1  ;;  %v10830_v48 = vpack.c.bf16 %v968_v47, %v968_v47  ;;  %v9176_v56 = vld [vmem:[#allocation20 + $0x18] sm:$0xff]  }
 0x2fd   : > { %9263 = vrcp.f32 %v1246_v54  ;;  %v1251_v58 = vpop.permute.xlu0 %1250  ;;  %v1216_v62 = vadd.f32 %v1215_v53, %v1214_v50  ;;  %v9170_v50 = vld [vmem:[#allocation17 + $0x30] sm:$0xff]   ;;  %v9174_v54 = vld [vmem:[#allocation20 + $0x10] sm:$0xff]  }
 0x2fe   : > { %9265 = vrcp.f32 %v1251_v58  ;;  %v1227_v23 = vadd.f32 %v1226_v13, %v1225_v4  ;;  %v9173_v53 = vld [vmem:[#allocation20] sm:$0xff]   ;;  %v9178_v58 = vld [vmem:[#allocation20 + $0x30] sm:$0xff]  }
 0x2ff   : > { %v1217_v9 = vrot.slane %v1216_v62, 1 }
 0x300   : > { %v9258_v61 = vpop.eup %9257  ;;  %v1256_v63 = vpop.permute.xlu1 %1255  ;;  %s11458_s22 = scalar_lea.hbm %s11646_s5, %s7957_s25 }
 0x301   : > { %v1259_v0 = vmul.f32 %v9258_v61, %v1182_v60  ;;  %9267 = vrcp.f32 %v1256_v63  ;;  %v1218_v18 = vadd.f32 %v1217_v9, %v1216_v62  ;;  %v9180_v60 = vld [vmem:[#allocation20 + $0x38] sm:$0xff]  }
 0x303   : > { %v9260_v5 = vpop.eup %9259  ;;  %v1311_v7 = vpack.c.bf16 %v1259_v0, %v1259_v0 }
 0x304   : > { %v9262_v8 = vpop.eup %9261  ;;  %v1261_v10 = vmul.f32 %v9260_v5, %v1191_v3 }
 0x305   : > { %v1263_v11 = vmul.f32 %v9262_v8, %v1200_v6  ;;  %v1367_v16 = vunpack.c.l.b16 %v1311_v7 }
 0x306   : > { %v1312_v14 = vpack.c.bf16 %v1261_v10, %v1261_v10 }
 0x307   : > { %v9264_v15 = vpop.eup %9263  ;;  %v1313_v17 = vpack.c.bf16 %v1263_v11, %v1263_v11 }
 0x308   : > { %v1368_v19 = vunpack.c.l.b16 %v1312_v14  ;;  %v1265_v20 = vmul.f32 %v9264_v15, %v1209_v12  ;;  %v9266_v21 = vpop.eup %9265  ;;  %v7716_v14 = vld [vmem:[#allocation19] ss:$0 sm:$0xff]  ;;  %v7717_v15 = vld [vmem:[#allocation19 + $0x1] ss:$0 sm:$0xff] }
 0x309   : > { %v1369_v22 = vunpack.c.l.b16 %v1313_v17  ;;  %v1267_v25 = vmul.f32 %v9266_v21, %v1218_v18 }
 0x30a   : > { %v1314_v24 = vpack.c.bf16 %v1265_v20, %v1265_v20  ;;  %v1374_v27 = vsel %vm1373_vm7, %v1368_v19, %v1367_v16 }
 0x30b   : > { %v9268_v26 = vpop.eup %9267  ;;  %v1315_v30 = vpack.c.bf16 %v1267_v25, %v1267_v25  ;;  %v1376_v31 = vsel %vm1375_vm8, %v1369_v22, %v1374_v27 }
 0x30c   : > { %v1370_v28 = vunpack.c.l.b16 %v1314_v24  ;;  %v1269_v29 = vmul.f32 %v9268_v26, %v1227_v23 }
 0x30d   : > { %v1371_v33 = vunpack.c.l.b16 %v1315_v30 }
 0x30e   : > { %v1316_v32 = vpack.c.bf16 %v1269_v29, %v1269_v29  ;;  %v1378_v34 = vsel %vm1377_vm9, %v1370_v28, %v1376_v31  ;;  %v7700_v28 = vld [vmem:[#allocation16] ss:$0 sm:$0xff]  ;;  %v7701_v29 = vld [vmem:[#allocation16 + $0x1] ss:$0 sm:$0xff] }
 0x30f   : > { %v1380_v36 = vsel %vm1379_vm10, %v1371_v33, %v1378_v34  ;;  %v7719_v33 = vld [vmem:[#allocation19 + $0x3] ss:$0 sm:$0xff] }
 0x310   : > { %v1372_v35 = vunpack.c.l.b16 %v1316_v32  ;;  %v7718_v32 = vld [vmem:[#allocation19 + $0x2] ss:$0 sm:$0xff] }
 0x312   : > { %v1382_v37 = vsel %vm1381_vm11, %v1372_v35, %v1380_v36 }
 0x313   : > { %v1383_v40 = vpack.c.b16 %v1382_v37, %v1382_v37 }
 0x315   : > { %8222 = vmatmul.mubr.msk.bf16.vlgmr.msra.gmra.mrb[0].mxu0 %vm1172_vm5, %v1383_v40  ;;  %8230 = vmatmul.mubr.msk.bf16.vlgmr.msra.gmra.mrb[0].mxu1 %vm1172_vm5, %v1383_v40 }
 0x316   : > { %8234 = vmatpush3.bf16.msra.mxu0 %v9161_v38  ;;  %8242 = vmatpush3.bf16.msra.mxu1 %v9162_v39 }
 0x317   : > { %8235 = vmatprep.subr.bf16.mxu0 %v9992_v1  ;;  %8243 = vmatprep.subr.bf16.mxu1 %v9992_v1 }
 0x318   : > { %8237 = vmatprep.mubr.msk.bf16.mxu0 %vm9993_vm4, %v9992_v1  ;;  %8245 = vmatprep.mubr.msk.bf16.mxu1 %vm9993_vm4, %v9992_v1 }
 0x31a   : > { %8236 = vmatpush3.bf16.msra.mxu0 %v9163_v41  ;;  %8244 = vmatpush3.bf16.msra.mxu1 %v9164_v42 }
 0x31b   : > { %8249 = vmatprep.subr.bf16.mxu0 %v9992_v1  ;;  %8257 = vmatprep.subr.bf16.mxu1 %v9992_v1 }
 0x31d   : > { %8238 = vmatmul.mubr.msk.bf16.vlgmr.msra.gmra.mrb[4].mxu0 %vm1172_vm5, %v1383_v40  ;;  %8246 = vmatmul.mubr.msk.bf16.vlgmr.msra.gmra.mrb[4].mxu1 %vm1172_vm5, %v1383_v40 }
 0x31e   : > { %8250 = vmatpush3.bf16.msra.mxu0 %v9165_v43  ;;  %8258 = vmatpush3.bf16.msra.mxu1 %v9166_v44 }
 0x31f   : > { %8251 = vmatprep.subr.bf16.mxu0 %v9992_v1  ;;  %8259 = vmatprep.subr.bf16.mxu1 %v9992_v1 }
 0x320   : > { %8253 = vmatprep.mubr.msk.bf16.mxu0 %vm9993_vm4, %v9992_v1  ;;  %8261 = vmatprep.mubr.msk.bf16.mxu1 %vm9993_vm4, %v9992_v1 }
 0x322   : > { %8252 = vmatpush3.bf16.msra.mxu0 %v9167_v45  ;;  %8260 = vmatpush3.bf16.msra.mxu1 %v9168_v46 }
 0x323   : > { %8265 = vmatprep.subr.bf16.mxu0 %v9992_v1  ;;  %8273 = vmatprep.subr.bf16.mxu1 %v9992_v1 }
 0x325   : > { %8254 = vmatmul.mubr.msk.bf16.vlgmr.msra.gmra.mrb[8].mxu0 %vm1172_vm5, %v10830_v48  ;;  %8262 = vmatmul.mubr.msk.bf16.vlgmr.msra.gmra.mrb[8].mxu1 %vm1172_vm5, %v10830_v48 }
 0x326   : > { %8266 = vmatpush3.bf16.msra.mxu0 %v9169_v49  ;;  %8274 = vmatpush3.bf16.msra.mxu1 %v9170_v50 }
 0x327   : > { %8267 = vmatprep.subr.bf16.mxu0 %v9992_v1  ;;  %8275 = vmatprep.subr.bf16.mxu1 %v9992_v1 }
 0x328   : > { %8269 = vmatprep.mubr.msk.bf16.mxu0 %vm9993_vm4, %v9992_v1  ;;  %8277 = vmatprep.mubr.msk.bf16.mxu1 %vm9993_vm4, %v9992_v1 }
 0x32a   : > { %8268 = vmatpush3.bf16.msra.mxu0 %v9171_v51  ;;  %8276 = vmatpush3.bf16.msra.mxu1 %v9172_v52  ;;  %v7702_v51 = vld [vmem:[#allocation16 + $0x2] ss:$0 sm:$0xff]  ;;  %v7703_v52 = vld [vmem:[#allocation16 + $0x3] ss:$0 sm:$0xff] }
 0x32b   : > { %8281 = vmatprep.subr.bf16.mxu0 %v9992_v1  ;;  %8289 = vmatprep.subr.bf16.mxu1 %v9992_v1 }
 0x32d   : > { %8270 = vmatmul.mubr.msk.bf16.vlgmr.msra.gmra.mrb[12].mxu0 %vm1172_vm5, %v10830_v48  ;;  %8278 = vmatmul.mubr.msk.bf16.vlgmr.msra.gmra.mrb[12].mxu1 %vm1172_vm5, %v10830_v48 }
 0x32e   : > { %8282 = vmatpush3.bf16.msra.mxu0 %v9173_v53  ;;  %8285 = vmatprep.mubr.msk.bf16.mxu0 %vm9993_vm4, %v9992_v1 }
 0x32f   : > { %8283 = vmatprep.subr.bf16.mxu0 %v9992_v1  ;;  %8293 = vmatprep.mubr.msk.bf16.mxu1 %vm9993_vm4, %v9992_v1 }
 0x330   : > { %8290 = vmatpush3.bf16.msra.mxu1 %v9174_v54 }
 0x331   : > { %8291 = vmatprep.subr.bf16.mxu1 %v9992_v1 }
 0x332   : > { %8284 = vmatpush3.bf16.msra.mxu0 %v9175_v55 }
 0x333   : > { %8297 = vmatprep.subr.bf16.mxu0 %v9992_v1 }
 0x334   : > { %8292 = vmatpush3.bf16.msra.mxu1 %v9176_v56 }
 0x335   : > { %8286 = vmatmul.mubr.msk.bf16.vlgmr.msra.gmra.mrb[16].mxu0 %vm1172_vm5, %v10830_v48  ;;  %8305 = vmatprep.subr.bf16.mxu1 %v9992_v1 }
 0x336   : > { %8301 = vmatprep.mubr.msk.bf16.mxu0 %vm9993_vm4, %v9992_v1  ;;  %8298 = vmatpush3.bf16.msra.mxu0 %v9177_v57 }
 0x337   : > { %8294 = vmatmul.mubr.msk.bf16.vlgmr.msra.gmra.mrb[16].mxu1 %vm1172_vm5, %v10830_v48  ;;  %8299 = vmatprep.subr.bf16.mxu0 %v9992_v1 }
 0x338   : > { %8306 = vmatpush3.bf16.msra.mxu1 %v9178_v58  ;;  %8309 = vmatprep.mubr.msk.bf16.mxu1 %vm9993_vm4, %v9992_v1 }
 0x339   : > { %8307 = vmatprep.subr.bf16.mxu1 %v9992_v1 }
 0x33a   : > { %8300 = vmatpush3.bf16.msra.mxu0 %v9179_v59  ;;  %v7732_v59 = vld [vmem:[#allocation22] ss:$0 sm:$0xff] }
 0x33b   : > { %8313 = vmatprep.subr.bf16.mxu0 %v9992_v1 }
 0x33c   : > { %8308 = vmatpush3.bf16.msra.mxu1 %v9180_v60 }
 0x33d   : > { %8319 = vmatprep.subr.bf16.mxu1 %v9992_v1  ;;  %8302 = vmatmul.mubr.msk.bf16.vlgmr.msra.gmra.mrb[20].mxu0 %vm1172_vm5, %v10830_v48 }
 0x33e   : > { %8315 = vmatprep.mubr.msk.bf16.mxu0 %vm9993_vm4, %v9992_v1 }
 0x33f   : > { %8310 = vmatmul.mubr.msk.bf16.vlgmr.msra.gmra.mrb[20].mxu1 %vm1172_vm5, %v10830_v48 }
 0x340   : > { %8321 = vmatprep.mubr.msk.bf16.mxu1 %vm9993_vm4, %v9992_v1 }
 0x3e8   : > { %v1433_v61 = vpop.f32.mrb[0].mxu0  ;;  %v1485_v62 = vpop.f32.mrb[0].mxu1 }
 0x3e9   : > { %v8223_v63 = vpop.f32.mrb[1].mxu0  ;;  %v8231_v0 = vpop.f32.mrb[1].mxu1  ;;  %v1434_v34 = vadd.f32 %v7700_v28, %v1433_v61  ;;  %v1486_v35 = vadd.f32 %v7701_v29, %v1485_v62  ;;  %v7733_v61 = vld [vmem:[#allocation22 + $0x1] ss:$0 sm:$0xff] }
 0x3ea   : > { %v1436_v2 = vpop.f32.mrb[2].mxu0  ;;  %v1488_v3 = vpop.f32.mrb[2].mxu1 }
 0x3eb   : > { %v8224_v4 = vpop.f32.mrb[3].mxu0  ;;  %v8232_v5 = vpop.f32.mrb[3].mxu1  ;;  %v2102_v44 = vpack.c.bf16 %v1434_v34, %v1434_v34  ;;  %v2103_v45 = vpack.c.bf16 %v1486_v35, %v1486_v35 }
 0x3f0   : > { %v1537_v6 = vpop.f32.mrb[4].mxu0  ;;  %v1589_v7 = vpop.f32.mrb[4].mxu1 }
 0x3f1   : > { %v8239_v8 = vpop.f32.mrb[5].mxu0  ;;  %v8247_v9 = vpop.f32.mrb[5].mxu1  ;;  %v1538_v55 = vadd.f32 %v7702_v51, %v1537_v6  ;;  %v1590_v56 = vadd.f32 %v7703_v52, %v1589_v7 }
 0x3f2   : > { %v1540_v10 = vpop.f32.mrb[6].mxu0  ;;  %v1592_v11 = vpop.f32.mrb[6].mxu1 }
 0x3f3   : > { %v8240_v12 = vpop.f32.mrb[7].mxu0  ;;  %v8248_v13 = vpop.f32.mrb[7].mxu1  ;;  %v2104_v57 = vpack.c.bf16 %v1538_v55, %v1538_v55  ;;  %v2105_v58 = vpack.c.bf16 %v1590_v56, %v1590_v56 }
 0x3f8   : > { %v1688_v16 = vpop.f32.mrb[8].mxu0  ;;  %v1740_v17 = vpop.f32.mrb[8].mxu1 }
 0x3f9   : > { %v1689_v18 = vadd.f32 %v7716_v14, %v1688_v16  ;;  %v1741_v19 = vadd.f32 %v7717_v15, %v1740_v17  ;;  %v8255_v20 = vpop.f32.mrb[9].mxu0  ;;  %v8263_v21 = vpop.f32.mrb[9].mxu1 }
 0x3fa   : > { %v1691_v22 = vpop.f32.mrb[10].mxu0  ;;  %v1743_v23 = vpop.f32.mrb[10].mxu1  ;;  %v2300_v20 = vlaneseq  ;;  %v969_v21 = vld [vmem:[%s797_s16] sm:$0x1]  ;;  %s9863_s16 = scalar_lea.vmem %s11460_s3, 16 }
 0x3fb   : > { %v2106_v24 = vpack.c.bf16 %v1689_v18, %v1689_v18  ;;  %v2107_v25 = vpack.c.bf16 %v1741_v19, %v1741_v19  ;;  %v8256_v26 = vpop.f32.mrb[11].mxu0  ;;  %v8264_v27 = vpop.f32.mrb[11].mxu1  ;;  %v970_v22 = vsub.f32 1.0, %v969_v21  ;;  %p9864_p13 = scmp.ne.s32.totalorder %s11460_s3, %s9863_s16  ;;  %p9871_p12 = scmp.lt.s32.totalorder %s9869_s7, %s9863_s16 }
 0x3fc   : > { %v2301_v23 = vshrl.u32 %v2300_v20, 7 }
 0x3fd   : > { %v2115_v30 = vsel %vm2110_vm12, %v2106_v24, 0  ;;  %v2161_v31 = vsel %vm2110_vm12, %v2107_v25, 0  ;;  %v971_v24 = vmul.f32 -1e+09, %v970_v22  ;;  %p9865_p7 = pnand %p9864_p13, %p11647_p3  ;;  %p9872_p8 = por %p9871_p12, %p9870_p4 }
 0x3fe   : > { %8314 = vmatpush3.bf16.xpose.msra.mxu0 %v2115_v30  ;;  %8320 = vmatpush3.bf16.xpose.msra.mxu1 %v2161_v31  ;;  %v2302_v25 = vsub.s32 0, %v2301_v23 }
 0x3ff   : > { %8325 = vmatprep.subr.bf16.mxu0 %v9992_v1  ;;  %8331 = vmatprep.subr.bf16.mxu1 %v9992_v1  ;;  %p9866_p6 = pneg %p9865_p7 }
 0x400   : > { %v1792_v36 = vpop.f32.mrb[12].mxu0  ;;  %v1844_v37 = vpop.f32.mrb[12].mxu1  ;;  %v10908_v26 = vrot.slane %v971_v24, %v2302_v25 }
 0x401   : > { %v1793_v38 = vadd.f32 %v7718_v32, %v1792_v36  ;;  %v1845_v39 = vadd.f32 %v7719_v33, %v1844_v37  ;;  %v8271_v40 = vpop.f32.mrb[13].mxu0  ;;  %v8279_v41 = vpop.f32.mrb[13].mxu1  ;;  %p9873_p9 = pnand %p9872_p8, %p9866_p6 }
 0x402   : > { %v1795_v42 = vpop.f32.mrb[14].mxu0  ;;  %v1847_v43 = vpop.f32.mrb[14].mxu1 }
 0x403   : > { %v2108_v46 = vpack.c.bf16 %v1793_v38, %v1793_v38  ;;  %v2109_v47 = vpack.c.bf16 %v1845_v39, %v1845_v39  ;;  %v8272_v49 = vpop.f32.mrb[15].mxu0  ;;  %v8280_v50 = vpop.f32.mrb[15].mxu1 }
 0x405   : > { %v2207_v53 = vsel %vm2110_vm12, %v2108_v46, 0  ;;  %v2253_v54 = vsel %vm2110_vm12, %v2109_v47, 0  ;;  %8316 = vmatmul.mubr.msk.bf16.vlgmr.msra.gmra.mrb[24].mxu0 %vm2110_vm12, %v2102_v44  ;;  %8322 = vmatmul.mubr.msk.bf16.vlgmr.msra.gmra.mrb[24].mxu1 %vm2110_vm12, %v2103_v45 }
 0x406   : > { %8326 = vmatpush3.bf16.xpose.msra.mxu0 %v2207_v53  ;;  %8332 = vmatpush3.bf16.xpose.msra.mxu1 %v2253_v54 }
 0x407   : > { %8327 = vmatprep.mubr.msk.bf16.mxu0 %vm9993_vm4, %v9992_v1  ;;  %8333 = vmatprep.mubr.msk.bf16.mxu1 %vm9993_vm4, %v9992_v1 }
 0x408   : > { %8337 = vmatprep.subr.bf16.mxu0 %v9992_v1  ;;  %8343 = vmatprep.subr.bf16.mxu1 %v9992_v1  ;;  %v1940_v60 = vpop.f32.mrb[16].mxu0 }
 0x409   : > { %v1941_v62 = vadd.f32 %v7732_v59, %v1940_v60  ;;  %v8287_v63 = vpop.f32.mrb[17].mxu0 }
 0x40a   : > { %v1943_v0 = vpop.f32.mrb[18].mxu0  ;;  %v1992_v2 = vpop.f32.mrb[16].mxu1 }
 0x40b   : > { %v2358_v3 = vpack.c.bf16 %v1941_v62, %v1941_v62  ;;  %v8288_v4 = vpop.f32.mrb[19].mxu0  ;;  %v1993_v5 = vadd.f32 %v7733_v61, %v1992_v2  ;;  %v8295_v6 = vpop.f32.mrb[17].mxu1 }
 0x40c   : > { %v1995_v7 = vpop.f32.mrb[18].mxu1 }
 0x40d   : > { %8328 = vmatmul.mubr.msk.bf16.vlgmr.msra.gmra.mrb[28].mxu0 %vm2110_vm12, %v2104_v57  ;;  %8334 = vmatmul.mubr.msk.bf16.vlgmr.msra.gmra.mrb[28].mxu1 %vm2110_vm12, %v2105_v58  ;;  %v2367_v8 = vsel %vm2365_vm13, %v2358_v3, 0  ;;  %v2359_v9 = vpack.c.bf16 %v1993_v5, %v1993_v5  ;;  %v8296_v10 = vpop.f32.mrb[19].mxu1 }
 0x40e   : > { %8339 = vmatprep.mubr.msk.bf16.mxu0 %vm9993_vm4, %v9992_v1  ;;  %8345 = vmatprep.mubr.msk.bf16.mxu1 %vm9993_vm4, %v9992_v1 }
 0x40f   : > { %8338 = vmatpush3.bf16.msra.mxu0 %v2367_v8  ;;  %v2413_v11 = vsel %vm2365_vm13, %v2359_v9, 0 }
 0x410   : > { %8349 = vmatprep.subr.bf16.mxu0 %v9992_v1  ;;  %8344 = vmatpush3.bf16.msra.mxu1 %v2413_v11  ;;  %v10902_v12 = vpop.f32.mrb[20].mxu0 }
 0x411   : > { %8355 = vmatprep.subr.bf16.mxu1 %v9992_v1  ;;  %v8303_v14 = vpop.f32.mrb[21].mxu0 }
 0x412   : > { %v10904_v13 = vpop.f32.mrb[20].mxu1  ;;  %v2047_v16 = vpop.f32.mrb[22].mxu0 }
 0x413   : > { %v8311_v15 = vpop.f32.mrb[21].mxu1  ;;  %v8304_v18 = vpop.f32.mrb[23].mxu0 }
 0x414   : > { %v2099_v17 = vpop.f32.mrb[22].mxu1  ;;  %v7734_v18 = vld [vmem:[#allocation22 + $0x2] ss:$0 sm:$0xff] }
 0x415   : > { %v8312_v19 = vpop.f32.mrb[23].mxu1  ;;  %v7735_v17 = vld [vmem:[#allocation22 + $0x3] ss:$0 sm:$0xff]  ;;  %v2045_v21 = vadd.f32 %v7734_v18, %v10902_v12  ;;  %v9190_v18 = vld [vmem:[#allocation17 + $0x48] sm:$0xff]  }
 0x416   : > { %v2097_v19 = vadd.f32 %v7735_v17, %v10904_v13  ;;  %v9191_v17 = vld [vmem:[#allocation17 + $0x50] sm:$0xff]  }
 0x418   : > { %v2361_v24 = vpack.c.bf16 %v2097_v19, %v2097_v19  ;;  %v9192_v19 = vld [vmem:[#allocation17 + $0x58] sm:$0xff]  }
 0x4d8   : > { %v2151_v27 = vpop.f32.mrb[24].mxu0  ;;  %v2197_v28 = vpop.f32.mrb[24].mxu1 }
 0x4d9   : > { %v2295_v29 = vmul.f32 0.35355338, %v2151_v27  ;;  %v2296_v30 = vmul.f32 0.35355338, %v2197_v28  ;;  %v8317_v31 = vpop.f32.mrb[25].mxu0  ;;  %v8323_v32 = vpop.f32.mrb[25].mxu1  ;;  %v2360_v28 = vpack.c.bf16 %v2045_v21, %v2045_v21 }
 0x4da   : > { %v2154_v33 = vpop.f32.mrb[26].mxu0  ;;  %v2200_v34 = vpop.f32.mrb[26].mxu1  ;;  %v2505_v32 = vsel %vm2365_vm13, %v2361_v24, 0  ;;  %v9195_v21 = vld [vmem:[#allocation17 + $0x70] sm:$0xff]  }
 0x4db   : > { %v8318_v35 = vpop.f32.mrb[27].mxu0  ;;  %v8324_v36 = vpop.f32.mrb[27].mxu1  ;;  %v2306_v37 = vadd.f32 %v10908_v26, %v2296_v30  ;;  %v2305_v38 = vadd.f32 %v10908_v26, %v2295_v29  ;;  %v2459_v13 = vsel %vm2365_vm13, %v2360_v28, 0  ;;  %v2551_v34 = vld [vmem:[#allocation23] sm:$0xf]  ;;  %v9197_v24 = vld [vmem:[#allocation20 + $0x40] sm:$0xff]  }
 0x4dc   : > { %v9200_v28 = vld [vmem:[#allocation20 + $0x58] sm:$0xff]  }
 0x4dd   : > { %v2313_v39 = vsel %vm2309_vm14, %v2306_v37, -inf  ;;  %v2310_v40 = vsel %vm2309_vm14, %v2305_v38, -inf }
 0x4de   : > { %2314 = vmax.xlane.f32.xlu1 %v2313_v39  ;;  %2311 = vmax.xlane.f32.xlu0 %v2310_v40  ;;  %v2552_v40 = vld [vmem:[#allocation23 + $0x4] sm:$0xf] }
 0x4e0   : > { %v2243_v41 = vpop.f32.mrb[28].mxu0  ;;  %v2289_v42 = vpop.f32.mrb[28].mxu1 }
 0x4e1   : > { %v2297_v43 = vmul.f32 0.35355338, %v2243_v41  ;;  %v2298_v44 = vmul.f32 0.35355338, %v2289_v42  ;;  %v8329_v45 = vpop.f32.mrb[29].mxu0  ;;  %v8335_v46 = vpop.f32.mrb[29].mxu1 }
 0x4e2   : > { %v2246_v47 = vpop.f32.mrb[30].mxu0  ;;  %v2292_v49 = vpop.f32.mrb[30].mxu1  ;;  %v2605_v41 = vsel %vm2365_vm13, %v2552_v40, 0  ;;  %v2554_v42 = vld [vmem:[#allocation23 + $0xc] sm:$0xf] }
 0x4e3   : > { %v8330_v50 = vpop.f32.mrb[31].mxu0  ;;  %v8336_v51 = vpop.f32.mrb[31].mxu1  ;;  %v2307_v52 = vadd.f32 %v10908_v26, %v2297_v43  ;;  %v2308_v54 = vadd.f32 %v10908_v26, %v2298_v44  ;;  %v2553_v43 = vld [vmem:[#allocation23 + $0x8] sm:$0xf]  ;;  %v2697_v49 = vsel %vm2365_vm13, %v2554_v42, 0 }
 0x4e5   : > { %v2316_v53 = vsel %vm2309_vm14, %v2307_v52, -inf  ;;  %v2319_v55 = vsel %vm2309_vm14, %v2308_v54, -inf }
 0x4e6   : > { %2317 = vmax.xlane.f32.xlu0 %v2316_v53  ;;  %v2651_v53 = vsel %vm2365_vm13, %v2553_v43, 0 }
 0x4ea   : > { %2320 = vmax.xlane.f32.xlu0 %v2319_v55 }
 0x56b   : > { %v2315_v56 = vpop.xlane.xlu1 %2314  ;;  %v2312_v57 = vpop.xlane.xlu0 %2311 }
 0x56c   : > { %v2323_v58 = vsub.f32 %v2306_v37, %v2315_v56  ;;  %v2322_v59 = vsub.f32 %v2305_v38, %v2312_v57  ;;  %v2559_v37 = vsel %vm2365_vm13, %v2551_v34, 0 }
 0x56e   : > { %v2328_v60 = vmul.f32 1.442695, %v2323_v58  ;;  %v2326_v61 = vmul.f32 1.442695, %v2322_v59  ;;  %v9181_v58 = vld [vmem:[#allocation14 + $0x40] sm:$0xff]  }
 0x570   : > { %9269 = vpow2.f32 %v2328_v60 }
 0x571   : > { %9271 = vpow2.f32 %v2326_v61 }
 0x573   : > { %v2318_v62 = vpop.xlane.xlu0 %2317 }
 0x574   : > { %v2324_v63 = vsub.f32 %v2307_v52, %v2318_v62 }
 0x576   : > { %v2330_v0 = vmul.f32 1.442695, %v2324_v63 }
 0x577   : > { %v2321_v2 = vpop.xlane.xlu0 %2320 }
 0x578   : > { %9273 = vpow2.f32 %v2330_v0  ;;  %v2325_v3 = vsub.f32 %v2308_v54, %v2321_v2  ;;  %v9183_v0 = vld [vmem:[#allocation14 + $0x50] sm:$0xff]  }
 0x57a   : > { %v9270_v4 = vpop.eup %9269  ;;  %v2332_v5 = vmul.f32 1.442695, %v2325_v3 }
 0x57b   : > { %v9272_v6 = vpop.eup %9271  ;;  %v2337_v7 = vsel %vm2309_vm14, %v9270_v4, 0.0 }
 0x57c   : > { %9275 = vpow2.f32 %v2332_v5  ;;  %v2334_v8 = vsel %vm2309_vm14, %v9272_v6, 0.0  ;;  %2338 = vadd.xlane.f32.xlu0 %v2337_v7  ;;  %v1308_v5 = vld [vmem:[%s10704_s8] sm:$0x3f] }
 0x57d   : > { %2335 = vadd.xlane.f32.xlu1 %v2334_v8  ;;  %v2755_v8 = vpack.c.bf16 %v1308_v5, %v1308_v5 }
 0x582   : > { %v9274_v9 = vpop.eup %9273 }
 0x583   : > { %v2340_v10 = vsel %vm2309_vm14, %v9274_v9, 0.0 }
 0x584   : > { %2341 = vadd.xlane.f32.xlu1 %v2340_v10  ;;  %v9185_v10 = vld [vmem:[#allocation14 + $0x60] sm:$0xff]  }
 0x586   : > { %v9276_v11 = vpop.eup %9275 }
 0x587   : > { %v2343_v14 = vsel %vm2309_vm14, %v9276_v11, 0.0 }
 0x588   : > { %2344 = vadd.xlane.f32.xlu0 %v2343_v14  ;;  %v9186_v14 = vld [vmem:[#allocation14 + $0x68] sm:$0xff]  }
 0x609   : > { %v2339_v15 = vpop.xlane.xlu0 %2338 }
 0x60a   : > { %v2336_v16 = vpop.xlane.xlu1 %2335  ;;  %9277 = vrcp.f32 %v2339_v15  ;;  %v9188_v15 = vld [vmem:[#allocation14 + $0x78] sm:$0xff]  }
 0x60b   : > { %9279 = vrcp.f32 %v2336_v16  ;;  %v9189_v16 = vld [vmem:[#allocation17 + $0x40] sm:$0xff]  }
 0x611   : > { %v2342_v20 = vpop.xlane.xlu1 %2341 }
 0x612   : > { %9281 = vrcp.f32 %v2342_v20  ;;  %v9193_v20 = vld [vmem:[#allocation17 + $0x60] sm:$0xff]  }
 0x614   : > { %v9278_v22 = vpop.eup %9277 }
 0x615   : > { %v9280_v23 = vpop.eup %9279  ;;  %v2351_v25 = vmul.f32 %v9278_v22, %v9270_v4  ;;  %v2345_v27 = vpop.xlane.xlu0 %2344  ;;  %v9182_v4 = vld [vmem:[#allocation14 + $0x48] sm:$0xff]   ;;  %v9194_v22 = vld [vmem:[#allocation17 + $0x68] sm:$0xff]  }
 0x616   : > { %v2350_v29 = vmul.f32 %v9280_v23, %v9272_v6  ;;  %9283 = vrcp.f32 %v2345_v27  ;;  %v9196_v23 = vld [vmem:[#allocation17 + $0x78] sm:$0xff]  }
 0x617   : > { %v2355_v30 = vpack.c.bf16 %v2351_v25, %v2351_v25  ;;  %v9198_v25 = vld [vmem:[#allocation20 + $0x50] sm:$0xff]   ;;  %v9199_v27 = vld [vmem:[#allocation20 + $0x48] sm:$0xff]  }
 0x618   : > { %v2354_v31 = vpack.c.bf16 %v2350_v29, %v2350_v29  ;;  %v9201_v29 = vld [vmem:[#allocation20 + $0x60] sm:$0xff]  }
 0x619   : > { %8346 = vmatmul.mubr.msk.bf16.vlgmr.msra.gmra.mrb[32].mxu1 %vm2110_vm12, %v2355_v30  ;;  %v9202_v30 = vld [vmem:[#allocation20 + $0x68] sm:$0xff]  }
 0x61a   : > { %8340 = vmatmul.mubr.msk.bf16.vlgmr.msra.gmra.mrb[32].mxu0 %vm2110_vm12, %v2354_v31  ;;  %8356 = vmatpush3.bf16.msra.mxu1 %v2505_v32  ;;  %v9203_v31 = vld [vmem:[#allocation20 + $0x70] sm:$0xff]   ;;  %v9204_v32 = vld [vmem:[#allocation20 + $0x78] sm:$0xff]  }
 0x61b   : > { %8350 = vmatpush3.bf16.msra.mxu0 %v2459_v13  ;;  %8351 = vmatprep.mubr.msk.bf16.mxu0 %vm9993_vm4, %v9992_v1 }
 0x61c   : > { %v9282_v12 = vpop.eup %9281  ;;  %8357 = vmatprep.mubr.msk.bf16.mxu1 %vm9993_vm4, %v9992_v1  ;;  %8361 = vmatprep.subr.bf16.mxu0 %v9992_v1 }
 0x61d   : > { %v2352_v33 = vmul.f32 %v9282_v12, %v9274_v9  ;;  %8367 = vmatprep.subr.bf16.mxu1 %v9992_v1  ;;  %v9184_v9 = vld [vmem:[#allocation14 + $0x58] sm:$0xff]  }
 0x61f   : > { %v2356_v35 = vpack.c.bf16 %v2352_v33, %v2352_v33 }
 0x620   : > { %v9284_v36 = vpop.eup %9283 }
 0x621   : > { %v2353_v38 = vmul.f32 %v9284_v36, %v9276_v11  ;;  %v9187_v11 = vld [vmem:[#allocation14 + $0x70] sm:$0xff]  }
 0x622   : > { %8352 = vmatmul.mubr.msk.bf16.vlgmr.msra.gmra.mrb[36].mxu0 %vm2110_vm12, %v2356_v35 }
 0x623   : > { %v2357_v39 = vpack.c.bf16 %v2353_v38, %v2353_v38  ;;  %8362 = vmatpush3.bf16.msra.mxu0 %v2559_v37  ;;  %8363 = vmatprep.mubr.msk.bf16.mxu0 %vm9993_vm4, %v9992_v1 }
 0x624   : > { %8373 = vmatprep.subr.bf16.mxu0 %v9992_v1 }
 0x625   : > { %8358 = vmatmul.mubr.msk.bf16.vlgmr.msra.gmra.mrb[36].mxu1 %vm2110_vm12, %v2357_v39 }
 0x626   : > { %8369 = vmatprep.mubr.msk.bf16.mxu1 %vm9993_vm4, %v9992_v1  ;;  %8368 = vmatpush3.bf16.msra.mxu1 %v2605_v41 }
 0x627   : > { %8379 = vmatprep.subr.bf16.mxu1 %v9992_v1 }
 0x6ec   : > { %v2449_v44 = vpop.f32.mrb[32].mxu1 }
 0x6ed   : > { %v2403_v45 = vpop.f32.mrb[32].mxu0  ;;  %v2548_v46 = vpack.c.bf16 %v2449_v44, %v2449_v44  ;;  %v8347_v47 = vpop.f32.mrb[33].mxu1 }
 0x6ee   : > { %v2547_v50 = vpack.c.bf16 %v2403_v45, %v2403_v45  ;;  %v8341_v51 = vpop.f32.mrb[33].mxu0  ;;  %v2452_v52 = vpop.f32.mrb[34].mxu1 }
 0x6ef   : > { %v2406_v54 = vpop.f32.mrb[34].mxu0  ;;  %v8348_v55 = vpop.f32.mrb[35].mxu1  ;;  %8370 = vmatmul.mubr.msk.bf16.vlgmr.msra.gmra.mrb[40].mxu1 %vm2110_vm12, %v2548_v46 }
 0x6f0   : > { %v8342_v56 = vpop.f32.mrb[35].mxu0  ;;  %8364 = vmatmul.mubr.msk.bf16.vlgmr.msra.gmra.mrb[40].mxu0 %vm2110_vm12, %v2547_v50  ;;  %8380 = vmatpush3.bf16.msra.mxu1 %v2697_v49 }
 0x6f1   : > { %8374 = vmatpush3.bf16.msra.mxu0 %v2651_v53  ;;  %8375 = vmatprep.mubr.msk.bf16.mxu0 %vm9993_vm4, %v9992_v1 }
 0x6f2   : > { %8385 = vmatprep.subr.bf16.mxu0 %v9992_v1  ;;  %8381 = vmatprep.mubr.msk.bf16.mxu1 %vm9993_vm4, %v9992_v1 }
 0x6f3   : > { %8393 = vmatprep.subr.bf16.mxu1 %v9992_v1 }
 0x6f5   : > { %v2495_v57 = vpop.f32.mrb[36].mxu0 }
 0x6f6   : > { %v2549_v59 = vpack.c.bf16 %v2495_v57, %v2495_v57  ;;  %v8353_v60 = vpop.f32.mrb[37].mxu0 }
 0x6f7   : > { %v2498_v61 = vpop.f32.mrb[38].mxu0 }
 0x6f8   : > { %v8354_v62 = vpop.f32.mrb[39].mxu0  ;;  %8376 = vmatmul.mubr.msk.bf16.vlgmr.msra.gmra.mrb[44].mxu0 %vm2110_vm12, %v2549_v59  ;;  %v2541_v63 = vpop.f32.mrb[36].mxu1 }
 0x6f9   : > { %v2550_v2 = vpack.c.bf16 %v2541_v63, %v2541_v63  ;;  %8386 = vmatpush3.bf16.msra.mxu0 %v9181_v58  ;;  %v8359_v3 = vpop.f32.mrb[37].mxu1  ;;  %8389 = vmatprep.mubr.msk.bf16.mxu0 %vm9993_vm4, %v9992_v1 }
 0x6fa   : > { %v2544_v6 = vpop.f32.mrb[38].mxu1  ;;  %8387 = vmatprep.subr.bf16.mxu0 %v9992_v1 }
 0x6fb   : > { %v8360_v7 = vpop.f32.mrb[39].mxu1  ;;  %8382 = vmatmul.mubr.msk.bf16.vlgmr.msra.gmra.mrb[44].mxu1 %vm2110_vm12, %v2550_v2 }
 0x6fc   : > { %8394 = vmatpush3.bf16.msra.mxu1 %v9183_v0  ;;  %8397 = vmatprep.mubr.msk.bf16.mxu1 %vm9993_vm4, %v9992_v1 }
 0x6fd   : > { %8388 = vmatpush3.bf16.msra.mxu0 %v9182_v4  ;;  %8395 = vmatprep.subr.bf16.mxu1 %v9992_v1 }
 0x6fe   : > { %8401 = vmatprep.subr.bf16.mxu0 %v9992_v1 }
 0x700   : > { %8390 = vmatmul.mubr.msk.bf16.vlgmr.msra.gmra.mrb[48].mxu0 %vm1172_vm5, %v2755_v8  ;;  %8396 = vmatpush3.bf16.msra.mxu1 %v9184_v9 }
 0x701   : > { %8402 = vmatpush3.bf16.msra.mxu0 %v9185_v10  ;;  %8409 = vmatprep.subr.bf16.mxu1 %v9992_v1 }
 0x702   : > { %8403 = vmatprep.subr.bf16.mxu0 %v9992_v1  ;;  %8405 = vmatprep.mubr.msk.bf16.mxu0 %vm9993_vm4, %v9992_v1 }
 0x703   : > { %8398 = vmatmul.mubr.msk.bf16.vlgmr.msra.gmra.mrb[48].mxu1 %vm1172_vm5, %v2755_v8 }
 0x704   : > { %8410 = vmatpush3.bf16.msra.mxu1 %v9187_v11  ;;  %8413 = vmatprep.mubr.msk.bf16.mxu1 %vm9993_vm4, %v9992_v1 }
 0x705   : > { %8404 = vmatpush3.bf16.msra.mxu0 %v9186_v14  ;;  %8411 = vmatprep.subr.bf16.mxu1 %v9992_v1  ;;  %v7778_v14 = vld [vmem:[#allocation19 + $0x5] ss:$0 sm:$0xff] }
 0x706   : > { %8417 = vmatprep.subr.bf16.mxu0 %v9992_v1 }
 0x708   : > { %8406 = vmatmul.mubr.msk.bf16.vlgmr.msra.gmra.mrb[52].mxu0 %vm1172_vm5, %v2755_v8  ;;  %8412 = vmatpush3.bf16.msra.mxu1 %v9188_v15 }
 0x709   : > { %8418 = vmatpush3.bf16.msra.mxu0 %v9189_v16  ;;  %8425 = vmatprep.subr.bf16.mxu1 %v9992_v1 }
 0x70a   : > { %8419 = vmatprep.subr.bf16.mxu0 %v9992_v1  ;;  %8421 = vmatprep.mubr.msk.bf16.mxu0 %vm9993_vm4, %v9992_v1 }
 0x70b   : > { %8414 = vmatmul.mubr.msk.bf16.vlgmr.msra.gmra.mrb[52].mxu1 %vm1172_vm5, %v2755_v8  ;;  %v7777_v8 = vld [vmem:[#allocation19 + $0x4] ss:$0 sm:$0xff] }
 0x70c   : > { %8426 = vmatpush3.bf16.msra.mxu1 %v9191_v17  ;;  %8429 = vmatprep.mubr.msk.bf16.mxu1 %vm9993_vm4, %v9992_v1 }
 0x70d   : > { %8420 = vmatpush3.bf16.msra.mxu0 %v9190_v18  ;;  %8427 = vmatprep.subr.bf16.mxu1 %v9992_v1 }
 0x70e   : > { %8433 = vmatprep.subr.bf16.mxu0 %v9992_v1 }
 0x710   : > { %8422 = vmatmul.mubr.msk.bf16.vlgmr.msra.gmra.mrb[56].mxu0 %vm1172_vm5, %v10830_v48  ;;  %8428 = vmatpush3.bf16.msra.mxu1 %v9192_v19  ;;  %v7761_v19 = vld [vmem:[#allocation16 + $0x4] ss:$0 sm:$0xff] }
 0x711   : > { %8434 = vmatpush3.bf16.msra.mxu0 %v9193_v20  ;;  %8441 = vmatprep.subr.bf16.mxu1 %v9992_v1 }
 0x712   : > { %8435 = vmatprep.subr.bf16.mxu0 %v9992_v1  ;;  %8437 = vmatprep.mubr.msk.bf16.mxu0 %vm9993_vm4, %v9992_v1 }
 0x713   : > { %8430 = vmatmul.mubr.msk.bf16.vlgmr.msra.gmra.mrb[56].mxu1 %vm1172_vm5, %v10830_v48 }
 0x714   : > { %8442 = vmatpush3.bf16.msra.mxu1 %v9195_v21  ;;  %8445 = vmatprep.mubr.msk.bf16.mxu1 %vm9993_vm4, %v9992_v1 }
 0x715   : > { %8436 = vmatpush3.bf16.msra.mxu0 %v9194_v22  ;;  %8443 = vmatprep.subr.bf16.mxu1 %v9992_v1 }
 0x716   : > { %8449 = vmatprep.subr.bf16.mxu0 %v9992_v1 }
 0x718   : > { %8438 = vmatmul.mubr.msk.bf16.vlgmr.msra.gmra.mrb[60].mxu0 %vm1172_vm5, %v10830_v48  ;;  %8444 = vmatpush3.bf16.msra.mxu1 %v9196_v23 }
 0x719   : > { %8457 = vmatprep.subr.bf16.mxu1 %v9992_v1  ;;  %8453 = vmatprep.mubr.msk.bf16.mxu0 %vm9993_vm4, %v9992_v1 }
 0x71a   : > { %8450 = vmatpush3.bf16.msra.mxu0 %v9197_v24 }
 0x71b   : > { %8446 = vmatmul.mubr.msk.bf16.vlgmr.msra.gmra.mrb[60].mxu1 %vm1172_vm5, %v10830_v48  ;;  %8451 = vmatprep.subr.bf16.mxu0 %v9992_v1 }
 0x71c   : > { %8461 = vmatprep.mubr.msk.bf16.mxu1 %vm9993_vm4, %v9992_v1  ;;  %8458 = vmatpush3.bf16.msra.mxu1 %v9198_v25 }
 0x71d   : > { %8459 = vmatprep.subr.bf16.mxu1 %v9992_v1 }
 0x71e   : > { %8452 = vmatpush3.bf16.msra.mxu0 %v9199_v27  ;;  %v7779_v27 = vld [vmem:[#allocation19 + $0x6] ss:$0 sm:$0xff] }
 0x71f   : > { %8465 = vmatprep.subr.bf16.mxu0 %v9992_v1 }
 0x720   : > { %8460 = vmatpush3.bf16.msra.mxu1 %v9200_v28 }
 0x721   : > { %8454 = vmatmul.mubr.msk.bf16.vlgmr.msra.gmra.mrb[64].mxu0 %vm1172_vm5, %v10830_v48  ;;  %8473 = vmatprep.subr.bf16.mxu1 %v9992_v1 }
 0x722   : > { %8466 = vmatpush3.bf16.msra.mxu0 %v9201_v29  ;;  %8469 = vmatprep.mubr.msk.bf16.mxu0 %vm9993_vm4, %v9992_v1  ;;  %v7762_v29 = vld [vmem:[#allocation16 + $0x5] ss:$0 sm:$0xff] }
 0x723   : > { %8462 = vmatmul.mubr.msk.bf16.vlgmr.msra.gmra.mrb[64].mxu1 %vm1172_vm5, %v10830_v48  ;;  %8467 = vmatprep.subr.bf16.mxu0 %v9992_v1 }
 0x724   : > { %8477 = vmatprep.mubr.msk.bf16.mxu1 %vm9993_vm4, %v9992_v1  ;;  %8474 = vmatpush3.bf16.msra.mxu1 %v9203_v31 }
 0x725   : > { %8475 = vmatprep.subr.bf16.mxu1 %v9992_v1 }
 0x726   : > { %8468 = vmatpush3.bf16.msra.mxu0 %v9202_v30 }
 0x727   : > { %8481 = vmatprep.subr.bf16.mxu0 %v9992_v1 }
 0x728   : > { %8476 = vmatpush3.bf16.msra.mxu1 %v9204_v32 }
 0x729   : > { %8470 = vmatmul.mubr.msk.bf16.vlgmr.msra.gmra.mrb[68].mxu0 %vm1172_vm5, %v10830_v48  ;;  %8487 = vmatprep.subr.bf16.mxu1 %v9992_v1 }
 0x72a   : > { %8483 = vmatprep.mubr.msk.bf16.mxu0 %vm9993_vm4, %v9992_v1 }
 0x72b   : > { %8478 = vmatmul.mubr.msk.bf16.vlgmr.msra.gmra.mrb[68].mxu1 %vm1172_vm5, %v10830_v48 }
 0x72c   : > { %8489 = vmatprep.mubr.msk.bf16.mxu1 %vm9993_vm4, %v9992_v1 }
 0x7c2   : > { %v2641_v13 = vpop.f32.mrb[40].mxu1 }
 0x7c3   : > { %v2595_v12 = vpop.f32.mrb[40].mxu0  ;;  %v2741_v33 = vsel %vm2739_vm15, %v2641_v13, 0.0  ;;  %v8371_v34 = vpop.f32.mrb[41].mxu1 }
 0x7c4   : > { %v2740_v35 = vsel %vm2739_vm15, %v2595_v12, 0.0  ;;  %v8365_v36 = vpop.f32.mrb[41].mxu0  ;;  %v2644_v37 = vpop.f32.mrb[42].mxu1  ;;  %v7780_v12 = vld [vmem:[#allocation19 + $0x7] ss:$0 sm:$0xff] }
 0x7c5   : > { %v2742_v38 = vadd.f32 %v2741_v33, %v2740_v35  ;;  %v2598_v39 = vpop.f32.mrb[42].mxu0  ;;  %v8372_v40 = vpop.f32.mrb[43].mxu1 }
 0x7c6   : > { %v8366_v41 = vpop.f32.mrb[43].mxu0  ;;  %v7763_v39 = vld [vmem:[#allocation16 + $0x6] ss:$0 sm:$0xff] }
 0x7cb   : > { %v2687_v42 = vpop.f32.mrb[44].mxu0 }
 0x7cc   : > { %v2743_v43 = vsel %vm2739_vm15, %v2687_v42, 0.0  ;;  %v8377_v44 = vpop.f32.mrb[45].mxu0 }
 0x7cd   : > { %v2744_v45 = vadd.f32 %v2743_v43, %v2742_v38  ;;  %v2690_v46 = vpop.f32.mrb[46].mxu0 }
 0x7ce   : > { %v8378_v47 = vpop.f32.mrb[47].mxu0  ;;  %v2733_v49 = vpop.f32.mrb[44].mxu1 }
 0x7cf   : > { %v2745_v50 = vsel %vm2739_vm15, %v2733_v49, 0.0  ;;  %v8383_v51 = vpop.f32.mrb[45].mxu1  ;;  %v7764_v49 = vld [vmem:[#allocation16 + $0x7] ss:$0 sm:$0xff] }
 0x7d0   : > { %v11033_v52 = vadd.f32 %v2745_v50, %v2744_v45  ;;  %v2736_v53 = vpop.f32.mrb[46].mxu1 }
 0x7d1   : > { %v8384_v54 = vpop.f32.mrb[47].mxu1 }
 0x7d3   : > { %v2851_v55 = vpop.f32.mrb[48].mxu0 }
 0x7d4   : > { %v8391_v56 = vpop.f32.mrb[49].mxu0  ;;  %v2852_v28 = vadd.f32 %v7761_v19, %v2851_v55  ;;  %v7793_v55 = vld [vmem:[#allocation22 + $0x4] ss:$0 sm:$0xff] }
 0x7d5   : > { %v2854_v57 = vpop.f32.mrb[50].mxu0 }
 0x7d6   : > { %v8392_v58 = vpop.f32.mrb[51].mxu0  ;;  %v2903_v59 = vpop.f32.mrb[48].mxu1  ;;  %v3521_v35 = vpack.c.bf16 %v2852_v28, %v2852_v28  ;;  %v7794_v57 = vld [vmem:[#allocation22 + $0x5] ss:$0 sm:$0xff] }
 0x7d7   : > { %v8399_v60 = vpop.f32.mrb[49].mxu1  ;;  %v2904_v33 = vadd.f32 %v7762_v29, %v2903_v59 }
 0x7d8   : > { %v2906_v61 = vpop.f32.mrb[50].mxu1 }
 0x7d9   : > { %v8400_v62 = vpop.f32.mrb[51].mxu1  ;;  %v3522_v44 = vpack.c.bf16 %v2904_v33, %v2904_v33 }
 0x7db   : > { %v2955_v63 = vpop.f32.mrb[52].mxu0 }
 0x7dc   : > { %v8407_v0 = vpop.f32.mrb[53].mxu0  ;;  %v2956_v47 = vadd.f32 %v7763_v39, %v2955_v63 }
 0x7dd   : > { %v2958_v2 = vpop.f32.mrb[54].mxu0 }
 0x7de   : > { %v8408_v3 = vpop.f32.mrb[55].mxu0  ;;  %v3007_v4 = vpop.f32.mrb[52].mxu1  ;;  %v3523_v53 = vpack.c.bf16 %v2956_v47, %v2956_v47 }
 0x7df   : > { %v8415_v5 = vpop.f32.mrb[53].mxu1  ;;  %v3008_v51 = vadd.f32 %v7764_v49, %v3007_v4 }
 0x7e0   : > { %v3010_v6 = vpop.f32.mrb[54].mxu1 }
 0x7e1   : > { %v8416_v7 = vpop.f32.mrb[55].mxu1  ;;  %v3524_v54 = vpack.c.bf16 %v3008_v51, %v3008_v51 }
 0x7e3   : > { %v3105_v9 = vpop.f32.mrb[56].mxu0 }
 0x7e4   : > { %v3106_v10 = vadd.f32 %v7777_v8, %v3105_v9  ;;  %v8423_v11 = vpop.f32.mrb[57].mxu0 }
 0x7e5   : > { %v3108_v15 = vpop.f32.mrb[58].mxu0 }
 0x7e6   : > { %v3525_v16 = vpack.c.bf16 %v3106_v10, %v3106_v10  ;;  %v8424_v17 = vpop.f32.mrb[59].mxu0  ;;  %v3157_v18 = vpop.f32.mrb[56].mxu1 }
 0x7e7   : > { %v3158_v20 = vadd.f32 %v7778_v14, %v3157_v18  ;;  %v8431_v21 = vpop.f32.mrb[57].mxu1 }
 0x7e8   : > { %v3533_v22 = vsel %vm2110_vm12, %v3525_v16, 0  ;;  %v3160_v23 = vpop.f32.mrb[58].mxu1 }
 0x7e9   : > { %v3526_v24 = vpack.c.bf16 %v3158_v20, %v3158_v20  ;;  %8482 = vmatpush3.bf16.xpose.msra.mxu0 %v3533_v22  ;;  %v8432_v25 = vpop.f32.mrb[59].mxu1 }
 0x7ea   : > { %8493 = vmatprep.subr.bf16.mxu0 %v9992_v1 }
 0x7eb   : > { %v3579_v30 = vsel %vm2110_vm12, %v3526_v24, 0  ;;  %v3209_v31 = vpop.f32.mrb[60].mxu0 }
 0x7ec   : > { %v3210_v32 = vadd.f32 %v7779_v27, %v3209_v31  ;;  %v8439_v13 = vpop.f32.mrb[61].mxu0  ;;  %8488 = vmatpush3.bf16.xpose.msra.mxu1 %v3579_v30 }
 0x7ed   : > { %v3212_v34 = vpop.f32.mrb[62].mxu0  ;;  %8499 = vmatprep.subr.bf16.mxu1 %v9992_v1 }
 0x7ee   : > { %v3527_v36 = vpack.c.bf16 %v3210_v32, %v3210_v32  ;;  %v8440_v37 = vpop.f32.mrb[63].mxu0  ;;  %v3261_v38 = vpop.f32.mrb[60].mxu1 }
 0x7ef   : > { %v3262_v40 = vadd.f32 %v7780_v12, %v3261_v38  ;;  %v8447_v41 = vpop.f32.mrb[61].mxu1 }
 0x7f0   : > { %v3625_v42 = vsel %vm2110_vm12, %v3527_v36, 0  ;;  %8484 = vmatmul.mubr.msk.bf16.vlgmr.msra.gmra.mrb[72].mxu0 %vm2110_vm12, %v3521_v35  ;;  %v3264_v43 = vpop.f32.mrb[62].mxu1 }
 0x7f1   : > { %v3528_v45 = vpack.c.bf16 %v3262_v40, %v3262_v40  ;;  %8494 = vmatpush3.bf16.xpose.msra.mxu0 %v3625_v42  ;;  %v8448_v46 = vpop.f32.mrb[63].mxu1  ;;  %8495 = vmatprep.mubr.msk.bf16.mxu0 %vm9993_vm4, %v9992_v1 }
 0x7f2   : > { %8505 = vmatprep.subr.bf16.mxu0 %v9992_v1 }
 0x7f3   : > { %v3671_v50 = vsel %vm2110_vm12, %v3528_v45, 0  ;;  %8490 = vmatmul.mubr.msk.bf16.vlgmr.msra.gmra.mrb[72].mxu1 %vm2110_vm12, %v3522_v44 }
 0x7f4   : > { %8500 = vmatpush3.bf16.xpose.msra.mxu1 %v3671_v50  ;;  %8501 = vmatprep.mubr.msk.bf16.mxu1 %vm9993_vm4, %v9992_v1  ;;  %v3359_v56 = vpop.f32.mrb[64].mxu0 }
 0x7f5   : > { %8511 = vmatprep.subr.bf16.mxu1 %v9992_v1  ;;  %v3360_v58 = vadd.f32 %v7793_v55, %v3359_v56  ;;  %v8455_v59 = vpop.f32.mrb[65].mxu0 }
 0x7f6   : > { %v3362_v60 = vpop.f32.mrb[66].mxu0  ;;  %v3411_v61 = vpop.f32.mrb[64].mxu1 }
 0x7f7   : > { %v3769_v62 = vpack.c.bf16 %v3360_v58, %v3360_v58  ;;  %v3412_v63 = vadd.f32 %v7794_v57, %v3411_v61  ;;  %v8456_v0 = vpop.f32.mrb[67].mxu0  ;;  %v8463_v2 = vpop.f32.mrb[65].mxu1 }
 0x7f8   : > { %8496 = vmatmul.mubr.msk.bf16.vlgmr.msra.gmra.mrb[76].mxu0 %vm2110_vm12, %v3523_v53  ;;  %v3414_v3 = vpop.f32.mrb[66].mxu1 }
 0x7f9   : > { %8507 = vmatprep.mubr.msk.bf16.mxu0 %vm9993_vm4, %v9992_v1  ;;  %v3777_v4 = vsel %vm2365_vm13, %v3769_v62, 0  ;;  %v3770_v5 = vpack.c.bf16 %v3412_v63, %v3412_v63  ;;  %v8464_v6 = vpop.f32.mrb[67].mxu1 }
 0x7fa   : > { %8506 = vmatpush3.bf16.msra.mxu0 %v3777_v4  ;;  %v7795_v6 = vld [vmem:[#allocation22 + $0x6] ss:$0 sm:$0xff] }
 0x7fb   : > { %8502 = vmatmul.mubr.msk.bf16.vlgmr.msra.gmra.mrb[76].mxu1 %vm2110_vm12, %v3524_v54  ;;  %v3823_v7 = vsel %vm2365_vm13, %v3770_v5, 0  ;;  %8517 = vmatprep.subr.bf16.mxu0 %v9992_v1 }
 0x7fc   : > { %8513 = vmatprep.mubr.msk.bf16.mxu1 %vm9993_vm4, %v9992_v1  ;;  %8512 = vmatpush3.bf16.msra.mxu1 %v3823_v7  ;;  %v11058_v8 = vpop.f32.mrb[68].mxu0 }
 0x7fd   : > { %v8471_v9 = vpop.f32.mrb[69].mxu0  ;;  %8523 = vmatprep.subr.bf16.mxu1 %v9992_v1  ;;  %v3464_v7 = vadd.f32 %v7795_v6, %v11058_v8 }
 0x7fe   : > { %v3466_v10 = vpop.f32.mrb[70].mxu0  ;;  %v11061_v14 = vpop.f32.mrb[68].mxu1  ;;  %v7796_v9 = vld [vmem:[#allocation22 + $0x7] ss:$0 sm:$0xff] }
 0x7ff   : > { %v8472_v11 = vpop.f32.mrb[71].mxu0  ;;  %v8479_v15 = vpop.f32.mrb[69].mxu1 }
 0x800   : > { %v3518_v16 = vpop.f32.mrb[70].mxu1  ;;  %v3516_v15 = vadd.f32 %v7796_v9, %v11061_v14 }
 0x801   : > { %v8480_v17 = vpop.f32.mrb[71].mxu1 }
 0x802   : > { %v3771_v17 = vpack.c.bf16 %v3464_v7, %v3464_v7  ;;  %v3964_v7 = vld [vmem:[#allocation23 + $0x18] sm:$0xf] }
 0x8c3   : > { %v3569_v18 = vpop.f32.mrb[72].mxu0 }
 0x8c4   : > { %v3713_v19 = vmul.f32 0.35355338, %v3569_v18  ;;  %v8485_v20 = vpop.f32.mrb[73].mxu0 }
 0x8c5   : > { %v3572_v21 = vpop.f32.mrb[74].mxu0 }
 0x8c6   : > { %v8486_v22 = vpop.f32.mrb[75].mxu0  ;;  %v3615_v23 = vpop.f32.mrb[72].mxu1  ;;  %v3717_v24 = vadd.f32 %v3713_v19, %v10908_v26  ;;  %v3772_v21 = vpack.c.bf16 %v3516_v15, %v3516_v15 }
 0x8c7   : > { %v3714_v25 = vmul.f32 0.35355338, %v3615_v23  ;;  %v8491_v27 = vpop.f32.mrb[73].mxu1  ;;  %v3869_v23 = vsel %vm2365_vm13, %v3771_v17, 0 }
 0x8c8   : > { %v3618_v28 = vpop.f32.mrb[74].mxu1  ;;  %v3721_v29 = vsel %vm2309_vm14, %v3717_v24, -inf }
 0x8c9   : > { %3722 = vmax.xlane.f32.xlu1 %v3721_v29  ;;  %v8492_v30 = vpop.f32.mrb[75].mxu1  ;;  %v3718_v31 = vadd.f32 %v3714_v25, %v10908_v26  ;;  %v3962_v25 = vld [vmem:[#allocation23 + $0x10] sm:$0xf] }
 0x8ca   : > { %v3970_v30 = vsel %vm2365_vm13, %v3962_v25, 0 }
 0x8cb   : > { %v3661_v32 = vpop.f32.mrb[76].mxu0  ;;  %v3724_v13 = vsel %vm2309_vm14, %v3718_v31, -inf }
 0x8cc   : > { %v3715_v12 = vmul.f32 0.35355338, %v3661_v32  ;;  %v8497_v33 = vpop.f32.mrb[77].mxu0  ;;  %3725 = vmax.xlane.f32.xlu0 %v3724_v13  ;;  %v3963_v13 = vld [vmem:[#allocation23 + $0x14] sm:$0xf] }
 0x8cd   : > { %v3664_v34 = vpop.f32.mrb[78].mxu0  ;;  %v1270_v33 = vld [vmem:[%s10702_s4] sm:$0x7] }
 0x8ce   : > { %v8498_v35 = vpop.f32.mrb[79].mxu0  ;;  %v3707_v36 = vpop.f32.mrb[76].mxu1  ;;  %v3719_v37 = vadd.f32 %v3715_v12, %v10908_v26  ;;  %v4016_v12 = vsel %vm2365_vm13, %v3963_v13, 0  ;;  %v1271_v34 = vld [vmem:[%s10702_s4 + $0x4] sm:$0x7] }
 0x8cf   : > { %v3716_v38 = vmul.f32 0.35355338, %v3707_v36  ;;  %v8503_v39 = vpop.f32.mrb[77].mxu1  ;;  %v1272_v35 = vld [vmem:[%s10702_s4 + $0x8] sm:$0x7]  ;;  %v1275_v36 = vsel %vm1274_vm0, %v1270_v33, 0.0 }
 0x8d0   : > { %v3710_v40 = vpop.f32.mrb[78].mxu1  ;;  %v3727_v41 = vsel %vm2309_vm14, %v3719_v37, -inf  ;;  %v1276_v39 = vrot.slane %v1275_v36, 4 }
 0x8d1   : > { %3728 = vmax.xlane.f32.xlu1 %v3727_v41  ;;  %v8504_v42 = vpop.f32.mrb[79].mxu1  ;;  %v3720_v43 = vadd.f32 %v3716_v38, %v10908_v26  ;;  %v1273_v38 = vld [vmem:[%s10702_s4 + $0xc] sm:$0x7]  ;;  %v1289_v41 = vsel %vm1274_vm0, %v1272_v35, 0.0 }
 0x8d2   : > { %v1290_v42 = vrot.slane %v1289_v41, 4 }
 0x8d3   : > { %v3730_v44 = vsel %vm2309_vm14, %v3720_v43, -inf }
 0x8d4   : > { %3731 = vmax.xlane.f32.xlu0 %v3730_v44  ;;  %v1277_v44 = vadd.f32 %v1276_v39, %v1275_v36 }
 0x956   : > { %v3723_v45 = vpop.xlane.xlu1 %3722 }
 0x957   : > { %v3733_v46 = vsub.f32 %v3717_v24, %v3723_v45  ;;  %v3915_v24 = vsel %vm2365_vm13, %v3772_v21, 0 }
 0x959   : > { %v3737_v47 = vmul.f32 1.442695, %v3733_v46  ;;  %v3726_v49 = vpop.xlane.xlu0 %3725 }
 0x95a   : > { %v3734_v50 = vsub.f32 %v3718_v31, %v3726_v49  ;;  %v1278_v49 = vrot.slane %v1277_v44, 2 }
 0x95b   : > { %9285 = vpow2.f32 %v3737_v47  ;;  %v1291_v47 = vadd.f32 %v1290_v42, %v1289_v41 }
 0x95c   : > { %v3739_v51 = vmul.f32 1.442695, %v3734_v50 }
 0x95e   : > { %9287 = vpow2.f32 %v3739_v51  ;;  %v3729_v53 = vpop.xlane.xlu1 %3728 }
 0x95f   : > { %v3735_v54 = vsub.f32 %v3719_v37, %v3729_v53  ;;  %v1282_v37 = vsel %vm1274_vm0, %v1271_v34, 0.0  ;;  %v1292_v53 = vrot.slane %v1291_v47, 2 }
 0x960   : > { %v1283_v40 = vrot.slane %v1282_v37, 4 }
 0x961   : > { %v3741_v55 = vmul.f32 1.442695, %v3735_v54  ;;  %v3732_v56 = vpop.xlane.xlu0 %3731  ;;  %v1279_v54 = vadd.f32 %v1278_v49, %v1277_v44  ;;  %v9208_v49 = vld [vmem:[#allocation14 + $0x98] sm:$0xff]  }
 0x962   : > { %v3736_v57 = vsub.f32 %v3720_v43, %v3732_v56  ;;  %v1296_v43 = vsel %vm1274_vm0, %v1273_v38, 0.0  ;;  %v1284_v45 = vadd.f32 %v1283_v40, %v1282_v37  ;;  %v9207_v40 = vld [vmem:[#allocation14 + $0x90] sm:$0xff]  }
 0x963   : > { %9289 = vpow2.f32 %v3741_v55  ;;  %v1297_v46 = vrot.slane %v1296_v43, 4 }
 0x964   : > { %v3743_v58 = vmul.f32 1.442695, %v3736_v57  ;;  %v1285_v50 = vrot.slane %v1284_v45, 2  ;;  %v1293_v57 = vadd.f32 %v1292_v53, %v1291_v47  ;;  %v9210_v53 = vld [vmem:[#allocation14 + $0xa8] sm:$0xff]  }
 0x965   : > { %v9286_v59 = vpop.eup %9285  ;;  %v1298_v51 = vadd.f32 %v1297_v46, %v1296_v43  ;;  %v9206_v43 = vld [vmem:[#allocation14 + $0x88] sm:$0xff]  }
 0x966   : > { %9291 = vpow2.f32 %v3743_v58  ;;  %v3745_v60 = vsel %vm2309_vm14, %v9286_v59, 0.0  ;;  %v1286_v55 = vadd.f32 %v1285_v50, %v1284_v45  ;;  %v1280_v58 = vrot.slane %v1279_v54, 1  ;;  %v9209_v50 = vld [vmem:[#allocation14 + $0xa0] sm:$0xff]  }
 0x967   : > { %3746 = vadd.xlane.f32.xlu1 %v3745_v60  ;;  %v1299_v56 = vrot.slane %v1298_v51, 2 }
 0x968   : > { %v9288_v61 = vpop.eup %9287 }
 0x969   : > { %v3748_v62 = vsel %vm2309_vm14, %v9288_v61, 0.0  ;;  %v1300_v60 = vadd.f32 %v1299_v56, %v1298_v51  ;;  %v9211_v51 = vld [vmem:[#allocation14 + $0xb0] sm:$0xff]   ;;  %v9215_v56 = vld [vmem:[#allocation17 + $0x90] sm:$0xff]  }
 0x96a   : > { %3749 = vadd.xlane.f32.xlu0 %v3748_v62  ;;  %v1281_v62 = vadd.f32 %v1280_v58, %v1279_v54  ;;  %v9212_v54 = vld [vmem:[#allocation14 + $0xb8] sm:$0xff]   ;;  %v9216_v58 = vld [vmem:[#allocation17 + $0x98] sm:$0xff]  }
 0x96d   : > { %v9290_v63 = vpop.eup %9289 }
 0x96e   : > { %v3751_v0 = vsel %vm2309_vm14, %v9290_v63, 0.0 }
 0x96f   : > { %3752 = vadd.xlane.f32.xlu1 %v3751_v0  ;;  %v1301_v0 = vrot.slane %v1300_v60, 1 }
 0x970   : > { %v9292_v2 = vpop.eup %9291 }
 0x971   : > { %v3754_v3 = vsel %vm2309_vm14, %v9292_v2, 0.0 }
 0x972   : > { %3755 = vadd.xlane.f32.xlu0 %v3754_v3  ;;  %v1304_v3 = vmul.f32 0.33333334, %v1281_v62  ;;  %v9220_v62 = vld [vmem:[#allocation17 + $0xb8] sm:$0xff]  }
 0x974   : > { %v4166_v9 = vpack.c.bf16 %v1304_v3, %v1304_v3  ;;  %v9224_v3 = vld [vmem:[#allocation20 + $0x98] sm:$0xff]  }
 0x9f4   : > { %v3747_v4 = vpop.xlane.xlu1 %3746 }
 0x9f5   : > { %9293 = vrcp.f32 %v3747_v4 }
 0x9f7   : > { %v3750_v5 = vpop.xlane.xlu0 %3749 }
 0x9f8   : > { %9295 = vrcp.f32 %v3750_v5  ;;  %v1302_v5 = vadd.f32 %v1301_v0, %v1300_v60  ;;  %v9219_v60 = vld [vmem:[#allocation17 + $0xb0] sm:$0xff]   ;;  %v9222_v0 = vld [vmem:[#allocation20 + $0x90] sm:$0xff]  }
 0x9fa   : > { %v1307_v15 = vmul.f32 0.33333334, %v1302_v5  ;;  %v9226_v5 = vld [vmem:[#allocation20 + $0xa8] sm:$0xff]  }
 0x9fc   : > { %v3753_v10 = vpop.xlane.xlu1 %3752 }
 0x9fd   : > { %9297 = vrcp.f32 %v3753_v10 }
 0x9ff   : > { %v9294_v11 = vpop.eup %9293  ;;  %v3756_v16 = vpop.xlane.xlu0 %3755 }
 0xa00   : > { %v3761_v18 = vmul.f32 %v9294_v11, %v9286_v59  ;;  %9299 = vrcp.f32 %v3756_v16  ;;  %v1287_v59 = vrot.slane %v1286_v55, 1 }
 0xa02   : > { %v9296_v19 = vpop.eup %9295  ;;  %v3765_v20 = vpack.c.bf16 %v3761_v18, %v3761_v18  ;;  %v4062_v18 = vsel %vm2365_vm13, %v3964_v7, 0  ;;  %v9228_v7 = vld [vmem:[#allocation20 + $0xb8] sm:$0xff]  }
 0xa03   : > { %v3762_v22 = vmul.f32 %v9296_v19, %v9288_v61  ;;  %v1294_v61 = vrot.slane %v1293_v57, 1  ;;  %v3965_v19 = vld [vmem:[#allocation23 + $0x1c] sm:$0xf] }
 0xa04   : > { %8508 = vmatmul.mubr.msk.bf16.vlgmr.msra.gmra.mrb[80].mxu0 %vm2110_vm12, %v3765_v20 }
 0xa05   : > { %8518 = vmatpush3.bf16.msra.mxu0 %v3869_v23  ;;  %v3766_v8 = vpack.c.bf16 %v3762_v22, %v3762_v22  ;;  %8519 = vmatprep.mubr.msk.bf16.mxu0 %vm9993_vm4, %v9992_v1  ;;  %v4220_v22 = vunpack.c.l.b16 %v4166_v9 }
 0xa06   : > { %8529 = vmatprep.subr.bf16.mxu0 %v9992_v1 }
 0xa07   : > { %v9298_v14 = vpop.eup %9297  ;;  %8514 = vmatmul.mubr.msk.bf16.vlgmr.msra.gmra.mrb[80].mxu1 %vm2110_vm12, %v3766_v8 }
 0xa08   : > { %v3763_v27 = vmul.f32 %v9298_v14, %v9290_v63  ;;  %8524 = vmatpush3.bf16.msra.mxu1 %v3915_v24  ;;  %8525 = vmatprep.mubr.msk.bf16.mxu1 %vm9993_vm4, %v9992_v1  ;;  %v1288_v63 = vadd.f32 %v1287_v59, %v1286_v55  ;;  %v9213_v55 = vld [vmem:[#allocation17 + $0x80] sm:$0xff]  }
 0xa09   : > { %8535 = vmatprep.subr.bf16.mxu1 %v9992_v1  ;;  %v9217_v59 = vld [vmem:[#allocation17 + $0xa0] sm:$0xff]  }
 0xa0a   : > { %v9300_v28 = vpop.eup %9299  ;;  %v3767_v29 = vpack.c.bf16 %v3763_v27, %v3763_v27  ;;  %v1305_v4 = vmul.f32 0.33333334, %v1288_v63  ;;  %v4108_v27 = vsel %vm2365_vm13, %v3965_v19, 0  ;;  %v9221_v63 = vld [vmem:[#allocation20 + $0x80] sm:$0xff]  }
 0xa0b   : > { %v3764_v31 = vmul.f32 %v9300_v28, %v9292_v2  ;;  %v1295_v2 = vadd.f32 %v1294_v61, %v1293_v57  ;;  %v4169_v28 = vpack.c.bf16 %v1307_v15, %v1307_v15  ;;  %v9214_v57 = vld [vmem:[#allocation17 + $0x88] sm:$0xff]  }
 0xa0c   : > { %8520 = vmatmul.mubr.msk.bf16.vlgmr.msra.gmra.mrb[84].mxu0 %vm2110_vm12, %v3767_v29  ;;  %v4167_v10 = vpack.c.bf16 %v1305_v4, %v1305_v4  ;;  %v9218_v61 = vld [vmem:[#allocation17 + $0xa8] sm:$0xff]   ;;  %v9225_v4 = vld [vmem:[#allocation20 + $0xa0] sm:$0xff]  }
 0xa0d   : > { %v3768_v32 = vpack.c.bf16 %v3764_v31, %v3764_v31  ;;  %8530 = vmatpush3.bf16.msra.mxu0 %v3970_v30  ;;  %8531 = vmatprep.mubr.msk.bf16.mxu0 %vm9993_vm4, %v9992_v1  ;;  %v1306_v6 = vmul.f32 0.33333334, %v1295_v2  ;;  %v4223_v33 = vunpack.c.l.b16 %v4169_v28  ;;  %v9223_v2 = vld [vmem:[#allocation20 + $0x88] sm:$0xff]  }
 0xa0e   : > { %8541 = vmatprep.subr.bf16.mxu0 %v9992_v1  ;;  %v4221_v23 = vunpack.c.l.b16 %v4167_v10 }
 0xa0f   : > { %8526 = vmatmul.mubr.msk.bf16.vlgmr.msra.gmra.mrb[84].mxu1 %vm2110_vm12, %v3768_v32  ;;  %v4168_v20 = vpack.c.bf16 %v1306_v6, %v1306_v6  ;;  %v9227_v6 = vld [vmem:[#allocation20 + $0xb0] sm:$0xff]  }
 0xa10   : > { %8537 = vmatprep.mubr.msk.bf16.mxu1 %vm9993_vm4, %v9992_v1  ;;  %8536 = vmatpush3.bf16.msra.mxu1 %v4016_v12  ;;  %v4224_v32 = vsel %vm1373_vm7, %v4221_v23, %v4220_v22  ;;  %v9205_v12 = vld [vmem:[#allocation14 + $0x80] sm:$0xff]   ;;  %vm7152_vm7 = vcmask 158720  }
 0xa11   : > { %8547 = vmatprep.subr.bf16.mxu1 %v9992_v1  ;;  %v4222_v30 = vunpack.c.l.b16 %v4168_v20 }
 0xa13   : > { %v4225_v36 = vsel %vm1375_vm8, %v4222_v30, %v4224_v32  ;;  %v7821_v30 = vld [vmem:[#allocation25 + $0x1] ss:$0 sm:$0xff]  ;;  %vm7334_vm8 = vcmask 253952  }
 0xa14   : > { %v4226_v44 = vsel %vm1377_vm9, %v4223_v33, %v4225_v36 }
 0xa15   : > { %v4227_v47 = vpack.c.b16 %v4226_v44, %v4226_v44 }
 0xad7   : > { %v3813_v11 = vpop.f32.mrb[80].mxu0 }
 0xad8   : > { %v3957_v16 = vpack.c.bf16 %v3813_v11, %v3813_v11  ;;  %v8509_v17 = vpop.f32.mrb[81].mxu0 }
 0xad9   : > { %v3816_v21 = vpop.f32.mrb[82].mxu0 }
 0xada   : > { %v8510_v8 = vpop.f32.mrb[83].mxu0  ;;  %8532 = vmatmul.mubr.msk.bf16.vlgmr.msra.gmra.mrb[88].mxu0 %vm2110_vm12, %v3957_v16  ;;  %v3859_v14 = vpop.f32.mrb[80].mxu1 }
 0xadb   : > { %v3958_v24 = vpack.c.bf16 %v3859_v14, %v3859_v14  ;;  %v8515_v25 = vpop.f32.mrb[81].mxu1  ;;  %8542 = vmatpush3.bf16.msra.mxu0 %v4062_v18  ;;  %8543 = vmatprep.mubr.msk.bf16.mxu0 %vm9993_vm4, %v9992_v1 }
 0xadc   : > { %v3862_v29 = vpop.f32.mrb[82].mxu1  ;;  %8553 = vmatprep.subr.bf16.mxu0 %v9992_v1 }
 0xadd   : > { %v8516_v31 = vpop.f32.mrb[83].mxu1  ;;  %8538 = vmatmul.mubr.msk.bf16.vlgmr.msra.gmra.mrb[88].mxu1 %vm2110_vm12, %v3958_v24 }
 0xade   : > { %8548 = vmatpush3.bf16.msra.mxu1 %v4108_v27  ;;  %8549 = vmatprep.mubr.msk.bf16.mxu1 %vm9993_vm4, %v9992_v1 }
 0xadf   : > { %v3905_v13 = vpop.f32.mrb[84].mxu0  ;;  %8561 = vmatprep.subr.bf16.mxu1 %v9992_v1 }
 0xae0   : > { %v3959_v34 = vpack.c.bf16 %v3905_v13, %v3905_v13  ;;  %v8521_v35 = vpop.f32.mrb[85].mxu0 }
 0xae1   : > { %v3908_v37 = vpop.f32.mrb[86].mxu0 }
 0xae2   : > { %v8522_v38 = vpop.f32.mrb[87].mxu0  ;;  %8544 = vmatmul.mubr.msk.bf16.vlgmr.msra.gmra.mrb[92].mxu0 %vm2110_vm12, %v3959_v34  ;;  %v3951_v39 = vpop.f32.mrb[84].mxu1 }
 0xae3   : > { %v3960_v41 = vpack.c.bf16 %v3951_v39, %v3951_v39  ;;  %8554 = vmatpush3.bf16.msra.mxu0 %v9205_v12  ;;  %v8527_v42 = vpop.f32.mrb[85].mxu1  ;;  %8557 = vmatprep.mubr.msk.bf16.mxu0 %vm9993_vm4, %v9992_v1  ;;  %v7760_v12 = vld [vmem:[#allocation25] ss:$0 sm:$0xff] }
 0xae4   : > { %v3954_v45 = vpop.f32.mrb[86].mxu1  ;;  %8555 = vmatprep.subr.bf16.mxu0 %v9992_v1  ;;  %v2754_v36 = vadd.f32 %v7760_v12, %v11033_v52  ;;  %v7825_v12 = vld [vmem:[#allocation16 + $0xb] ss:$0 sm:$0xff] }
 0xae5   : > { %v8528_v46 = vpop.f32.mrb[87].mxu1  ;;  %8550 = vmatmul.mubr.msk.bf16.vlgmr.msra.gmra.mrb[92].mxu1 %vm2110_vm12, %v3960_v41 }
 0xae6   : > { %8562 = vmatpush3.bf16.msra.mxu1 %v9207_v40  ;;  %8565 = vmatprep.mubr.msk.bf16.mxu1 %vm9993_vm4, %v9992_v1 }
 0xae7   : > { %8556 = vmatpush3.bf16.msra.mxu0 %v9206_v43  ;;  %8563 = vmatprep.subr.bf16.mxu1 %v9992_v1 }
 0xae8   : > { %8569 = vmatprep.subr.bf16.mxu0 %v9992_v1 }
 0xaea   : > { %8558 = vmatmul.mubr.msk.bf16.vlgmr.msra.gmra.mrb[96].mxu0 %vm1172_vm5, %v4227_v47  ;;  %8564 = vmatpush3.bf16.msra.mxu1 %v9208_v49 }
 0xaeb   : > { %8570 = vmatpush3.bf16.msra.mxu0 %v9209_v50  ;;  %8577 = vmatprep.subr.bf16.mxu1 %v9992_v1 }
 0xaec   : > { %8571 = vmatprep.subr.bf16.mxu0 %v9992_v1  ;;  %8573 = vmatprep.mubr.msk.bf16.mxu0 %vm9993_vm4, %v9992_v1 }
 0xaed   : > { %8566 = vmatmul.mubr.msk.bf16.vlgmr.msra.gmra.mrb[96].mxu1 %vm1172_vm5, %v4227_v47 }
 0xaee   : > { %8578 = vmatpush3.bf16.msra.mxu1 %v9211_v51  ;;  %8581 = vmatprep.mubr.msk.bf16.mxu1 %vm9993_vm4, %v9992_v1 }
 0xaef   : > { %8572 = vmatpush3.bf16.msra.mxu0 %v9210_v53  ;;  %8579 = vmatprep.subr.bf16.mxu1 %v9992_v1 }
 0xaf0   : > { %8585 = vmatprep.subr.bf16.mxu0 %v9992_v1 }
 0xaf2   : > { %8574 = vmatmul.mubr.msk.bf16.vlgmr.msra.gmra.mrb[100].mxu0 %vm1172_vm5, %v4227_v47  ;;  %8580 = vmatpush3.bf16.msra.mxu1 %v9212_v54 }
 0xaf3   : > { %8586 = vmatpush3.bf16.msra.mxu0 %v9213_v55  ;;  %8593 = vmatprep.subr.bf16.mxu1 %v9992_v1  ;;  %v7838_v55 = vld [vmem:[#allocation19 + $0x8] ss:$0 sm:$0xff] }
 0xaf4   : > { %8587 = vmatprep.subr.bf16.mxu0 %v9992_v1  ;;  %8589 = vmatprep.mubr.msk.bf16.mxu0 %vm9993_vm4, %v9992_v1 }
 0xaf5   : > { %8582 = vmatmul.mubr.msk.bf16.vlgmr.msra.gmra.mrb[100].mxu1 %vm1172_vm5, %v4227_v47 }
 0xaf6   : > { %8594 = vmatpush3.bf16.msra.mxu1 %v9215_v56  ;;  %8597 = vmatprep.mubr.msk.bf16.mxu1 %vm9993_vm4, %v9992_v1 }
 0xaf7   : > { %8588 = vmatpush3.bf16.msra.mxu0 %v9214_v57  ;;  %8595 = vmatprep.subr.bf16.mxu1 %v9992_v1 }
 0xaf8   : > { %8601 = vmatprep.subr.bf16.mxu0 %v9992_v1 }
 0xafa   : > { %8590 = vmatmul.mubr.msk.bf16.vlgmr.msra.gmra.mrb[104].mxu0 %vm1172_vm5, %v10830_v48  ;;  %8596 = vmatpush3.bf16.msra.mxu1 %v9216_v58 }
 0xafb   : > { %8602 = vmatpush3.bf16.msra.mxu0 %v9217_v59  ;;  %8609 = vmatprep.subr.bf16.mxu1 %v9992_v1  ;;  %v7839_v59 = vld [vmem:[#allocation19 + $0x9] ss:$0 sm:$0xff] }
 0xafc   : > { %8603 = vmatprep.subr.bf16.mxu0 %v9992_v1  ;;  %8605 = vmatprep.mubr.msk.bf16.mxu0 %vm9993_vm4, %v9992_v1 }
 0xafd   : > { %8598 = vmatmul.mubr.msk.bf16.vlgmr.msra.gmra.mrb[104].mxu1 %vm1172_vm5, %v10830_v48 }
 0xafe   : > { %8610 = vmatpush3.bf16.msra.mxu1 %v9219_v60  ;;  %8613 = vmatprep.mubr.msk.bf16.mxu1 %vm9993_vm4, %v9992_v1 }
 0xaff   : > { %8604 = vmatpush3.bf16.msra.mxu0 %v9218_v61  ;;  %8611 = vmatprep.subr.bf16.mxu1 %v9992_v1 }
 0xb00   : > { %8617 = vmatprep.subr.bf16.mxu0 %v9992_v1 }
 0xb02   : > { %8606 = vmatmul.mubr.msk.bf16.vlgmr.msra.gmra.mrb[108].mxu0 %vm1172_vm5, %v10830_v48  ;;  %8612 = vmatpush3.bf16.msra.mxu1 %v9220_v62 }
 0xb03   : > { %8625 = vmatprep.subr.bf16.mxu1 %v9992_v1  ;;  %8621 = vmatprep.mubr.msk.bf16.mxu0 %vm9993_vm4, %v9992_v1 }
 0xb04   : > { %8618 = vmatpush3.bf16.msra.mxu0 %v9221_v63 }
 0xb05   : > { %8614 = vmatmul.mubr.msk.bf16.vlgmr.msra.gmra.mrb[108].mxu1 %vm1172_vm5, %v10830_v48  ;;  %8619 = vmatprep.subr.bf16.mxu0 %v9992_v1 }
 0xb06   : > { %8629 = vmatprep.mubr.msk.bf16.mxu1 %vm9993_vm4, %v9992_v1  ;;  %8626 = vmatpush3.bf16.msra.mxu1 %v9222_v0  ;;  %v7822_v0 = vld [vmem:[#allocation16 + $0x8] ss:$0 sm:$0xff] }
 0xb07   : > { %8627 = vmatprep.subr.bf16.mxu1 %v9992_v1 }
 0xb08   : > { %8620 = vmatpush3.bf16.msra.mxu0 %v9223_v2 }
 0xb09   : > { %8633 = vmatprep.subr.bf16.mxu0 %v9992_v1 }
 0xb0a   : > { %8628 = vmatpush3.bf16.msra.mxu1 %v9224_v3 }
 0xb0b   : > { %8622 = vmatmul.mubr.msk.bf16.vlgmr.msra.gmra.mrb[112].mxu0 %vm1172_vm5, %v10830_v48  ;;  %8641 = vmatprep.subr.bf16.mxu1 %v9992_v1 }
 0xb0c   : > { %8634 = vmatpush3.bf16.msra.mxu0 %v9225_v4  ;;  %8637 = vmatprep.mubr.msk.bf16.mxu0 %vm9993_vm4, %v9992_v1 }
 0xb0d   : > { %8630 = vmatmul.mubr.msk.bf16.vlgmr.msra.gmra.mrb[112].mxu1 %vm1172_vm5, %v10830_v48  ;;  %8635 = vmatprep.subr.bf16.mxu0 %v9992_v1 }
 0xb0e   : > { %8645 = vmatprep.mubr.msk.bf16.mxu1 %vm9993_vm4, %v9992_v1  ;;  %8642 = vmatpush3.bf16.msra.mxu1 %v9227_v6 }
 0xb0f   : > { %8643 = vmatprep.subr.bf16.mxu1 %v9992_v1 }
 0xb10   : > { %8636 = vmatpush3.bf16.msra.mxu0 %v9226_v5 }
 0xb11   : > { %8649 = vmatprep.subr.bf16.mxu0 %v9992_v1 }
 0xb12   : > { %8644 = vmatpush3.bf16.msra.mxu1 %v9228_v7 }
 0xb13   : > { %8638 = vmatmul.mubr.msk.bf16.vlgmr.msra.gmra.mrb[116].mxu0 %vm1172_vm5, %v10830_v48  ;;  %8655 = vmatprep.subr.bf16.mxu1 %v9992_v1 }
 0xb14   : > { %8651 = vmatprep.mubr.msk.bf16.mxu0 %vm9993_vm4, %v9992_v1 }
 0xb15   : > { %8646 = vmatmul.mubr.msk.bf16.vlgmr.msra.gmra.mrb[116].mxu1 %vm1172_vm5, %v10830_v48 }
 0xb16   : > { %8657 = vmatprep.mubr.msk.bf16.mxu1 %vm9993_vm4, %v9992_v1 }
 0xbad   : > { %v4006_v9 = vpop.f32.mrb[88].mxu0 }
 0xbae   : > { %v8533_v10 = vpop.f32.mrb[89].mxu0  ;;  %v4150_v17 = vsel %vm2739_vm15, %v4006_v9, 0.0  ;;  %v7840_v9 = vld [vmem:[#allocation19 + $0xa] ss:$0 sm:$0xff] }
 0xbaf   : > { %v4009_v11 = vpop.f32.mrb[90].mxu0 }
 0xbb0   : > { %v8534_v15 = vpop.f32.mrb[91].mxu0  ;;  %v4052_v16 = vpop.f32.mrb[88].mxu1  ;;  %v7823_v11 = vld [vmem:[#allocation16 + $0x9] ss:$0 sm:$0xff] }
 0xbb1   : > { %v4151_v18 = vsel %vm2739_vm15, %v4052_v16, 0.0  ;;  %v8539_v19 = vpop.f32.mrb[89].mxu1 }
 0xbb2   : > { %v4152_v20 = vadd.f32 %v4151_v18, %v4150_v17  ;;  %v4055_v21 = vpop.f32.mrb[90].mxu1  ;;  %v7841_v19 = vld [vmem:[#allocation19 + $0xb] ss:$0 sm:$0xff] }
 0xbb3   : > { %v8540_v22 = vpop.f32.mrb[91].mxu1 }
 0xbb5   : > { %v4098_v23 = vpop.f32.mrb[92].mxu0 }
 0xbb6   : > { %v4153_v8 = vsel %vm2739_vm15, %v4098_v23, 0.0  ;;  %v8545_v14 = vpop.f32.mrb[93].mxu0 }
 0xbb7   : > { %v4154_v24 = vadd.f32 %v4153_v8, %v4152_v20  ;;  %v4101_v25 = vpop.f32.mrb[94].mxu0 }
 0xbb8   : > { %v8546_v27 = vpop.f32.mrb[95].mxu0  ;;  %v4144_v28 = vpop.f32.mrb[92].mxu1 }
 0xbb9   : > { %v4155_v29 = vsel %vm2739_vm15, %v4144_v28, 0.0  ;;  %v8551_v31 = vpop.f32.mrb[93].mxu1 }
 0xbba   : > { %v4156_v32 = vadd.f32 %v4155_v29, %v4154_v24  ;;  %v4147_v13 = vpop.f32.mrb[94].mxu1  ;;  %v7824_v24 = vld [vmem:[#allocation16 + $0xa] ss:$0 sm:$0xff] }
 0xbbb   : > { %v8552_v33 = vpop.f32.mrb[95].mxu1 }
 0xbbc   : > { %v4165_v34 = vadd.f32 %v7821_v30, %v4156_v32 }
 0xbbd   : > { %v4277_v35 = vpop.f32.mrb[96].mxu0 }
 0xbbe   : > { %v11193_v37 = vrot.slane %v4165_v34, 2  ;;  %v8559_v38 = vpop.f32.mrb[97].mxu0  ;;  %v4278_v10 = vadd.f32 %v7822_v0, %v4277_v35 }
 0xbbf   : > { %v4280_v39 = vpop.f32.mrb[98].mxu0  ;;  %v7854_v38 = vld [vmem:[#allocation22 + $0x8] ss:$0 sm:$0xff] }
 0xbc0   : > { %v11196_v40 = vsel %vm7012_vm1, %v2754_v36, %v11193_v37  ;;  %v8560_v41 = vpop.f32.mrb[99].mxu0  ;;  %v4329_v42 = vpop.f32.mrb[96].mxu1  ;;  %v4947_v22 = vpack.c.bf16 %v4278_v10, %v4278_v10 }
 0xbc1   : > { %v8567_v43 = vpop.f32.mrb[97].mxu1  ;;  %v4330_v20 = vadd.f32 %v7823_v11, %v4329_v42  ;;  %v7855_v41 = vld [vmem:[#allocation22 + $0x9] ss:$0 sm:$0xff] }
 0xbc2   : > { %v4332_v44 = vpop.f32.mrb[98].mxu1 }
 0xbc3   : > { %v8568_v45 = vpop.f32.mrb[99].mxu1  ;;  %v4948_v30 = vpack.c.bf16 %v4330_v20, %v4330_v20 }
 0xbc5   : > { %v4381_v46 = vpop.f32.mrb[100].mxu0 }
 0xbc6   : > { %v8575_v47 = vpop.f32.mrb[101].mxu0  ;;  %v4382_v13 = vadd.f32 %v7824_v24, %v4381_v46 }
 0xbc7   : > { %v4384_v49 = vpop.f32.mrb[102].mxu0 }
 0xbc8   : > { %v8576_v50 = vpop.f32.mrb[103].mxu0  ;;  %v4433_v51 = vpop.f32.mrb[100].mxu1  ;;  %v4949_v35 = vpack.c.bf16 %v4382_v13, %v4382_v13 }
 0xbc9   : > { %v8583_v53 = vpop.f32.mrb[101].mxu1  ;;  %v4434_v34 = vadd.f32 %v7825_v12, %v4433_v51 }
 0xbca   : > { %v4436_v54 = vpop.f32.mrb[102].mxu1 }
 0xbcb   : > { %v8584_v52 = vpop.f32.mrb[103].mxu1  ;;  %v4950_v36 = vpack.c.bf16 %v4434_v34, %v4434_v34 }
 0xbcd   : > { %v4531_v56 = vpop.f32.mrb[104].mxu0 }
 0xbce   : > { %v4532_v57 = vadd.f32 %v7838_v55, %v4531_v56  ;;  %v8591_v58 = vpop.f32.mrb[105].mxu0 }
 0xbcf   : > { %v4534_v60 = vpop.f32.mrb[106].mxu0 }
 0xbd0   : > { %v4951_v61 = vpack.c.bf16 %v4532_v57, %v4532_v57  ;;  %v8592_v62 = vpop.f32.mrb[107].mxu0  ;;  %v4583_v63 = vpop.f32.mrb[104].mxu1 }
 0xbd1   : > { %v4584_v2 = vadd.f32 %v7839_v59, %v4583_v63  ;;  %v8599_v3 = vpop.f32.mrb[105].mxu1 }
 0xbd2   : > { %v4959_v4 = vsel %vm2110_vm12, %v4951_v61, 0  ;;  %v4586_v5 = vpop.f32.mrb[106].mxu1 }
 0xbd3   : > { %v4952_v6 = vpack.c.bf16 %v4584_v2, %v4584_v2  ;;  %8650 = vmatpush3.bf16.xpose.msra.mxu0 %v4959_v4  ;;  %v8600_v7 = vpop.f32.mrb[107].mxu1 }
 0xbd4   : > { %8661 = vmatprep.subr.bf16.mxu0 %v9992_v1 }
 0xbd5   : > { %v5005_v15 = vsel %vm2110_vm12, %v4952_v6, 0  ;;  %v4635_v16 = vpop.f32.mrb[108].mxu0 }
 0xbd6   : > { %v4636_v17 = vadd.f32 %v7840_v9, %v4635_v16  ;;  %v8607_v18 = vpop.f32.mrb[109].mxu0  ;;  %8656 = vmatpush3.bf16.xpose.msra.mxu1 %v5005_v15 }
 0xbd7   : > { %v4638_v21 = vpop.f32.mrb[110].mxu0  ;;  %8667 = vmatprep.subr.bf16.mxu1 %v9992_v1 }
 0xbd8   : > { %v4953_v23 = vpack.c.bf16 %v4636_v17, %v4636_v17  ;;  %v8608_v8 = vpop.f32.mrb[111].mxu0  ;;  %v4687_v14 = vpop.f32.mrb[108].mxu1 }
 0xbd9   : > { %v4688_v25 = vadd.f32 %v7841_v19, %v4687_v14  ;;  %v8615_v27 = vpop.f32.mrb[109].mxu1 }
 0xbda   : > { %v5051_v28 = vsel %vm2110_vm12, %v4953_v23, 0  ;;  %8652 = vmatmul.mubr.msk.bf16.vlgmr.msra.gmra.mrb[120].mxu0 %vm2110_vm12, %v4947_v22  ;;  %v4690_v29 = vpop.f32.mrb[110].mxu1 }
 0xbdb   : > { %v4954_v31 = vpack.c.bf16 %v4688_v25, %v4688_v25  ;;  %8662 = vmatpush3.bf16.xpose.msra.mxu0 %v5051_v28  ;;  %v8616_v32 = vpop.f32.mrb[111].mxu1  ;;  %8663 = vmatprep.mubr.msk.bf16.mxu0 %vm9993_vm4, %v9992_v1 }
 0xbdc   : > { %8673 = vmatprep.subr.bf16.mxu0 %v9992_v1 }
 0xbdd   : > { %v5097_v33 = vsel %vm2110_vm12, %v4954_v31, 0  ;;  %8658 = vmatmul.mubr.msk.bf16.vlgmr.msra.gmra.mrb[120].mxu1 %vm2110_vm12, %v4948_v30 }
 0xbde   : > { %8668 = vmatpush3.bf16.xpose.msra.mxu1 %v5097_v33  ;;  %8669 = vmatprep.mubr.msk.bf16.mxu1 %vm9993_vm4, %v9992_v1  ;;  %v4785_v39 = vpop.f32.mrb[112].mxu0 }
 0xbdf   : > { %8679 = vmatprep.subr.bf16.mxu1 %v9992_v1  ;;  %v4786_v42 = vadd.f32 %v7854_v38, %v4785_v39  ;;  %v8623_v43 = vpop.f32.mrb[113].mxu0 }
 0xbe0   : > { %v4788_v44 = vpop.f32.mrb[114].mxu0  ;;  %v4837_v45 = vpop.f32.mrb[112].mxu1 }
 0xbe1   : > { %v5196_v46 = vpack.c.bf16 %v4786_v42, %v4786_v42  ;;  %v4838_v47 = vadd.f32 %v7855_v41, %v4837_v45  ;;  %v8624_v49 = vpop.f32.mrb[115].mxu0  ;;  %v8631_v50 = vpop.f32.mrb[113].mxu1 }
 0xbe2   : > { %8664 = vmatmul.mubr.msk.bf16.vlgmr.msra.gmra.mrb[124].mxu0 %vm2110_vm12, %v4949_v35  ;;  %v4840_v51 = vpop.f32.mrb[114].mxu1 }
 0xbe3   : > { %8675 = vmatprep.mubr.msk.bf16.mxu0 %vm9993_vm4, %v9992_v1  ;;  %v5204_v53 = vsel %vm2365_vm13, %v5196_v46, 0  ;;  %v5197_v54 = vpack.c.bf16 %v4838_v47, %v4838_v47  ;;  %v8632_v52 = vpop.f32.mrb[115].mxu1 }
 0xbe4   : > { %8674 = vmatpush3.bf16.msra.mxu0 %v5204_v53 }
 0xbe5   : > { %8670 = vmatmul.mubr.msk.bf16.vlgmr.msra.gmra.mrb[124].mxu1 %vm2110_vm12, %v4950_v36  ;;  %v5250_v55 = vsel %vm2365_vm13, %v5197_v54, 0  ;;  %8685 = vmatprep.subr.bf16.mxu0 %v9992_v1 }
 0xbe6   : > { %8681 = vmatprep.mubr.msk.bf16.mxu1 %vm9993_vm4, %v9992_v1  ;;  %8680 = vmatpush3.bf16.msra.mxu1 %v5250_v55  ;;  %v11221_v56 = vpop.f32.mrb[116].mxu0  ;;  %v7856_v55 = vld [vmem:[#allocation22 + $0xa] ss:$0 sm:$0xff] }
 0xbe7   : > { %v8639_v57 = vpop.f32.mrb[117].mxu0  ;;  %8691 = vmatprep.subr.bf16.mxu1 %v9992_v1 }
 0xbe8   : > { %v4892_v58 = vpop.f32.mrb[118].mxu0  ;;  %v11224_v60 = vpop.f32.mrb[116].mxu1  ;;  %v4890_v57 = vadd.f32 %v7856_v55, %v11221_v56  ;;  %v9236_v55 = vld [vmem:[#allocation14 + $0xf8] sm:$0xff]  }
 0xbe9   : > { %v8640_v59 = vpop.f32.mrb[119].mxu0  ;;  %v8647_v61 = vpop.f32.mrb[117].mxu1  ;;  %v7857_v58 = vld [vmem:[#allocation22 + $0xb] ss:$0 sm:$0xff] }
 0xbea   : > { %v4944_v62 = vpop.f32.mrb[118].mxu1 }
 0xbeb   : > { %v8648_v63 = vpop.f32.mrb[119].mxu1  ;;  %v4942_v62 = vadd.f32 %v7857_v58, %v11224_v60  ;;  %v9239_v58 = vld [vmem:[#allocation17 + $0xd0] sm:$0xff]  }
 0xcad   : > { %v4995_v0 = vpop.f32.mrb[120].mxu0 }
 0xcae   : > { %v5139_v2 = vmul.f32 0.35355338, %v4995_v0  ;;  %v8653_v3 = vpop.f32.mrb[121].mxu0  ;;  %v5198_v0 = vpack.c.bf16 %v4890_v57, %v4890_v57  ;;  %v9237_v57 = vld [vmem:[#allocation17 + $0xc0] sm:$0xff]  }
 0xcaf   : > { %v4998_v4 = vpop.f32.mrb[122].mxu0 }
 0xcb0   : > { %v8654_v5 = vpop.f32.mrb[123].mxu0  ;;  %v5041_v6 = vpop.f32.mrb[120].mxu1  ;;  %v5143_v7 = vadd.f32 %v5139_v2, %v10908_v26 }
 0xcb1   : > { %v5140_v9 = vmul.f32 0.35355338, %v5041_v6  ;;  %v8659_v10 = vpop.f32.mrb[121].mxu1  ;;  %v5199_v5 = vpack.c.bf16 %v4942_v62, %v4942_v62  ;;  %v9241_v62 = vld [vmem:[#allocation17 + $0xe0] sm:$0xff]  }
 0xcb2   : > { %v5044_v11 = vpop.f32.mrb[122].mxu1  ;;  %v5148_v15 = vsel %vm5147_vm2, %v5143_v7, -inf  ;;  %v5389_v10 = vld [vmem:[#allocation23 + $0x20] sm:$0xf] }
 0xcb3   : > { %5149 = vmax.xlane.f32.xlu1 %v5148_v15  ;;  %v8660_v16 = vpop.f32.mrb[123].mxu1  ;;  %v5144_v17 = vadd.f32 %v5140_v9, %v10908_v26  ;;  %v5342_v9 = vsel %vm2365_vm13, %v5199_v5, 0  ;;  %v9247_v5 = vld [vmem:[#allocation20 + $0xc8] sm:$0xff]  }
 0xcb5   : > { %v5087_v18 = vpop.f32.mrb[124].mxu0  ;;  %v5151_v19 = vsel %vm5147_vm2, %v5144_v17, -inf }
 0xcb6   : > { %v5141_v20 = vmul.f32 0.35355338, %v5087_v18  ;;  %v8665_v21 = vpop.f32.mrb[125].mxu0  ;;  %5152 = vmax.xlane.f32.xlu0 %v5151_v19 }
 0xcb7   : > { %v5090_v22 = vpop.f32.mrb[126].mxu0 }
 0xcb8   : > { %v8666_v23 = vpop.f32.mrb[127].mxu0  ;;  %v5133_v8 = vpop.f32.mrb[124].mxu1  ;;  %v5145_v14 = vadd.f32 %v5141_v20, %v10908_v26  ;;  %v5390_v20 = vld [vmem:[#allocation23 + $0x24] sm:$0xf]  ;;  %v5391_v22 = vld [vmem:[#allocation23 + $0x28] sm:$0xf] }
 0xcb9   : > { %v5142_v24 = vmul.f32 0.35355338, %v5133_v8  ;;  %v8671_v25 = vpop.f32.mrb[125].mxu1  ;;  %v5443_v21 = vsel %vm2365_vm13, %v5390_v20, 0 }
 0xcba   : > { %v5136_v27 = vpop.f32.mrb[126].mxu1  ;;  %v5154_v28 = vsel %vm5147_vm2, %v5145_v14, -inf  ;;  %v5392_v25 = vld [vmem:[#allocation23 + $0x2c] sm:$0xf] }
 0xcbb   : > { %5155 = vmax.xlane.f32.xlu1 %v5154_v28  ;;  %v8672_v29 = vpop.f32.mrb[127].mxu1  ;;  %v5146_v30 = vadd.f32 %v5142_v24, %v10908_v26  ;;  %v5489_v24 = vsel %vm2365_vm13, %v5391_v22, 0 }
 0xcbd   : > { %v5157_v31 = vsel %vm5147_vm2, %v5146_v30, -inf }
 0xcbe   : > { %5158 = vmax.xlane.f32.xlu0 %v5157_v31 }
 0xd40   : > { %v5150_v32 = vpop.xlane.xlu1 %5149 }
 0xd41   : > { %v5160_v13 = vsub.f32 %v5143_v7, %v5150_v32  ;;  %v5296_v7 = vsel %vm2365_vm13, %v5198_v0, 0  ;;  %v5535_v32 = vsel %vm2365_vm13, %v5392_v25, 0  ;;  %v9242_v0 = vld [vmem:[#allocation17 + $0xe8] sm:$0xff]  }
 0xd43   : > { %v5164_v12 = vmul.f32 1.442695, %v5160_v13  ;;  %v5153_v33 = vpop.xlane.xlu0 %5152 }
 0xd44   : > { %v5161_v34 = vsub.f32 %v5144_v17, %v5153_v33  ;;  %v5397_v17 = vsel %vm2365_vm13, %v5389_v10, 0 }
 0xd45   : > { %9301 = vpow2.f32 %v5164_v12 }
 0xd46   : > { %v5166_v35 = vmul.f32 1.442695, %v5161_v34  ;;  %v9229_v34 = vld [vmem:[#allocation14 + $0xc0] sm:$0xff]  }
 0xd48   : > { %9303 = vpow2.f32 %v5166_v35  ;;  %v5156_v36 = vpop.xlane.xlu1 %5155 }
 0xd49   : > { %v5162_v38 = vsub.f32 %v5145_v14, %v5156_v36 }
 0xd4b   : > { %v5168_v39 = vmul.f32 1.442695, %v5162_v38  ;;  %v5159_v41 = vpop.xlane.xlu0 %5158 }
 0xd4c   : > { %v5163_v42 = vsub.f32 %v5146_v30, %v5159_v41 }
 0xd4d   : > { %9305 = vpow2.f32 %v5168_v39 }
 0xd4e   : > { %v5170_v43 = vmul.f32 1.442695, %v5163_v42  ;;  %v9231_v42 = vld [vmem:[#allocation14 + $0xd0] sm:$0xff]  }
 0xd4f   : > { %v9302_v44 = vpop.eup %9301 }
 0xd50   : > { %9307 = vpow2.f32 %v5170_v43  ;;  %v5172_v45 = vsel %vm5147_vm2, %v9302_v44, 0.0 }
 0xd51   : > { %5173 = vadd.xlane.f32.xlu1 %v5172_v45  ;;  %v9230_v45 = vld [vmem:[#allocation14 + $0xc8] sm:$0xff]  }
 0xd52   : > { %v9304_v46 = vpop.eup %9303 }
 0xd53   : > { %v5175_v47 = vsel %vm5147_vm2, %v9304_v46, 0.0 }
 0xd54   : > { %5176 = vadd.xlane.f32.xlu0 %v5175_v47 }
 0xd57   : > { %v9306_v49 = vpop.eup %9305 }
 0xd58   : > { %v5178_v50 = vsel %vm5147_vm2, %v9306_v49, 0.0 }
 0xd59   : > { %5179 = vadd.xlane.f32.xlu1 %v5178_v50 }
 0xd5a   : > { %v9308_v51 = vpop.eup %9307 }
 0xd5b   : > { %v5181_v53 = vsel %vm5147_vm2, %v9308_v51, 0.0 }
 0xd5c   : > { %5182 = vadd.xlane.f32.xlu0 %v5181_v53  ;;  %v9233_v53 = vld [vmem:[#allocation14 + $0xe0] sm:$0xff]  }
 0xdde   : > { %v5174_v54 = vpop.xlane.xlu1 %5173 }
 0xddf   : > { %9309 = vrcp.f32 %v5174_v54  ;;  %v9235_v54 = vld [vmem:[#allocation14 + $0xf0] sm:$0xff]  }
 0xde1   : > { %v5177_v52 = vpop.xlane.xlu0 %5176 }
 0xde2   : > { %9311 = vrcp.f32 %v5177_v52  ;;  %v9234_v52 = vld [vmem:[#allocation14 + $0xe8] sm:$0xff]  }
 0xde6   : > { %v5180_v59 = vpop.xlane.xlu1 %5179 }
 0xde7   : > { %9313 = vrcp.f32 %v5180_v59  ;;  %v9238_v59 = vld [vmem:[#allocation17 + $0xc8] sm:$0xff]  }
 0xde9   : > { %v9310_v61 = vpop.eup %9309  ;;  %v5183_v63 = vpop.xlane.xlu0 %5182 }
 0xdea   : > { %v5188_v2 = vmul.f32 %v9310_v61, %v9302_v44  ;;  %9315 = vrcp.f32 %v5183_v63  ;;  %v9240_v61 = vld [vmem:[#allocation17 + $0xd8] sm:$0xff]   ;;  %v9243_v63 = vld [vmem:[#allocation17 + $0xf0] sm:$0xff]  }
 0xdec   : > { %v9312_v3 = vpop.eup %9311  ;;  %v5192_v4 = vpack.c.bf16 %v5188_v2, %v5188_v2  ;;  %v9244_v2 = vld [vmem:[#allocation17 + $0xf8] sm:$0xff]  }
 0xded   : > { %v5189_v6 = vmul.f32 %v9312_v3, %v9304_v46  ;;  %v1309_v46 = vld [vmem:[%s10711_s10] sm:$0xf]  ;;  %v9245_v3 = vld [vmem:[#allocation20 + $0xc0] sm:$0xff]  }
 0xdee   : > { %8676 = vmatmul.mubr.msk.bf16.vlgmr.msra.gmra.mrb[128].mxu0 %vm2110_vm12, %v5192_v4  ;;  %v5594_v50 = vpack.c.bf16 %v1309_v46, %v1309_v46  ;;  %v9246_v4 = vld [vmem:[#allocation20 + $0xd0] sm:$0xff]  }
 0xdef   : > { %8686 = vmatpush3.bf16.msra.mxu0 %v5296_v7  ;;  %v5193_v56 = vpack.c.bf16 %v5189_v6, %v5189_v6  ;;  %8687 = vmatprep.mubr.msk.bf16.mxu0 %vm9993_vm4, %v9992_v1  ;;  %v9248_v6 = vld [vmem:[#allocation20 + $0xd8] sm:$0xff]   ;;  %v9249_v7 = vld [vmem:[#allocation20 + $0xe0] sm:$0xff]  }
 0xdf0   : > { %8697 = vmatprep.subr.bf16.mxu0 %v9992_v1 }
 0xdf1   : > { %v9314_v60 = vpop.eup %9313  ;;  %8682 = vmatmul.mubr.msk.bf16.vlgmr.msra.gmra.mrb[128].mxu1 %vm2110_vm12, %v5193_v56  ;;  %v9250_v56 = vld [vmem:[#allocation20 + $0xe8] sm:$0xff]  }
 0xdf2   : > { %v5190_v11 = vmul.f32 %v9314_v60, %v9306_v49  ;;  %8692 = vmatpush3.bf16.msra.mxu1 %v5342_v9  ;;  %8693 = vmatprep.mubr.msk.bf16.mxu1 %vm9993_vm4, %v9992_v1  ;;  %v9251_v60 = vld [vmem:[#allocation20 + $0xf0] sm:$0xff]   ;;  %v9252_v9 = vld [vmem:[#allocation20 + $0xf8] sm:$0xff]  }
 0xdf3   : > { %8703 = vmatprep.subr.bf16.mxu1 %v9992_v1 }
 0xdf4   : > { %v9316_v15 = vpop.eup %9315  ;;  %v5194_v16 = vpack.c.bf16 %v5190_v11, %v5190_v11 }
 0xdf5   : > { %v5191_v18 = vmul.f32 %v9316_v15, %v9308_v51  ;;  %v9232_v51 = vld [vmem:[#allocation14 + $0xd8] sm:$0xff]  }
 0xdf6   : > { %8688 = vmatmul.mubr.msk.bf16.vlgmr.msra.gmra.mrb[132].mxu0 %vm2110_vm12, %v5194_v16 }
 0xdf7   : > { %v5195_v19 = vpack.c.bf16 %v5191_v18, %v5191_v18  ;;  %8698 = vmatpush3.bf16.msra.mxu0 %v5397_v17  ;;  %8699 = vmatprep.mubr.msk.bf16.mxu0 %vm9993_vm4, %v9992_v1 }
 0xdf8   : > { %8709 = vmatprep.subr.bf16.mxu0 %v9992_v1 }
 0xdf9   : > { %8694 = vmatmul.mubr.msk.bf16.vlgmr.msra.gmra.mrb[132].mxu1 %vm2110_vm12, %v5195_v19 }
 0xdfa   : > { %8705 = vmatprep.mubr.msk.bf16.mxu1 %vm9993_vm4, %v9992_v1  ;;  %8704 = vmatpush3.bf16.msra.mxu1 %v5443_v21 }
 0xdfb   : > { %8715 = vmatprep.subr.bf16.mxu1 %v9992_v1 }
 0xec1   : > { %v5240_v23 = vpop.f32.mrb[128].mxu0 }
 0xec2   : > { %v5384_v8 = vpack.c.bf16 %v5240_v23, %v5240_v23  ;;  %v8677_v14 = vpop.f32.mrb[129].mxu0 }
 0xec3   : > { %v5243_v27 = vpop.f32.mrb[130].mxu0 }
 0xec4   : > { %v8678_v28 = vpop.f32.mrb[131].mxu0  ;;  %8700 = vmatmul.mubr.msk.bf16.vlgmr.msra.gmra.mrb[136].mxu0 %vm2110_vm12, %v5384_v8  ;;  %v5286_v29 = vpop.f32.mrb[128].mxu1 }
 0xec5   : > { %v5385_v30 = vpack.c.bf16 %v5286_v29, %v5286_v29  ;;  %v8683_v31 = vpop.f32.mrb[129].mxu1  ;;  %8710 = vmatpush3.bf16.msra.mxu0 %v5489_v24  ;;  %8711 = vmatprep.mubr.msk.bf16.mxu0 %vm9993_vm4, %v9992_v1 }
 0xec6   : > { %v5289_v13 = vpop.f32.mrb[130].mxu1  ;;  %8721 = vmatprep.subr.bf16.mxu0 %v9992_v1 }
 0xec7   : > { %v8684_v12 = vpop.f32.mrb[131].mxu1  ;;  %8706 = vmatmul.mubr.msk.bf16.vlgmr.msra.gmra.mrb[136].mxu1 %vm2110_vm12, %v5385_v30 }
 0xec8   : > { %8716 = vmatpush3.bf16.msra.mxu1 %v5535_v32  ;;  %8717 = vmatprep.mubr.msk.bf16.mxu1 %vm9993_vm4, %v9992_v1 }
 0xec9   : > { %v5332_v33 = vpop.f32.mrb[132].mxu0  ;;  %8729 = vmatprep.subr.bf16.mxu1 %v9992_v1 }
 0xeca   : > { %v5386_v35 = vpack.c.bf16 %v5332_v33, %v5332_v33  ;;  %v8689_v36 = vpop.f32.mrb[133].mxu0 }
 0xecb   : > { %v5335_v38 = vpop.f32.mrb[134].mxu0 }
 0xecc   : > { %v8690_v39 = vpop.f32.mrb[135].mxu0  ;;  %8712 = vmatmul.mubr.msk.bf16.vlgmr.msra.gmra.mrb[140].mxu0 %vm2110_vm12, %v5386_v35  ;;  %v5378_v41 = vpop.f32.mrb[132].mxu1 }
 0xecd   : > { %v5387_v43 = vpack.c.bf16 %v5378_v41, %v5378_v41  ;;  %8722 = vmatpush3.bf16.msra.mxu0 %v9229_v34  ;;  %v8695_v44 = vpop.f32.mrb[133].mxu1  ;;  %8725 = vmatprep.mubr.msk.bf16.mxu0 %vm9993_vm4, %v9992_v1 }
 0xece   : > { %v5381_v47 = vpop.f32.mrb[134].mxu1  ;;  %8723 = vmatprep.subr.bf16.mxu0 %v9992_v1 }
 0xecf   : > { %v8696_v49 = vpop.f32.mrb[135].mxu1  ;;  %8718 = vmatmul.mubr.msk.bf16.vlgmr.msra.gmra.mrb[140].mxu1 %vm2110_vm12, %v5387_v43 }
 0xed0   : > { %8730 = vmatpush3.bf16.msra.mxu1 %v9231_v42  ;;  %8733 = vmatprep.mubr.msk.bf16.mxu1 %vm9993_vm4, %v9992_v1 }
 0xed1   : > { %8724 = vmatpush3.bf16.msra.mxu0 %v9230_v45  ;;  %8731 = vmatprep.subr.bf16.mxu1 %v9992_v1 }
 0xed2   : > { %8737 = vmatprep.subr.bf16.mxu0 %v9992_v1 }
 0xed4   : > { %8726 = vmatmul.mubr.msk.bf16.vlgmr.msra.gmra.mrb[144].mxu0 %vm1172_vm5, %v5594_v50  ;;  %8732 = vmatpush3.bf16.msra.mxu1 %v9232_v51  ;;  %v7899_v51 = vld [vmem:[#allocation19 + $0xc] ss:$0 sm:$0xff] }
 0xed5   : > { %8738 = vmatpush3.bf16.msra.mxu0 %v9233_v53  ;;  %8745 = vmatprep.subr.bf16.mxu1 %v9992_v1 }
 0xed6   : > { %8739 = vmatprep.subr.bf16.mxu0 %v9992_v1  ;;  %8741 = vmatprep.mubr.msk.bf16.mxu0 %vm9993_vm4, %v9992_v1 }
 0xed7   : > { %8734 = vmatmul.mubr.msk.bf16.vlgmr.msra.gmra.mrb[144].mxu1 %vm1172_vm5, %v5594_v50 }
 0xed8   : > { %8746 = vmatpush3.bf16.msra.mxu1 %v9235_v54  ;;  %8749 = vmatprep.mubr.msk.bf16.mxu1 %vm9993_vm4, %v9992_v1 }
 0xed9   : > { %8740 = vmatpush3.bf16.msra.mxu0 %v9234_v52  ;;  %8747 = vmatprep.subr.bf16.mxu1 %v9992_v1 }
 0xeda   : > { %8753 = vmatprep.subr.bf16.mxu0 %v9992_v1 }
 0xedc   : > { %8742 = vmatmul.mubr.msk.bf16.vlgmr.msra.gmra.mrb[148].mxu0 %vm1172_vm5, %v5594_v50  ;;  %8748 = vmatpush3.bf16.msra.mxu1 %v9236_v55  ;;  %v7900_v55 = vld [vmem:[#allocation19 + $0xd] ss:$0 sm:$0xff] }
 0xedd   : > { %8754 = vmatpush3.bf16.msra.mxu0 %v9237_v57  ;;  %8761 = vmatprep.subr.bf16.mxu1 %v9992_v1 }
 0xede   : > { %8755 = vmatprep.subr.bf16.mxu0 %v9992_v1  ;;  %8757 = vmatprep.mubr.msk.bf16.mxu0 %vm9993_vm4, %v9992_v1 }
 0xedf   : > { %8750 = vmatmul.mubr.msk.bf16.vlgmr.msra.gmra.mrb[148].mxu1 %vm1172_vm5, %v5594_v50 }
 0xee0   : > { %8762 = vmatpush3.bf16.msra.mxu1 %v9239_v58  ;;  %8765 = vmatprep.mubr.msk.bf16.mxu1 %vm9993_vm4, %v9992_v1 }
 0xee1   : > { %8756 = vmatpush3.bf16.msra.mxu0 %v9238_v59  ;;  %8763 = vmatprep.subr.bf16.mxu1 %v9992_v1 }
 0xee2   : > { %8769 = vmatprep.subr.bf16.mxu0 %v9992_v1 }
 0xee4   : > { %8758 = vmatmul.mubr.msk.bf16.vlgmr.msra.gmra.mrb[152].mxu0 %vm1172_vm5, %v10830_v48  ;;  %8764 = vmatpush3.bf16.msra.mxu1 %v9240_v61 }
 0xee5   : > { %8770 = vmatpush3.bf16.msra.mxu0 %v9241_v62  ;;  %8777 = vmatprep.subr.bf16.mxu1 %v9992_v1  ;;  %v7883_v62 = vld [vmem:[#allocation16 + $0xc] ss:$0 sm:$0xff] }
 0xee6   : > { %8771 = vmatprep.subr.bf16.mxu0 %v9992_v1  ;;  %8773 = vmatprep.mubr.msk.bf16.mxu0 %vm9993_vm4, %v9992_v1 }
 0xee7   : > { %8766 = vmatmul.mubr.msk.bf16.vlgmr.msra.gmra.mrb[152].mxu1 %vm1172_vm5, %v10830_v48 }
 0xee8   : > { %8778 = vmatpush3.bf16.msra.mxu1 %v9243_v63  ;;  %8781 = vmatprep.mubr.msk.bf16.mxu1 %vm9993_vm4, %v9992_v1 }
 0xee9   : > { %8772 = vmatpush3.bf16.msra.mxu0 %v9242_v0  ;;  %8779 = vmatprep.subr.bf16.mxu1 %v9992_v1 }
 0xeea   : > { %8785 = vmatprep.subr.bf16.mxu0 %v9992_v1 }
 0xeec   : > { %8774 = vmatmul.mubr.msk.bf16.vlgmr.msra.gmra.mrb[156].mxu0 %vm1172_vm5, %v10830_v48  ;;  %8780 = vmatpush3.bf16.msra.mxu1 %v9244_v2 }
 0xeed   : > { %8793 = vmatprep.subr.bf16.mxu1 %v9992_v1  ;;  %8789 = vmatprep.mubr.msk.bf16.mxu0 %vm9993_vm4, %v9992_v1 }
 0xeee   : > { %8786 = vmatpush3.bf16.msra.mxu0 %v9245_v3 }
 0xeef   : > { %8782 = vmatmul.mubr.msk.bf16.vlgmr.msra.gmra.mrb[156].mxu1 %vm1172_vm5, %v10830_v48  ;;  %8787 = vmatprep.subr.bf16.mxu0 %v9992_v1 }
 0xef0   : > { %8797 = vmatprep.mubr.msk.bf16.mxu1 %vm9993_vm4, %v9992_v1  ;;  %8794 = vmatpush3.bf16.msra.mxu1 %v9246_v4 }
 0xef1   : > { %8795 = vmatprep.subr.bf16.mxu1 %v9992_v1 }
 0xef2   : > { %8788 = vmatpush3.bf16.msra.mxu0 %v9247_v5 }
 0xef3   : > { %8801 = vmatprep.subr.bf16.mxu0 %v9992_v1 }
 0xef4   : > { %8796 = vmatpush3.bf16.msra.mxu1 %v9248_v6  ;;  %v7901_v6 = vld [vmem:[#allocation19 + $0xe] ss:$0 sm:$0xff] }
 0xef5   : > { %8790 = vmatmul.mubr.msk.bf16.vlgmr.msra.gmra.mrb[160].mxu0 %vm1172_vm5, %v10830_v48  ;;  %8809 = vmatprep.subr.bf16.mxu1 %v9992_v1 }
 0xef6   : > { %8802 = vmatpush3.bf16.msra.mxu0 %v9249_v7  ;;  %8805 = vmatprep.mubr.msk.bf16.mxu0 %vm9993_vm4, %v9992_v1 }
 0xef7   : > { %8798 = vmatmul.mubr.msk.bf16.vlgmr.msra.gmra.mrb[160].mxu1 %vm1172_vm5, %v10830_v48  ;;  %8803 = vmatprep.subr.bf16.mxu0 %v9992_v1 }
 0xef8   : > { %8813 = vmatprep.mubr.msk.bf16.mxu1 %vm9993_vm4, %v9992_v1  ;;  %8810 = vmatpush3.bf16.msra.mxu1 %v9251_v60 }
 0xef9   : > { %8811 = vmatprep.subr.bf16.mxu1 %v9992_v1 }
 0xefa   : > { %8804 = vmatpush3.bf16.msra.mxu0 %v9250_v56  ;;  %v7884_v56 = vld [vmem:[#allocation16 + $0xd] ss:$0 sm:$0xff] }
 0xefb   : > { %8817 = vmatprep.subr.bf16.mxu0 %v9992_v1 }
 0xefc   : > { %8812 = vmatpush3.bf16.msra.mxu1 %v9252_v9 }
 0xefd   : > { %8806 = vmatmul.mubr.msk.bf16.vlgmr.msra.gmra.mrb[164].mxu0 %vm1172_vm5, %v10830_v48  ;;  %8823 = vmatprep.subr.bf16.mxu1 %v9992_v1 }
 0xefe   : > { %8819 = vmatprep.mubr.msk.bf16.mxu0 %vm9993_vm4, %v9992_v1 }
 0xeff   : > { %8814 = vmatmul.mubr.msk.bf16.vlgmr.msra.gmra.mrb[164].mxu1 %vm1172_vm5, %v10830_v48 }
 0xf00   : > { %8825 = vmatprep.mubr.msk.bf16.mxu1 %vm9993_vm4, %v9992_v1 }
 0xf97   : > { %v5433_v10 = vpop.f32.mrb[136].mxu0 }
 0xf98   : > { %v8701_v11 = vpop.f32.mrb[137].mxu0  ;;  %v5578_v18 = vsel %vm5577_vm3, %v5433_v10, 0.0 }
 0xf99   : > { %v5436_v15 = vpop.f32.mrb[138].mxu0 }
 0xf9a   : > { %v8702_v16 = vpop.f32.mrb[139].mxu0  ;;  %v5479_v17 = vpop.f32.mrb[136].mxu1  ;;  %v7902_v15 = vld [vmem:[#allocation19 + $0xf] ss:$0 sm:$0xff] }
 0xf9b   : > { %v5579_v19 = vsel %vm5577_vm3, %v5479_v17, 0.0  ;;  %v8707_v20 = vpop.f32.mrb[137].mxu1 }
 0xf9c   : > { %v5580_v21 = vadd.f32 %v5579_v19, %v5578_v18  ;;  %v5482_v22 = vpop.f32.mrb[138].mxu1 }
 0xf9d   : > { %v8708_v23 = vpop.f32.mrb[139].mxu1  ;;  %v7885_v22 = vld [vmem:[#allocation16 + $0xe] ss:$0 sm:$0xff] }
 0xf9f   : > { %v5525_v8 = vpop.f32.mrb[140].mxu0 }
 0xfa0   : > { %v5581_v48 = vsel %vm5577_vm3, %v5525_v8, 0.0  ;;  %v8713_v14 = vpop.f32.mrb[141].mxu0 }
 0xfa1   : > { %v5582_v24 = vadd.f32 %v5581_v48, %v5580_v21  ;;  %v5528_v25 = vpop.f32.mrb[142].mxu0 }
 0xfa2   : > { %v8714_v27 = vpop.f32.mrb[143].mxu0  ;;  %v5571_v28 = vpop.f32.mrb[140].mxu1 }
 0xfa3   : > { %v5583_v29 = vsel %vm5577_vm3, %v5571_v28, 0.0  ;;  %v8719_v30 = vpop.f32.mrb[141].mxu1 }
 0xfa4   : > { %v11349_v31 = vadd.f32 %v5583_v29, %v5582_v24  ;;  %v5574_v32 = vpop.f32.mrb[142].mxu1  ;;  %v7886_v29 = vld [vmem:[#allocation16 + $0xf] ss:$0 sm:$0xff] }
 0xfa5   : > { %v8720_v13 = vpop.f32.mrb[143].mxu1 }
 0xfa7   : > { %v5690_v12 = vpop.f32.mrb[144].mxu0 }
 0xfa8   : > { %v8727_v33 = vpop.f32.mrb[145].mxu0  ;;  %v5691_v7 = vadd.f32 %v7883_v62, %v5690_v12 }
 0xfa9   : > { %v5693_v34 = vpop.f32.mrb[146].mxu0  ;;  %v7915_v33 = vld [vmem:[#allocation22 + $0xc] ss:$0 sm:$0xff] }
 0xfaa   : > { %v8728_v35 = vpop.f32.mrb[147].mxu0  ;;  %v5742_v36 = vpop.f32.mrb[144].mxu1  ;;  %v6360_v18 = vpack.c.bf16 %v5691_v7, %v5691_v7 }
 0xfab   : > { %v8735_v38 = vpop.f32.mrb[145].mxu1  ;;  %v5743_v16 = vadd.f32 %v7884_v56, %v5742_v36  ;;  %v7916_v35 = vld [vmem:[#allocation22 + $0xd] ss:$0 sm:$0xff] }
 0xfac   : > { %v5745_v39 = vpop.f32.mrb[146].mxu1 }
 0xfad   : > { %v8736_v41 = vpop.f32.mrb[147].mxu1  ;;  %v6361_v24 = vpack.c.bf16 %v5743_v16, %v5743_v16 }
 0xfaf   : > { %v5794_v42 = vpop.f32.mrb[148].mxu0 }
 0xfb0   : > { %v8743_v43 = vpop.f32.mrb[149].mxu0  ;;  %v5795_v28 = vadd.f32 %v7885_v22, %v5794_v42 }
 0xfb1   : > { %v5797_v44 = vpop.f32.mrb[150].mxu0 }
 0xfb2   : > { %v8744_v45 = vpop.f32.mrb[151].mxu0  ;;  %v5846_v46 = vpop.f32.mrb[148].mxu1  ;;  %v6362_v13 = vpack.c.bf16 %v5795_v28, %v5795_v28 }
 0xfb3   : > { %v8751_v47 = vpop.f32.mrb[149].mxu1  ;;  %v5847_v32 = vadd.f32 %v7886_v29, %v5846_v46 }
 0xfb4   : > { %v5849_v49 = vpop.f32.mrb[150].mxu1 }
 0xfb5   : > { %v8752_v50 = vpop.f32.mrb[151].mxu1  ;;  %v6363_v12 = vpack.c.bf16 %v5847_v32, %v5847_v32 }
 0xfb7   : > { %v5944_v53 = vpop.f32.mrb[152].mxu0 }
 0xfb8   : > { %v5945_v54 = vadd.f32 %v7899_v51, %v5944_v53  ;;  %v8759_v52 = vpop.f32.mrb[153].mxu0 }
 0xfb9   : > { %v5947_v57 = vpop.f32.mrb[154].mxu0 }
 0xfba   : > { %v6364_v58 = vpack.c.bf16 %v5945_v54, %v5945_v54  ;;  %v8760_v59 = vpop.f32.mrb[155].mxu0  ;;  %v5996_v61 = vpop.f32.mrb[152].mxu1 }
 0xfbb   : > { %v5997_v63 = vadd.f32 %v7900_v55, %v5996_v61  ;;  %v8767_v0 = vpop.f32.mrb[153].mxu1 }
 0xfbc   : > { %v6372_v2 = vsel %vm2110_vm12, %v6364_v58, 0  ;;  %v5999_v3 = vpop.f32.mrb[154].mxu1 }
 0xfbd   : > { %v6365_v4 = vpack.c.bf16 %v5997_v63, %v5997_v63  ;;  %8818 = vmatpush3.bf16.xpose.msra.mxu0 %v6372_v2  ;;  %v8768_v5 = vpop.f32.mrb[155].mxu1 }
 0xfbe   : > { %8829 = vmatprep.subr.bf16.mxu0 %v9992_v1 }
 0xfbf   : > { %v6418_v60 = vsel %vm2110_vm12, %v6365_v4, 0  ;;  %v6048_v9 = vpop.f32.mrb[156].mxu0 }
 0xfc0   : > { %v6049_v10 = vadd.f32 %v7901_v6, %v6048_v9  ;;  %v8775_v11 = vpop.f32.mrb[157].mxu0  ;;  %8824 = vmatpush3.bf16.xpose.msra.mxu1 %v6418_v60 }
 0xfc1   : > { %v6051_v17 = vpop.f32.mrb[158].mxu0  ;;  %8835 = vmatprep.subr.bf16.mxu1 %v9992_v1 }
 0xfc2   : > { %v6366_v19 = vpack.c.bf16 %v6049_v10, %v6049_v10  ;;  %v8776_v20 = vpop.f32.mrb[159].mxu0  ;;  %v6100_v21 = vpop.f32.mrb[156].mxu1 }
 0xfc3   : > { %v6101_v23 = vadd.f32 %v7902_v15, %v6100_v21  ;;  %v8783_v8 = vpop.f32.mrb[157].mxu1 }
 0xfc4   : > { %v6464_v48 = vsel %vm2110_vm12, %v6366_v19, 0  ;;  %8820 = vmatmul.mubr.msk.bf16.vlgmr.msra.gmra.mrb[168].mxu0 %vm2110_vm12, %v6360_v18  ;;  %v6103_v14 = vpop.f32.mrb[158].mxu1 }
 0xfc5   : > { %v6367_v25 = vpack.c.bf16 %v6101_v23, %v6101_v23  ;;  %8830 = vmatpush3.bf16.xpose.msra.mxu0 %v6464_v48  ;;  %v8784_v27 = vpop.f32.mrb[159].mxu1  ;;  %8831 = vmatprep.mubr.msk.bf16.mxu0 %vm9993_vm4, %v9992_v1 }
 0xfc6   : > { %8841 = vmatprep.subr.bf16.mxu0 %v9992_v1 }
 0xfc7   : > { %v6510_v30 = vsel %vm2110_vm12, %v6367_v25, 0  ;;  %8826 = vmatmul.mubr.msk.bf16.vlgmr.msra.gmra.mrb[168].mxu1 %vm2110_vm12, %v6361_v24 }
 0xfc8   : > { %8836 = vmatpush3.bf16.xpose.msra.mxu1 %v6510_v30  ;;  %8837 = vmatprep.mubr.msk.bf16.mxu1 %vm9993_vm4, %v9992_v1  ;;  %v6198_v34 = vpop.f32.mrb[160].mxu0 }
 0xfc9   : > { %8847 = vmatprep.subr.bf16.mxu1 %v9992_v1  ;;  %v6199_v36 = vadd.f32 %v7915_v33, %v6198_v34  ;;  %v8791_v38 = vpop.f32.mrb[161].mxu0 }
 0xfca   : > { %v6201_v39 = vpop.f32.mrb[162].mxu0  ;;  %v6250_v41 = vpop.f32.mrb[160].mxu1 }
 0xfcb   : > { %v6608_v42 = vpack.c.bf16 %v6199_v36, %v6199_v36  ;;  %v6251_v43 = vadd.f32 %v7916_v35, %v6250_v41  ;;  %v8792_v44 = vpop.f32.mrb[163].mxu0  ;;  %v8799_v45 = vpop.f32.mrb[161].mxu1 }
 0xfcc   : > { %8832 = vmatmul.mubr.msk.bf16.vlgmr.msra.gmra.mrb[172].mxu0 %vm2110_vm12, %v6362_v13  ;;  %v6253_v46 = vpop.f32.mrb[162].mxu1 }
 0xfcd   : > { %8843 = vmatprep.mubr.msk.bf16.mxu0 %vm9993_vm4, %v9992_v1  ;;  %v6616_v47 = vsel %vm2365_vm13, %v6608_v42, 0  ;;  %v6609_v49 = vpack.c.bf16 %v6251_v43, %v6251_v43  ;;  %v8800_v50 = vpop.f32.mrb[163].mxu1 }
 0xfce   : > { %8842 = vmatpush3.bf16.msra.mxu0 %v6616_v47  ;;  %v7917_v50 = vld [vmem:[#allocation22 + $0xe] ss:$0 sm:$0xff] }
 0xfcf   : > { %8838 = vmatmul.mubr.msk.bf16.vlgmr.msra.gmra.mrb[172].mxu1 %vm2110_vm12, %v6363_v12  ;;  %v6662_v51 = vsel %vm2365_vm13, %v6609_v49, 0  ;;  %8853 = vmatprep.subr.bf16.mxu0 %v9992_v1 }
 0xfd0   : > { %8849 = vmatprep.mubr.msk.bf16.mxu1 %vm9993_vm4, %v9992_v1  ;;  %8848 = vmatpush3.bf16.msra.mxu1 %v6662_v51  ;;  %v11374_v53 = vpop.f32.mrb[164].mxu0 }
 0xfd1   : > { %v8807_v54 = vpop.f32.mrb[165].mxu0  ;;  %8859 = vmatprep.subr.bf16.mxu1 %v9992_v1  ;;  %v6303_v51 = vadd.f32 %v7917_v50, %v11374_v53 }
 0xfd2   : > { %v6305_v52 = vpop.f32.mrb[166].mxu0  ;;  %v11377_v57 = vpop.f32.mrb[164].mxu1  ;;  %v7918_v54 = vld [vmem:[#allocation22 + $0xf] ss:$0 sm:$0xff] }
 0xfd3   : > { %v8808_v55 = vpop.f32.mrb[167].mxu0  ;;  %v8815_v58 = vpop.f32.mrb[165].mxu1 }
 0xfd4   : > { %v6357_v59 = vpop.f32.mrb[166].mxu1  ;;  %v6355_v58 = vadd.f32 %v7918_v54, %v11377_v57 }
 0xfd5   : > { %v8816_v61 = vpop.f32.mrb[167].mxu1 }
 0xfd6   : > { %v6610_v61 = vpack.c.bf16 %v6303_v51, %v6303_v51 }
0x1097   : > { %v6408_v62 = vpop.f32.mrb[168].mxu0 }
0x1098   : > { %v6552_v63 = vmul.f32 0.35355338, %v6408_v62  ;;  %v8821_v0 = vpop.f32.mrb[169].mxu0 }
0x1099   : > { %v6411_v2 = vpop.f32.mrb[170].mxu0 }
0x109a   : > { %v8822_v3 = vpop.f32.mrb[171].mxu0  ;;  %v6454_v4 = vpop.f32.mrb[168].mxu1  ;;  %v6556_v5 = vadd.f32 %v6552_v63, %v10908_v26  ;;  %v6611_v2 = vpack.c.bf16 %v6355_v58, %v6355_v58 }
0x109b   : > { %v6553_v6 = vmul.f32 0.35355338, %v6454_v4  ;;  %v8827_v7 = vpop.f32.mrb[169].mxu1  ;;  %v6708_v4 = vsel %vm2365_vm13, %v6610_v61, 0 }
0x109c   : > { %v6457_v56 = vpop.f32.mrb[170].mxu1  ;;  %v6560_v60 = vsel %vm5147_vm2, %v6556_v5, -inf }
0x109d   : > { %6561 = vmax.xlane.f32.xlu1 %v6560_v60  ;;  %v8828_v9 = vpop.f32.mrb[171].mxu1  ;;  %v6557_v10 = vadd.f32 %v6553_v6, %v10908_v26  ;;  %v6801_v6 = vld [vmem:[#allocation23 + $0x30] sm:$0xf] }
0x109e   : > { %v6809_v9 = vsel %vm2365_vm13, %v6801_v6, 0 }
0x109f   : > { %v6500_v11 = vpop.f32.mrb[172].mxu0  ;;  %v6563_v15 = vsel %vm5147_vm2, %v6557_v10, -inf }
0x10a0   : > { %v6554_v16 = vmul.f32 0.35355338, %v6500_v11  ;;  %v8833_v17 = vpop.f32.mrb[173].mxu0  ;;  %6564 = vmax.xlane.f32.xlu0 %v6563_v15  ;;  %v6802_v15 = vld [vmem:[#allocation23 + $0x34] sm:$0xf] }
0x10a1   : > { %v6503_v18 = vpop.f32.mrb[174].mxu0  ;;  %v6803_v17 = vld [vmem:[#allocation23 + $0x38] sm:$0xf] }
0x10a2   : > { %v8834_v19 = vpop.f32.mrb[175].mxu0  ;;  %v6546_v20 = vpop.f32.mrb[172].mxu1  ;;  %v6558_v21 = vadd.f32 %v6554_v16, %v10908_v26  ;;  %v6855_v16 = vsel %vm2365_vm13, %v6802_v15, 0 }
0x10a3   : > { %v6555_v22 = vmul.f32 0.35355338, %v6546_v20  ;;  %v8839_v23 = vpop.f32.mrb[173].mxu1 }
0x10a4   : > { %v6549_v8 = vpop.f32.mrb[174].mxu1  ;;  %v6566_v48 = vsel %vm5147_vm2, %v6558_v21, -inf }
0x10a5   : > { %6567 = vmax.xlane.f32.xlu1 %v6566_v48  ;;  %v8840_v14 = vpop.f32.mrb[175].mxu1  ;;  %v6559_v24 = vadd.f32 %v6555_v22, %v10908_v26  ;;  %v6804_v22 = vld [vmem:[#allocation23 + $0x3c] sm:$0xf] }
0x10a7   : > { %v6569_v25 = vsel %vm5147_vm2, %v6559_v24, -inf }
0x10a8   : > { %6570 = vmax.xlane.f32.xlu0 %v6569_v25  ;;  %v6947_v25 = vsel %vm2365_vm13, %v6804_v22, 0 }
0x112a   : > { %v6562_v27 = vpop.xlane.xlu1 %6561 }
0x112b   : > { %v6572_v28 = vsub.f32 %v6556_v5, %v6562_v27  ;;  %v6754_v5 = vsel %vm2365_vm13, %v6611_v2, 0 }
0x112d   : > { %v6576_v29 = vmul.f32 1.442695, %v6572_v28  ;;  %v6565_v30 = vpop.xlane.xlu0 %6564 }
0x112e   : > { %v6573_v32 = vsub.f32 %v6557_v10, %v6565_v30 }
0x112f   : > { %9317 = vpow2.f32 %v6576_v29 }
0x1130   : > { %v6578_v13 = vmul.f32 1.442695, %v6573_v32 }
0x1132   : > { %9319 = vpow2.f32 %v6578_v13  ;;  %v6568_v12 = vpop.xlane.xlu1 %6567 }
0x1133   : > { %v6574_v33 = vsub.f32 %v6558_v21, %v6568_v12  ;;  %v6901_v21 = vsel %vm2365_vm13, %v6803_v17, 0 }
0x1135   : > { %v6580_v34 = vmul.f32 1.442695, %v6574_v33  ;;  %v6571_v35 = vpop.xlane.xlu0 %6570 }
0x1136   : > { %v6575_v36 = vsub.f32 %v6559_v24, %v6571_v35 }
0x1137   : > { %9321 = vpow2.f32 %v6580_v34 }
0x1138   : > { %v6582_v38 = vmul.f32 1.442695, %v6575_v36 }
0x1139   : > { %v9318_v39 = vpop.eup %9317 }
0x113a   : > { %9323 = vpow2.f32 %v6582_v38  ;;  %v6584_v26 = vsel %vm5147_vm2, %v9318_v39, 0.0 }
0x113b   : > { %6585 = vadd.xlane.f32.xlu1 %v6584_v26  ;;  %v9254_v26 = vld [vmem:[#allocation26 + $0x8] sm:$0xff]  }
0x113c   : > { %v9320_v41 = vpop.eup %9319 }
0x113d   : > { %v6587_v42 = vsel %vm5147_vm2, %v9320_v41, 0.0 }
0x113e   : > { %6588 = vadd.xlane.f32.xlu0 %v6587_v42 }
0x1141   : > { %v9322_v43 = vpop.eup %9321 }
0x1142   : > { %v6590_v44 = vsel %vm5147_vm2, %v9322_v43, 0.0 }
0x1143   : > { %6591 = vadd.xlane.f32.xlu1 %v6590_v44 }
0x1144   : > { %v9324_v45 = vpop.eup %9323 }
0x1145   : > { %v6593_v46 = vsel %vm5147_vm2, %v9324_v45, 0.0 }
0x1146   : > { %6594 = vadd.xlane.f32.xlu0 %v6593_v46 }
0x11c8   : > { %v6586_v47 = vpop.xlane.xlu1 %6585 }
0x11c9   : > { %9325 = vrcp.f32 %v6586_v47 }
0x11cb   : > { %v6589_v49 = vpop.xlane.xlu0 %6588 }
0x11cc   : > { %9327 = vrcp.f32 %v6589_v49 }
0x11d0   : > { %v6592_v52 = vpop.xlane.xlu1 %6591 }
0x11d1   : > { %9329 = vrcp.f32 %v6592_v52 }
0x11d3   : > { %v9326_v55 = vpop.eup %9325  ;;  %v6595_v59 = vpop.xlane.xlu0 %6594 }
0x11d4   : > { %v6600_v62 = vmul.f32 %v9326_v55, %v9318_v39  ;;  %9331 = vrcp.f32 %v6595_v59  ;;  %v9253_v39 = vld [vmem:[#allocation26] sm:$0xff]  }
0x11d6   : > { %v9328_v63 = vpop.eup %9327  ;;  %v6604_v0 = vpack.c.bf16 %v6600_v62, %v6600_v62 }
0x11d7   : > { %v6601_v3 = vmul.f32 %v9328_v63, %v9320_v41 }
0x11d8   : > { %8844 = vmatmul.mubr.msk.bf16.vlgmr.msra.gmra.mrb[176].mxu0 %vm2110_vm12, %v6604_v0  ;;  %v7943_v0 = vld [vmem:[#allocation25 + $0x3] ss:$0 sm:$0xff] }
0x11d9   : > { %8854 = vmatpush3.bf16.msra.mxu0 %v6708_v4  ;;  %v6605_v53 = vpack.c.bf16 %v6601_v3, %v6601_v3  ;;  %8855 = vmatprep.mubr.msk.bf16.mxu0 %vm9993_vm4, %v9992_v1 }
0x11da   : > { %8865 = vmatprep.subr.bf16.mxu0 %v9992_v1 }
0x11db   : > { %v9330_v57 = vpop.eup %9329  ;;  %8850 = vmatmul.mubr.msk.bf16.vlgmr.msra.gmra.mrb[176].mxu1 %vm2110_vm12, %v6605_v53  ;;  %v7882_v53 = vld [vmem:[#allocation25 + $0x2] ss:$0 sm:$0xff] }
0x11dc   : > { %v6602_v7 = vmul.f32 %v9330_v57, %v9322_v43  ;;  %8860 = vmatpush3.bf16.msra.mxu1 %v6754_v5  ;;  %8861 = vmatprep.mubr.msk.bf16.mxu1 %vm9993_vm4, %v9992_v1  ;;  %v5593_v6 = vadd.f32 %v7882_v53, %v11349_v31 }
0x11dd   : > { %8871 = vmatprep.subr.bf16.mxu1 %v9992_v1 }
0x11de   : > { %v9332_v56 = vpop.eup %9331  ;;  %v6606_v60 = vpack.c.bf16 %v6602_v7, %v6602_v7 }
0x11df   : > { %v6603_v10 = vmul.f32 %v9332_v56, %v9324_v45 }
0x11e0   : > { %8856 = vmatmul.mubr.msk.bf16.vlgmr.msra.gmra.mrb[180].mxu0 %vm2110_vm12, %v6606_v60 }
0x11e1   : > { %v6607_v11 = vpack.c.bf16 %v6603_v10, %v6603_v10  ;;  %8866 = vmatpush3.bf16.msra.mxu0 %v6809_v9  ;;  %8867 = vmatprep.mubr.msk.bf16.mxu0 %vm9993_vm4, %v9992_v1  ;;  %v7015_v9 = vpack.c.bf16 %v11193_v37, %v11193_v37 }
0x11e2   : > { %8877 = vmatprep.subr.bf16.mxu0 %v9992_v1 }
0x11e3   : > { %8862 = vmatmul.mubr.msk.bf16.vlgmr.msra.gmra.mrb[180].mxu1 %vm2110_vm12, %v6607_v11 }
0x11e4   : > { %8873 = vmatprep.mubr.msk.bf16.mxu1 %vm9993_vm4, %v9992_v1  ;;  %8872 = vmatpush3.bf16.msra.mxu1 %v6855_v16 }
0x11e5   : > { %8883 = vmatprep.subr.bf16.mxu1 %v9992_v1 }
0x12ab   : > { %v6652_v18 = vpop.f32.mrb[176].mxu0 }
0x12ac   : > { %v6796_v19 = vpack.c.bf16 %v6652_v18, %v6652_v18  ;;  %v8845_v20 = vpop.f32.mrb[177].mxu0 }
0x12ad   : > { %v6655_v23 = vpop.f32.mrb[178].mxu0 }
0x12ae   : > { %v8846_v8 = vpop.f32.mrb[179].mxu0  ;;  %8868 = vmatmul.mubr.msk.bf16.vlgmr.msra.gmra.mrb[184].mxu0 %vm2110_vm12, %v6796_v19  ;;  %v6698_v48 = vpop.f32.mrb[176].mxu1 }
0x12af   : > { %v6797_v14 = vpack.c.bf16 %v6698_v48, %v6698_v48  ;;  %v8851_v24 = vpop.f32.mrb[177].mxu1  ;;  %8878 = vmatpush3.bf16.msra.mxu0 %v6901_v21  ;;  %8879 = vmatprep.mubr.msk.bf16.mxu0 %vm9993_vm4, %v9992_v1 }
0x12b0   : > { %v6701_v27 = vpop.f32.mrb[178].mxu1  ;;  %8889 = vmatprep.subr.bf16.mxu0 %v9253_v39 }
0x12b1   : > { %v8852_v28 = vpop.f32.mrb[179].mxu1  ;;  %8874 = vmatmul.mubr.msk.bf16.vlgmr.msra.gmra.mrb[184].mxu1 %vm2110_vm12, %v6797_v14 }
0x12b2   : > { %8884 = vmatpush3.bf16.msra.mxu1 %v6947_v25  ;;  %8885 = vmatprep.mubr.msk.bf16.mxu1 %vm9993_vm4, %v9992_v1  ;;  %vm7188_vm4 = vcmask 1041408  }
0x12b3   : > { %v6744_v29 = vpop.f32.mrb[180].mxu0  ;;  %v7189_v31 = vsel %vm7188_vm4, %v7015_v9, 0 }
0x12b4   : > { %v6798_v30 = vpack.c.bf16 %v6744_v29, %v6744_v29  ;;  %v8857_v32 = vpop.f32.mrb[181].mxu0 }
0x12b5   : > { %v6747_v13 = vpop.f32.mrb[182].mxu0 }
0x12b6   : > { %v8858_v12 = vpop.f32.mrb[183].mxu0  ;;  %8880 = vmatmul.mubr.msk.bf16.vlgmr.msra.gmra.mrb[188].mxu0 %vm2110_vm12, %v6798_v30  ;;  %v6790_v33 = vpop.f32.mrb[180].mxu1 }
0x12b7   : > { %v6799_v34 = vpack.c.bf16 %v6790_v33, %v6790_v33  ;;  %v8863_v35 = vpop.f32.mrb[181].mxu1  ;;  %8890 = vmatpush3.bf16.msra.mxu0 %v9253_v39 }
0x12b8   : > { %v6793_v36 = vpop.f32.mrb[182].mxu1  ;;  %8891 = vmatprep.subr.bf16.mxu0 %v9254_v26 }
0x12b9   : > { %v8864_v38 = vpop.f32.mrb[183].mxu1  ;;  %8886 = vmatmul.mubr.msk.bf16.vlgmr.msra.gmra.mrb[188].mxu1 %vm2110_vm12, %v6799_v34 }
0x12bb   : > { %8892 = vmatpush3.bf16.msra.mxu0 %v9254_v26 }
0x1381   : > { %v6845_v1 = vpop.f32.mrb[184].mxu0 }
0x1382   : > { %v8869_v41 = vpop.f32.mrb[185].mxu0  ;;  %v6989_v45 = vsel %vm5577_vm3, %v6845_v1, 0.0 }
0x1383   : > { %v6848_v42 = vpop.f32.mrb[186].mxu0  ;;  %v9255_v41 = vld [vmem:[#allocation28] sm:$0xff]  }
0x1384   : > { %v8870_v43 = vpop.f32.mrb[187].mxu0  ;;  %v6891_v44 = vpop.f32.mrb[184].mxu1 }
0x1385   : > { %v6990_v46 = vsel %vm5577_vm3, %v6891_v44, 0.0  ;;  %v8875_v47 = vpop.f32.mrb[185].mxu1 }
0x1386   : > { %v6991_v49 = vadd.f32 %v6990_v46, %v6989_v45  ;;  %v6894_v50 = vpop.f32.mrb[186].mxu1 }
0x1387   : > { %v8876_v51 = vpop.f32.mrb[187].mxu1 }
0x1389   : > { %v6937_v54 = vpop.f32.mrb[188].mxu0 }
0x138a   : > { %v6992_v52 = vsel %vm5577_vm3, %v6937_v54, 0.0  ;;  %v8881_v55 = vpop.f32.mrb[189].mxu0 }
0x138b   : > { %v6993_v58 = vadd.f32 %v6992_v52, %v6991_v49  ;;  %v6940_v59 = vpop.f32.mrb[190].mxu0  ;;  %v9256_v55 = vld [vmem:[#allocation28 + $0x8] sm:$0xff]  }
0x138c   : > { %v8882_v61 = vpop.f32.mrb[191].mxu0  ;;  %v6983_v62 = vpop.f32.mrb[188].mxu1 }
0x138d   : > { %v6994_v63 = vsel %vm5577_vm3, %v6983_v62, 0.0  ;;  %v8887_v2 = vpop.f32.mrb[189].mxu1 }
0x138e   : > { %v6995_v3 = vadd.f32 %v6994_v63, %v6993_v58  ;;  %v6986_v4 = vpop.f32.mrb[190].mxu1  ;;  %v7952_v2 = vld [vmem:[#allocation29] ss:$0 sm:$0xff] }
0x138f   : > { %v8888_v57 = vpop.f32.mrb[191].mxu1 }
0x1390   : > { %v7004_v5 = vadd.f32 %v7943_v0, %v6995_v3 }
0x1392   : > { %v7006_v7 = vrot.slane %v7004_v5, 4 }
0x1394   : > { %v7011_v56 = vsel %vm2365_vm13, %v5593_v6, %v7006_v7 }
0x1395   : > { %v7014_v60 = vpack.c.bf16 %v11196_v40, %v7011_v56  ;;  %v7036_v40 = vsel %vm1172_vm5, %v7015_v9, 0 }
0x1397   : > { %8893 = vmatprep.mubr.msk.bf16.mxu0 %vm1172_vm5, %v7014_v60  ;;  %8921 = vmatprep.subr.msk.bf16.mxu1 %vm1172_vm5, %v7014_v60  ;;  %v7033_v10 = vsel %vm1172_vm5, %v7014_v60, 0 }
0x1398   : > { %8905 = vmatprep.subr.bf16.mxu0 %v7014_v60  ;;  %8894 = vmatmul.mubr.msk.bf16.vlgmr.msra.gmra.mrb[192].mxu0 %vm1172_vm5, %v7015_v9 }
0x1399   : > { %8898 = vmatpush3.bf16.xpose.msra.mxu1 %v7033_v10  ;;  %8906 = vmatpush3.bf16.msra.mxu0 %v7014_v60 }
0x139a   : > { %8922 = vmatprep.subr.msk.bf16.mxu1 %vm1172_vm5, %v7015_v9  ;;  %8923 = vmatprep.subr.msk.bf16.mxu0 %vm7188_vm4, %v7015_v9 }
0x139d   : > { %8908 = vmatpush3.bf16.msra.mxu0 %v7189_v31 }
0x139e   : > { %8913 = vmatprep.subr.bf16.mxu0 %v9255_v41 }
0x13a1   : > { %8900 = vmatpush3.bf16.xpose.msra.mxu1 %v7036_v40 }
0x146b   : > { %v8895_v37 = vpop.f32.mrb[192].mxu0 }
0x146c   : > { %v7072_v11 = vpop.f32.mrb[193].mxu0  ;;  %v7087_v18 = vpack.c.bf16 %v8895_v37, %v8895_v37 }
0x146d   : > { %v8896_v15 = vpop.f32.mrb[194].mxu0 }
0x146e   : > { %v7075_v16 = vpop.f32.mrb[195].mxu0 }
0x146f   : > { %v7086_v17 = vpack.c.bf16 %v7075_v16, %v7072_v11 }
0x1471   : > { %8901 = vmatprep.mubr.msk.bf16.mxu1 %vm1172_vm5, %v7086_v17 }
0x1472   : > { %8902 = vmatmul.mubr.msk.bf16.vlgmr.msra.gmra.mrb[192].mxu1 %vm1172_vm5, %v7087_v18 }
0x1545   : > { %v8903_v19 = vpop.f32.mrb[192].mxu1 }
0x1546   : > { %v7128_v20 = vpop.f32.mrb[193].mxu1  ;;  %v7144_v8 = vmul.f32 0.17677669, %v8903_v19 }
0x1547   : > { %v7142_v21 = vmul.f32 0.17677669, %v7128_v20  ;;  %v8904_v22 = vpop.f32.mrb[194].mxu1 }
0x1548   : > { %v7131_v23 = vpop.f32.mrb[195].mxu1  ;;  %v7153_v25 = vsel %vm7152_vm7, %v7144_v8, -inf }
0x1549   : > { %v7143_v48 = vmul.f32 0.17677669, %v7131_v23  ;;  %v7146_v14 = vsel %vm7145_vm6, %v7142_v21, -inf }
0x154a   : > { %7147 = vmax.xlane.f32.xlu1 %v7146_v14 }
0x154b   : > { %v7149_v24 = vsel %vm7145_vm6, %v7143_v48, -inf }
0x154c   : > { %7150 = vmax.xlane.f32.xlu0 %v7149_v24 }
0x154e   : > { %7154 = vmax.xlane.f32.xlu1 %v7153_v25 }
0x15d7   : > { %v7148_v27 = vpop.xlane.xlu1 %7147 }
0x15d8   : > { %v7156_v28 = vsub.f32 %v7142_v21, %v7148_v27 }
0x15d9   : > { %v7151_v29 = vpop.xlane.xlu0 %7150 }
0x15da   : > { %v7159_v30 = vmul.f32 1.442695, %v7156_v28  ;;  %v7157_v32 = vsub.f32 %v7143_v48, %v7151_v29 }
0x15db   : > { %v7155_v13 = vpop.xlane.xlu1 %7154 }
0x15dc   : > { %9333 = vpow2.f32 %v7159_v30  ;;  %v7161_v12 = vmul.f32 1.442695, %v7157_v32  ;;  %v7158_v33 = vsub.f32 %v7144_v8, %v7155_v13 }
0x15de   : > { %9335 = vpow2.f32 %v7161_v12  ;;  %v7163_v34 = vmul.f32 1.442695, %v7158_v33 }
0x15e0   : > { %9337 = vpow2.f32 %v7163_v34 }
0x15e6   : > { %v9334_v35 = vpop.eup %9333 }
0x15e7   : > { %v7165_v36 = vsel %vm7145_vm6, %v9334_v35, 0.0 }
0x15e8   : > { %v9336_v38 = vpop.eup %9335  ;;  %7166 = vadd.xlane.f32.xlu0 %v7165_v36 }
0x15e9   : > { %v7168_v39 = vsel %vm7145_vm6, %v9336_v38, 0.0 }
0x15ea   : > { %v9338_v26 = vpop.eup %9337  ;;  %7169 = vadd.xlane.f32.xlu1 %v7168_v39 }
0x15eb   : > { %v7171_v1 = vsel %vm7152_vm7, %v9338_v26, 0.0 }
0x15ec   : > { %7172 = vadd.xlane.f32.xlu0 %v7171_v1 }
0x1675   : > { %v7167_v42 = vpop.xlane.xlu0 %7166 }
0x1676   : > { %9339 = vrcp.f32 %v7167_v42 }
0x1677   : > { %v7170_v43 = vpop.xlane.xlu1 %7169 }
0x1678   : > { %9341 = vrcp.f32 %v7170_v43 }
0x1679   : > { %v7173_v44 = vpop.xlane.xlu0 %7172 }
0x167a   : > { %9343 = vrcp.f32 %v7173_v44 }
0x1680   : > { %v9340_v45 = vpop.eup %9339 }
0x1681   : > { %v7177_v47 = vmul.f32 %v9340_v45, %v9334_v35 }
0x1682   : > { %v9342_v46 = vpop.eup %9341 }
0x1683   : > { %v7178_v49 = vmul.f32 %v9342_v46, %v9336_v38 }
0x1684   : > { %v9344_v50 = vpop.eup %9343 }
0x1685   : > { %v7179_v51 = vmul.f32 %v9344_v50, %v9338_v26  ;;  %v7180_v54 = vpack.c.bf16 %v7178_v49, %v7177_v47 }
0x1687   : > { %v7181_v52 = vpack.c.bf16 %v7179_v51, %v7179_v51  ;;  %8909 = vmatprep.mubr.msk.bf16.mxu0 %vm7145_vm6, %v7180_v54 }
0x1689   : > { %8910 = vmatmul.mubr.msk.bf16.vlgmr.msra.gmra.mrb[196].mxu0 %vm7145_vm6, %v7181_v52 }
0x168a   : > { %8914 = vmatpush3.bf16.msra.mxu0 %v9255_v41 }
0x168b   : > { %8915 = vmatprep.subr.bf16.mxu0 %v9256_v55 }
0x168e   : > { %8916 = vmatpush3.bf16.msra.mxu0 %v9256_v55 }
0x175c   : > { %v8911_v58 = vpop.f32.mrb[196].mxu0 }
0x175d   : > { %v7225_v59 = vpop.f32.mrb[197].mxu0  ;;  %v7240_v0 = vpack.c.bf16 %v8911_v58, %v8911_v58 }
0x175e   : > { %v8912_v61 = vpop.f32.mrb[198].mxu0 }
0x175f   : > { %v7228_v62 = vpop.f32.mrb[199].mxu0 }
0x1760   : > { %v7239_v63 = vpack.c.bf16 %v7228_v62, %v7225_v59 }
0x1762   : > { %8917 = vmatprep.mubr.msk.bf16.mxu0 %vm1172_vm5, %v7239_v63 }
0x1763   : > { %8918 = vmatmul.mubr.msk.bf16.vlgmr.msra.gmra.mrb[200].mxu0 %vm1172_vm5, %v7240_v0 }
0x1836   : > { %v8919_v3 = vpop.f32.mrb[200].mxu0 }
0x1837   : > { %v7304_v4 = vpop.f32.mrb[201].mxu0  ;;  %v7313_v53 = vadd.f32 %v8919_v3, %v7952_v2 }
0x1838   : > { %v7305_v57 = vadd.f32 %v7952_v2, %v7304_v4  ;;  %v8920_v5 = vpop.f32.mrb[202].mxu0 }
0x1839   : > { %v7307_v6 = vpop.f32.mrb[203].mxu0  ;;  %v7320_v60 = vmax.f32 %v7313_v53, 0.0 }
0x183a   : > { %v7318_v7 = vmax.f32 %v7305_v57, 0.0  ;;  %v7308_v56 = vadd.f32 %v7952_v2, %v7307_v6 }
0x183b   : > { %v7324_v37 = vsel %vm5577_vm3, %v7320_v60, 0.0 }
0x183c   : > { %v7319_v9 = vmax.f32 %v7308_v56, 0.0  ;;  %v7321_v10 = vsel %vm1172_vm5, %v7318_v7, 0.0 }
0x183e   : > { %v7322_v31 = vsel %vm1172_vm5, %v7319_v9, 0.0 }
0x183f   : > { %v7323_v40 = vadd.f32 %v7322_v31, %v7321_v10 }
0x1841   : > { %v7325_v11 = vadd.f32 %v7324_v37, %v7323_v40 }
0x1843   : > { %v7326_v15 = vrot.slane %v7325_v11, 4 }
0x1845   : > { %v7327_v16 = vadd.f32 %v7326_v15, %v7325_v11 }
0x1847   : > { %v7328_v17 = vrot.slane %v7327_v16, 2 }
0x1849   : > { %v7329_v18 = vadd.f32 %v7328_v17, %v7327_v16 }
0x184b   : > { %v7330_v19 = vrot.slane %v7329_v18, 1 }
0x184d   : > { %v7331_v20 = vadd.f32 %v7330_v19, %v7329_v18 }
0x184f   : > { %v7333_v21 = vmul.f32 0.05, %v7331_v20 }
0x1851   : > { %7335 = vst.msk [vmem:[%s966_s6] sm:$0x1] %vm7334_vm8, %v7333_v21 }
0x1852   : > { %9876 = shalt.err (!%p9873_p9)
}
0x1853   : > { %s9877_s15 = scalar_lea.hbm %s11458_s22, 16  ;;  %s9881_s18 = scalar_lea.hbm %s11646_s5, 32 }
0x1854   : > { %p9878_p11 = scmp.ne.s32.totalorder %s11458_s22, %s9877_s15  ;;  %p9882_p0 = scmp.lt.u32.totalorder %s11458_s22, %s11646_s5 }
0x1855   : > { %p9883_p5 = scmp.lt.u32.totalorder %s9881_s18, %s9877_s15  ;;  %p9885_p13 = scmp.lt.u32.totalorder %s9877_s15, %s11458_s22 }
0x1856   : > { %p9879_p1 = pnand %p9878_p11, %p11647_p3 }
0x1857   : > { %p9884_p10 = por %p9883_p5, %p9882_p0 }
0x1858   : > { %p9880_p2 = pneg %p9879_p1 }
0x1859   : > { %p9886_p7 = por %p9885_p13, %p9884_p10 }
0x185b   : > { %p9887_p6 = pnand %p9886_p7, %p9880_p2 }
0x185d   : > { %9890 = shalt.err (!%p9887_p6)
}
0x185e   : > { %8987 = dma.vmem_to_hbm [thread:$0]  (%p11647_p3), %s11460_s3, 16, %s11458_s22, %s7337_s19  }
0x185f PF: > { %s11648_s8 = sld [smem:[#allocation47_spill]]  ;;  %s7361_s13 = sand.u32 1, %s9953_s27  }
0x1860   : > { %p11650_p12 = scmp.ge.s32.totalorder %s9965_s30, 2  ;;  %s7362_s10 = scalar_lea.sflag [#allocation4], %s7361_s13 }
0x1865   : > { %p11649_p4 = scmp.ne.s32.totalorder %s11648_s8, 0 }
0x1867   : > { %p9046_p8 = pnand %p11650_p12, %p11649_p4 }
0x1869   : > { %9948 = dma.done.wait (!%p9046_p8), %s7362_s10, 16  }
0x186a   : > { %9950 = vsyncadd (!%p9046_p8), %s7362_s10, 4294967280  ;;  %s11651_s30 = sld [smem:[#allocation45_spill]]  ;;  %s11652_s25 = sld [smem:[#allocation43_spill]] }
0x186b   : > { %s11653_s29 = sld [smem:[#allocation46_spill]]  ;;  %s11654_s27 = smov %s9957_s28 }
0x1870   : > { %p46_p9 = scmp.ge.s32.totalorder %s11651_s30, 4   ;;  %s11655_s28 = smov %s11652_s25 }
0x1872   :  { %48 = sbr.rel (!%p46_p9) target bundleno = 36 (0x24), region = 277 }
0x1879   :  { %7366 = vsyncpa [#allocation3], 1 }
0x187a   :  { %7368 = vsyncpa [#allocation3 + $0x1], 1 }
0x187b   :  { %7369 = vsyncpa [#allocation6], 1 }
0x187c   :  { %7371 = vsyncpa [#allocation6 + $0x1], 1 }
0x187d   :  { %7372 = vsyncpa [#allocation9], 1 }
0x187e   :  { %7374 = vsyncpa [#allocation9 + $0x1], 1 }
0x187f   :  { %7375 = vsyncpa [#allocation12], 1 }
0x1880   :  { %7377 = vsyncpa [#allocation12 + $0x1], 1 }
0x1881   :  { %7378 = vsyncpa [#allocation15], 1 }
0x1882   :  { %7379 = vsyncpa [#allocation18], 1 }
0x1883   :  { %7380 = vsyncpa [#allocation21], 1 }
0x1884   :  { %7381 = vsyncpa [#allocation24], 1 }
0x1885   :  { %7382 = vsyncpa [#allocation27], 1 }
0x1886   :  { %7383 = vsyncpa [#allocation30], 1 }
0x1887   :  { %7384 = vsyncpa [#allocation4], 1 }
0x1888   :  { %7386 = vsyncpa [#allocation4 + $0x1], 1 }

</bundles_post_ra>
